<compile_context>
chip_gen: v7x
topology: tpu7x:2x2x1
jax: 0.10.0
libtpu: 0.0.40
codegen_flags: <defaults>
</compile_context>

<pallas_src>
import numpy as np

import jax
import jax.numpy as jnp
from jax import lax
from jax.experimental import pallas as pl
from jax.experimental.pallas import tpu as pltpu

EPS = 1e-5
NEG_SLOPE = 0.3          # matches CRBlock's nn.LeakyReLU(negative_slope=0.3)
CPAD = 8                 # channel padding granule (one sublane block)
_OFFS = (-4, -3, -2, -1, 1, 2, 3, 4)   # spatial offsets with precomputed masks

# Static tap-block layout inside the packed (39, 8, 8) weight array.
_CONV_SHAPES = (("w3x3", 3, 3), ("w1x9", 1, 9), ("w9x1", 9, 1),
                ("w1x5", 1, 5), ("w5x1", 5, 1))
_CONV_BASE = {}
_nblk = 0
for _name, _kh, _kw in _CONV_SHAPES:
    _CONV_BASE[_name] = _nblk
    _nblk += _kh * _kw
_HEAD_BASE = _nblk        # 37, 38: two 8x8 blocks for the 1x1 head conv
_NBLOCKS = _nblk + 2      # 39


# ---------------------------------------------------------------------------
# Kernel
# ---------------------------------------------------------------------------
def _make_crblock_kernel(n, h, w):
    m = n * h * w

    def leaky(z):
        return jnp.where(z >= 0, z, NEG_SLOPE * z)

    def kernel(x_ref, w_ref, g_ref, b_ref, mask_ref, o_ref):
        x = x_ref[...]                                    # (CPAD, M) lane-dense

        # Hoisted 0/1 boundary masks: one (1, M) load per unique offset.
        hmask = {d: mask_ref[i:i + 1, :] for i, d in enumerate(_OFFS)}
        wmask = {d: mask_ref[8 + i:8 + i + 1, :] for i, d in enumerate(_OFFS)}

        def conv(a, name, kh, kw):
            """'same' conv (stride 1): per-tap roll + mask + 8x8 MXU accumulate.

            a: (Cin_pad, M) activations; the tap at spatial offset (dy, dx) is a
            lane roll by dy*W+dx (wrapped lanes are killed by the hoisted masks,
            which also enforce image/batch boundaries).
            """
            base = _CONV_BASE[name]
            ph, pw = (kh - 1) // 2, (kw - 1) // 2
            y = None
            for i in range(kh):
                for j in range(kw):
                    dy, dx = i - ph, j - pw
                    if dy == 0 and dx == 0:
                        tap = a
                    else:
                        s = dy * w + dx                   # lane shift of this tap
                        tap = pltpu.roll(a, shift=(-s) % m, axis=1)
                        if dy != 0:
                            tap = tap * hmask[dy]
                        if dx != 0:
                            tap = tap * wmask[dx]
                    wt = w_ref[base + i * kw + j]          # (cout=8, cin=8) block
                    contrib = jnp.dot(wt, tap, preferred_element_type=jnp.float32)
                    y = contrib if y is None else y + contrib
            return y

        inv_m = 1.0 / m

        def bn(y, stage, act):
            """Training-mode BatchNorm over N*H*W (lane axis), biased variance.

            Single-pass statistics (sum, sum-of-squares) and the affine folded
            into one scale/shift so the (8, M) epilogue is y*scale + shift.
            Padded channels have gamma=beta=0 and stay exactly zero.
            """
            mean = jnp.sum(y, axis=1, keepdims=True) * inv_m
            ex2 = jnp.sum(y * y, axis=1, keepdims=True) * inv_m
            var = jnp.maximum(ex2 - mean * mean, 0.0)
            scale = g_ref[:, stage:stage + 1] * lax.rsqrt(var + EPS)
            shift = b_ref[:, stage:stage + 1] - mean * scale
            z = y * scale + shift
            return leaky(z) if act else z

        # path1: conv3x3 -> lrelu -> conv1x9 -> lrelu -> conv9x1
        t = bn(conv(x, "w3x3", 3, 3), 0, True)
        t = bn(conv(t, "w1x9", 1, 9), 1, True)
        # The post-concat LeakyReLU is elementwise -> fused into each path tail.
        out1 = bn(conv(t, "w9x1", 9, 1), 2, True)
        # path2: conv1x5 -> lrelu -> conv5x1
        t = bn(conv(x, "w1x5", 1, 5), 3, True)
        out2 = bn(conv(t, "w5x1", 5, 1), 4, True)

        # 1x1 head conv over the (virtual) concat as two 8x8 matmuls, then
        # BatchNorm, residual add with the original input, final LeakyReLU.
        head = (jnp.dot(w_ref[_HEAD_BASE], out1, preferred_element_type=jnp.float32)
                + jnp.dot(w_ref[_HEAD_BASE + 1], out2,
                          preferred_element_type=jnp.float32))
        o_ref[...] = leaky(bn(head, 5, False) + x)

    return kernel


# ---------------------------------------------------------------------------
# One-time parameter packing (outside the hot path)
# ---------------------------------------------------------------------------
def _pack_conv_blocks(w_hwio):
    """(kh, kw, cin, cout) HWIO -> (kh*kw, CPAD, CPAD) blocks, block[t, co, ci]."""
    kh, kw, cin, cout = w_hwio.shape
    blk = jnp.zeros((kh * kw, CPAD, CPAD), jnp.float32)
    wt = jnp.transpose(w_hwio.astype(jnp.float32), (0, 1, 3, 2)).reshape(kh * kw, cout, cin)
    return blk.at[:, :cout, :cin].set(wt)


def _pack_head_blocks(w_hwio):
    """1x1 head conv (1, 1, 14, 2) -> two (CPAD, CPAD) blocks (path1 / path2 halves)."""
    w2d = w_hwio.astype(jnp.float32).reshape(14, 2)           # (cin, cout)
    blk = jnp.zeros((2, CPAD, CPAD), jnp.float32)
    blk = blk.at[0, :2, :7].set(w2d[:7].T)
    blk = blk.at[1, :2, :7].set(w2d[7:].T)
    return blk


def _pack_gb(vs):
    """Stack per-stage BN vectors into (CPAD, 6); padded channel rows are zero."""
    return jnp.stack(
        [jnp.pad(v.astype(jnp.float32), (0, CPAD - v.shape[0])) for v in vs], axis=1)


def pack_params(params):
    """Repack CRBlock parameters once; the packed arrays are reused every call."""
    p1, p2, hd = params["path1"], params["path2"], params["head"]
    w_all = jnp.concatenate([
        _pack_conv_blocks(p1["w3x3"]),
        _pack_conv_blocks(p1["w1x9"]),
        _pack_conv_blocks(p1["w9x1"]),
        _pack_conv_blocks(p2["w1x5"]),
        _pack_conv_blocks(p2["w5x1"]),
        _pack_head_blocks(hd["w1x1"]),
    ], axis=0)                                               # (39, 8, 8)
    gam = _pack_gb([p1["g3x3"], p1["g1x9"], p1["g9x1"],
                    p2["g1x5"], p2["g5x1"], hd["g1x1"]])
    bet = _pack_gb([p1["b3x3"], p1["b1x9"], p1["b9x1"],
                    p2["b1x5"], p2["b5x1"], hd["b1x1"]])
    return {"w_all": w_all, "gam": gam, "bet": bet}


def _boundary_masks(n, h, w):
    """Packed (16, M) float 0/1 masks: rows 0..7 = h offsets -4..-1,1..4,
    rows 8..15 = w offsets. Host-side numpy -> compile-time constant."""
    m = n * h * w
    pos = np.arange(m, dtype=np.int64)
    wi = pos % w
    hi = (pos // w) % h
    rows = []
    for d in _OFFS:
        rows.append(((hi + d >= 0) & (hi + d < h)).astype(np.float32))
    for d in _OFFS:
        rows.append(((wi + d >= 0) & (wi + d < w)).astype(np.float32))
    return jnp.asarray(np.stack(rows, axis=0))


# ---------------------------------------------------------------------------
# CRBlock forward: single fused pallas_call
# ---------------------------------------------------------------------------
@jax.jit
def crblock_forward(x_nchw, packed):
    x_nchw = x_nchw.astype(jnp.float32)
    n, c, h, w = x_nchw.shape
    m = n * h * w
    # BN statistics reduce over the full lane axis: require no lane padding.
    assert m % 128 == 0, "N*H*W must be a multiple of 128 (no padded lanes in BN)."

    # TODO(synk): in a full CRNet, keep activations in this lane-dense
    # (C_pad, N*H*W) layout across adjacent CRBlocks and relayout only at the
    # network boundary; here it is done per call for the standalone block.
    x_cm = jnp.transpose(x_nchw, (1, 0, 2, 3)).reshape(c, m)
    x_cm = jnp.pad(x_cm, ((0, CPAD - c), (0, 0)))

    masks = _boundary_masks(n, h, w)

    # TODO(synk): at much larger N*H*W, tile the M axis with a ("parallel",)
    # grid (two-phase sum/sumsq BatchNorm), sizing tiles against v7x's 64 MiB
    # VMEM incl. double-buffering; at this size one gridless call is fastest.
    vmem = pl.BlockSpec(memory_space=pltpu.MemorySpace.VMEM)
    out_cm = pl.pallas_call(
        _make_crblock_kernel(n, h, w),
        out_shape=jax.ShapeDtypeStruct((CPAD, m), jnp.float32),
        in_specs=[vmem] * 5,
        out_specs=vmem,
    )(x_cm, packed["w_all"], packed["gam"], packed["bet"], masks)

    # Strip channel padding and convert back to NCHW at the module boundary.
    out = out_cm[:c].reshape(c, n, h, w)
    return jnp.transpose(out, (1, 0, 2, 3))


# ---------------------------------------------------------------------------
# Pure-JAX reference (for correctness check)
# ---------------------------------------------------------------------------
def _leaky(z):
    return jnp.where(z >= 0, z, NEG_SLOPE * z)


def _conv_bn_ref(x, w, g, b):
    y = lax.conv_general_dilated(x, w, (1, 1), "SAME",
                                 dimension_numbers=("NHWC", "HWIO", "NHWC"))
    mean = y.mean(axis=(0, 1, 2))
    var = jnp.square(y - mean).mean(axis=(0, 1, 2))
    return (y - mean) * lax.rsqrt(var + EPS) * g + b


def crblock_ref(x_nchw, params):
    x = jnp.transpose(x_nchw, (0, 2, 3, 1)).astype(jnp.float32)
    identity = x
    p = params["path1"]
    t = _leaky(_conv_bn_ref(x, p["w3x3"], p["g3x3"], p["b3x3"]))
    t = _leaky(_conv_bn_ref(t, p["w1x9"], p["g1x9"], p["b1x9"]))
    out1 = _conv_bn_ref(t, p["w9x1"], p["g9x1"], p["b9x1"])
    p = params["path2"]
    t = _leaky(_conv_bn_ref(x, p["w1x5"], p["g1x5"], p["b1x5"]))
    out2 = _conv_bn_ref(t, p["w5x1"], p["g5x1"], p["b5x1"])
    cat = _leaky(jnp.concatenate([out1, out2], axis=-1))
    p = params["head"]
    out = _leaky(_conv_bn_ref(cat, p["w1x1"], p["g1x1"], p["b1x1"]) + identity)
    return jnp.transpose(out, (0, 3, 1, 2))


# ---------------------------------------------------------------------------
# Deterministic parameter construction (shapes from CRBlock.__init__)
# ---------------------------------------------------------------------------
def make_params(key):
    def conv_w(k, kh, kw, cin, cout):
        return 0.1 * jax.random.normal(k, (kh, kw, cin, cout), jnp.float32)

    def bn(k, c):
        kg, kb = jax.random.split(k)
        g = 1.0 + 0.1 * jax.random.normal(kg, (c,), jnp.float32)
        b = 0.1 * jax.random.normal(kb, (c,), jnp.float32)
        return g, b

    ks = jax.random.split(key, 12)
    g3, b3 = bn(ks[1], 7)
    g19, b19 = bn(ks[3], 7)
    g91, b91 = bn(ks[5], 7)
    g15, b15 = bn(ks[7], 7)
    g51, b51 = bn(ks[9], 7)
    g11, b11 = bn(ks[11], 2)
    return {
        "path1": {
            "w3x3": conv_w(ks[0], 3, 3, 2, 7), "g3x3": g3, "b3x3": b3,
            "w1x9": conv_w(ks[2], 1, 9, 7, 7), "g1x9": g19, "b1x9": b19,
            "w9x1": conv_w(ks[4], 9, 1, 7, 7), "g9x1": g91, "b9x1": b91,
        },
        "path2": {
            "w1x5": conv_w(ks[6], 1, 5, 2, 7), "g1x5": g15, "b1x5": b15,
            "w5x1": conv_w(ks[8], 5, 1, 7, 7), "g5x1": g51, "b5x1": b51,
        },
        "head": {
            "w1x1": conv_w(ks[10], 1, 1, 14, 2), "g1x1": g11, "b1x1": b11,
        },
    }


if __name__ == "__main__":
    key = jax.random.PRNGKey(0)
    kx, kp = jax.random.split(key)
    # Shapes consistent with the module: batch=2, in-channels=2, 16x16 spatial.
    x = jax.random.normal(kx, (2, 2, 16, 16), jnp.float32)   # NCHW, like torch
    params = make_params(kp)
    packed = pack_params(params)                             # one-time repack

    out = jax.block_until_ready(crblock_forward(x, packed))
    ref = crblock_ref(x, params)
    assert out.shape == (2, 2, 16, 16)
    if not jnp.allclose(out, ref, atol=1e-2, rtol=1e-2):
        raise AssertionError("Pallas CRBlock output mismatch vs JAX reference")
    print("KERNEL_OK")
</pallas_src>

<mosaic_0001>
module attributes {stable_mosaic.version = 11 : i64} {
  func.func @kernel(%arg0: memref<8x512xf32, #tpu.memory_space<vmem>>, %arg1: memref<39x8x8xf32, #tpu.memory_space<vmem>>, %arg2: memref<8x6xf32, #tpu.memory_space<vmem>>, %arg3: memref<8x6xf32, #tpu.memory_space<vmem>>, %arg4: memref<16x512xf32, #tpu.memory_space<vmem>>, %arg5: memref<8x512xf32, #tpu.memory_space<vmem>>) attributes {dimension_semantics = [], scalar_prefetch = 0 : i64, scratch_operands = 0 : i64, tpu.core_type = #tpu.core_type<tc>} {
    %c0 = arith.constant 0 : index
    %c0_0 = arith.constant 0 : index
    %0 = vector.load %arg0[%c0, %c0_0] : memref<8x512xf32, #tpu.memory_space<vmem>>, vector<8x512xf32>
    %c0_1 = arith.constant 0 : index
    %c0_2 = arith.constant 0 : index
    %1 = vector.load %arg4[%c0_1, %c0_2] : memref<16x512xf32, #tpu.memory_space<vmem>>, vector<1x512xf32>
    %c1 = arith.constant 1 : index
    %c0_3 = arith.constant 0 : index
    %2 = vector.load %arg4[%c1, %c0_3] : memref<16x512xf32, #tpu.memory_space<vmem>>, vector<1x512xf32>
    %c2 = arith.constant 2 : index
    %c0_4 = arith.constant 0 : index
    %3 = vector.load %arg4[%c2, %c0_4] : memref<16x512xf32, #tpu.memory_space<vmem>>, vector<1x512xf32>
    %c3 = arith.constant 3 : index
    %c0_5 = arith.constant 0 : index
    %4 = vector.load %arg4[%c3, %c0_5] : memref<16x512xf32, #tpu.memory_space<vmem>>, vector<1x512xf32>
    %c4 = arith.constant 4 : index
    %c0_6 = arith.constant 0 : index
    %5 = vector.load %arg4[%c4, %c0_6] : memref<16x512xf32, #tpu.memory_space<vmem>>, vector<1x512xf32>
    %c5 = arith.constant 5 : index
    %c0_7 = arith.constant 0 : index
    %6 = vector.load %arg4[%c5, %c0_7] : memref<16x512xf32, #tpu.memory_space<vmem>>, vector<1x512xf32>
    %c6 = arith.constant 6 : index
    %c0_8 = arith.constant 0 : index
    %7 = vector.load %arg4[%c6, %c0_8] : memref<16x512xf32, #tpu.memory_space<vmem>>, vector<1x512xf32>
    %c7 = arith.constant 7 : index
    %c0_9 = arith.constant 0 : index
    %8 = vector.load %arg4[%c7, %c0_9] : memref<16x512xf32, #tpu.memory_space<vmem>>, vector<1x512xf32>
    %c8 = arith.constant 8 : index
    %c0_10 = arith.constant 0 : index
    %9 = vector.load %arg4[%c8, %c0_10] : memref<16x512xf32, #tpu.memory_space<vmem>>, vector<1x512xf32>
    %c9 = arith.constant 9 : index
    %c0_11 = arith.constant 0 : index
    %10 = vector.load %arg4[%c9, %c0_11] : memref<16x512xf32, #tpu.memory_space<vmem>>, vector<1x512xf32>
    %c10 = arith.constant 10 : index
    %c0_12 = arith.constant 0 : index
    %11 = vector.load %arg4[%c10, %c0_12] : memref<16x512xf32, #tpu.memory_space<vmem>>, vector<1x512xf32>
    %c11 = arith.constant 11 : index
    %c0_13 = arith.constant 0 : index
    %12 = vector.load %arg4[%c11, %c0_13] : memref<16x512xf32, #tpu.memory_space<vmem>>, vector<1x512xf32>
    %c12 = arith.constant 12 : index
    %c0_14 = arith.constant 0 : index
    %13 = vector.load %arg4[%c12, %c0_14] : memref<16x512xf32, #tpu.memory_space<vmem>>, vector<1x512xf32>
    %c13 = arith.constant 13 : index
    %c0_15 = arith.constant 0 : index
    %14 = vector.load %arg4[%c13, %c0_15] : memref<16x512xf32, #tpu.memory_space<vmem>>, vector<1x512xf32>
    %c14 = arith.constant 14 : index
    %c0_16 = arith.constant 0 : index
    %15 = vector.load %arg4[%c14, %c0_16] : memref<16x512xf32, #tpu.memory_space<vmem>>, vector<1x512xf32>
    %c15 = arith.constant 15 : index
    %c0_17 = arith.constant 0 : index
    %16 = vector.load %arg4[%c15, %c0_17] : memref<16x512xf32, #tpu.memory_space<vmem>>, vector<1x512xf32>
    %c17_i32 = arith.constant 17 : i32
    %17 = tpu.dynamic_rotate %0 by %c17_i32 dim 1 : vector<8x512xf32>, i32 -> vector<8x512xf32>
    %18 = vector.broadcast %4 : vector<1x512xf32> to vector<8x512xf32>
    %19 = arith.mulf %17, %18 : vector<8x512xf32>
    %20 = vector.broadcast %12 : vector<1x512xf32> to vector<8x512xf32>
    %21 = arith.mulf %19, %20 : vector<8x512xf32>
    %c0_18 = arith.constant 0 : index
    %c0_19 = arith.constant 0 : index
    %c0_20 = arith.constant 0 : index
    %22 = vector.load %arg1[%c0_18, %c0_19, %c0_20] : memref<39x8x8xf32, #tpu.memory_space<vmem>>, vector<1x8x8xf32>
    %23 = vector.shape_cast %22 : vector<1x8x8xf32> to vector<8x8xf32>
    %cst = arith.constant dense<0.000000e+00> : vector<8x512xf32>
    %24 = tpu.matmul %23, %21, %cst {dimension_numbers = #tpu.dot_dimension_numbers<[1], [0], [0], [1], [0, 0, 1, 1], [], []>} : vector<8x8xf32>, vector<8x512xf32>, vector<8x512xf32> -> vector<8x512xf32>
    %c16_i32 = arith.constant 16 : i32
    %25 = tpu.dynamic_rotate %0 by %c16_i32 dim 1 : vector<8x512xf32>, i32 -> vector<8x512xf32>
    %26 = vector.broadcast %4 : vector<1x512xf32> to vector<8x512xf32>
    %27 = arith.mulf %25, %26 : vector<8x512xf32>
    %c1_21 = arith.constant 1 : index
    %c0_22 = arith.constant 0 : index
    %c0_23 = arith.constant 0 : index
    %28 = vector.load %arg1[%c1_21, %c0_22, %c0_23] : memref<39x8x8xf32, #tpu.memory_space<vmem>>, vector<1x8x8xf32>
    %29 = vector.shape_cast %28 : vector<1x8x8xf32> to vector<8x8xf32>
    %cst_24 = arith.constant dense<0.000000e+00> : vector<8x512xf32>
    %30 = tpu.matmul %29, %27, %cst_24 {dimension_numbers = #tpu.dot_dimension_numbers<[1], [0], [0], [1], [0, 0, 1, 1], [], []>} : vector<8x8xf32>, vector<8x512xf32>, vector<8x512xf32> -> vector<8x512xf32>
    %31 = arith.addf %24, %30 : vector<8x512xf32>
    %c15_i32 = arith.constant 15 : i32
    %32 = tpu.dynamic_rotate %0 by %c15_i32 dim 1 : vector<8x512xf32>, i32 -> vector<8x512xf32>
    %33 = vector.broadcast %4 : vector<1x512xf32> to vector<8x512xf32>
    %34 = arith.mulf %32, %33 : vector<8x512xf32>
    %35 = vector.broadcast %13 : vector<1x512xf32> to vector<8x512xf32>
    %36 = arith.mulf %34, %35 : vector<8x512xf32>
    %c2_25 = arith.constant 2 : index
    %c0_26 = arith.constant 0 : index
    %c0_27 = arith.constant 0 : index
    %37 = vector.load %arg1[%c2_25, %c0_26, %c0_27] : memref<39x8x8xf32, #tpu.memory_space<vmem>>, vector<1x8x8xf32>
    %38 = vector.shape_cast %37 : vector<1x8x8xf32> to vector<8x8xf32>
    %cst_28 = arith.constant dense<0.000000e+00> : vector<8x512xf32>
    %39 = tpu.matmul %38, %36, %cst_28 {dimension_numbers = #tpu.dot_dimension_numbers<[1], [0], [0], [1], [0, 0, 1, 1], [], []>} : vector<8x8xf32>, vector<8x512xf32>, vector<8x512xf32> -> vector<8x512xf32>
    %40 = arith.addf %31, %39 : vector<8x512xf32>
    %c1_i32 = arith.constant 1 : i32
    %41 = tpu.dynamic_rotate %0 by %c1_i32 dim 1 : vector<8x512xf32>, i32 -> vector<8x512xf32>
    %42 = vector.broadcast %12 : vector<1x512xf32> to vector<8x512xf32>
    %43 = arith.mulf %41, %42 : vector<8x512xf32>
    %c3_29 = arith.constant 3 : index
    %c0_30 = arith.constant 0 : index
    %c0_31 = arith.constant 0 : index
    %44 = vector.load %arg1[%c3_29, %c0_30, %c0_31] : memref<39x8x8xf32, #tpu.memory_space<vmem>>, vector<1x8x8xf32>
    %45 = vector.shape_cast %44 : vector<1x8x8xf32> to vector<8x8xf32>
    %cst_32 = arith.constant dense<0.000000e+00> : vector<8x512xf32>
    %46 = tpu.matmul %45, %43, %cst_32 {dimension_numbers = #tpu.dot_dimension_numbers<[1], [0], [0], [1], [0, 0, 1, 1], [], []>} : vector<8x8xf32>, vector<8x512xf32>, vector<8x512xf32> -> vector<8x512xf32>
    %47 = arith.addf %40, %46 : vector<8x512xf32>
    %c4_33 = arith.constant 4 : index
    %c0_34 = arith.constant 0 : index
    %c0_35 = arith.constant 0 : index
    %48 = vector.load %arg1[%c4_33, %c0_34, %c0_35] : memref<39x8x8xf32, #tpu.memory_space<vmem>>, vector<1x8x8xf32>
    %49 = vector.shape_cast %48 : vector<1x8x8xf32> to vector<8x8xf32>
    %cst_36 = arith.constant dense<0.000000e+00> : vector<8x512xf32>
    %50 = tpu.matmul %49, %0, %cst_36 {dimension_numbers = #tpu.dot_dimension_numbers<[1], [0], [0], [1], [0, 0, 1, 1], [], []>} : vector<8x8xf32>, vector<8x512xf32>, vector<8x512xf32> -> vector<8x512xf32>
    %51 = arith.addf %47, %50 : vector<8x512xf32>
    %c511_i32 = arith.constant 511 : i32
    %52 = tpu.dynamic_rotate %0 by %c511_i32 dim 1 : vector<8x512xf32>, i32 -> vector<8x512xf32>
    %53 = vector.broadcast %13 : vector<1x512xf32> to vector<8x512xf32>
    %54 = arith.mulf %52, %53 : vector<8x512xf32>
    %c5_37 = arith.constant 5 : index
    %c0_38 = arith.constant 0 : index
    %c0_39 = arith.constant 0 : index
    %55 = vector.load %arg1[%c5_37, %c0_38, %c0_39] : memref<39x8x8xf32, #tpu.memory_space<vmem>>, vector<1x8x8xf32>
    %56 = vector.shape_cast %55 : vector<1x8x8xf32> to vector<8x8xf32>
    %cst_40 = arith.constant dense<0.000000e+00> : vector<8x512xf32>
    %57 = tpu.matmul %56, %54, %cst_40 {dimension_numbers = #tpu.dot_dimension_numbers<[1], [0], [0], [1], [0, 0, 1, 1], [], []>} : vector<8x8xf32>, vector<8x512xf32>, vector<8x512xf32> -> vector<8x512xf32>
    %58 = arith.addf %51, %57 : vector<8x512xf32>
    %c497_i32 = arith.constant 497 : i32
    %59 = tpu.dynamic_rotate %0 by %c497_i32 dim 1 : vector<8x512xf32>, i32 -> vector<8x512xf32>
    %60 = vector.broadcast %5 : vector<1x512xf32> to vector<8x512xf32>
    %61 = arith.mulf %59, %60 : vector<8x512xf32>
    %62 = vector.broadcast %12 : vector<1x512xf32> to vector<8x512xf32>
    %63 = arith.mulf %61, %62 : vector<8x512xf32>
    %c6_41 = arith.constant 6 : index
    %c0_42 = arith.constant 0 : index
    %c0_43 = arith.constant 0 : index
    %64 = vector.load %arg1[%c6_41, %c0_42, %c0_43] : memref<39x8x8xf32, #tpu.memory_space<vmem>>, vector<1x8x8xf32>
    %65 = vector.shape_cast %64 : vector<1x8x8xf32> to vector<8x8xf32>
    %cst_44 = arith.constant dense<0.000000e+00> : vector<8x512xf32>
    %66 = tpu.matmul %65, %63, %cst_44 {dimension_numbers = #tpu.dot_dimension_numbers<[1], [0], [0], [1], [0, 0, 1, 1], [], []>} : vector<8x8xf32>, vector<8x512xf32>, vector<8x512xf32> -> vector<8x512xf32>
    %67 = arith.addf %58, %66 : vector<8x512xf32>
    %c496_i32 = arith.constant 496 : i32
    %68 = tpu.dynamic_rotate %0 by %c496_i32 dim 1 : vector<8x512xf32>, i32 -> vector<8x512xf32>
    %69 = vector.broadcast %5 : vector<1x512xf32> to vector<8x512xf32>
    %70 = arith.mulf %68, %69 : vector<8x512xf32>
    %c7_45 = arith.constant 7 : index
    %c0_46 = arith.constant 0 : index
    %c0_47 = arith.constant 0 : index
    %71 = vector.load %arg1[%c7_45, %c0_46, %c0_47] : memref<39x8x8xf32, #tpu.memory_space<vmem>>, vector<1x8x8xf32>
    %72 = vector.shape_cast %71 : vector<1x8x8xf32> to vector<8x8xf32>
    %cst_48 = arith.constant dense<0.000000e+00> : vector<8x512xf32>
    %73 = tpu.matmul %72, %70, %cst_48 {dimension_numbers = #tpu.dot_dimension_numbers<[1], [0], [0], [1], [0, 0, 1, 1], [], []>} : vector<8x8xf32>, vector<8x512xf32>, vector<8x512xf32> -> vector<8x512xf32>
    %74 = arith.addf %67, %73 : vector<8x512xf32>
    %c495_i32 = arith.constant 495 : i32
    %75 = tpu.dynamic_rotate %0 by %c495_i32 dim 1 : vector<8x512xf32>, i32 -> vector<8x512xf32>
    %76 = vector.broadcast %5 : vector<1x512xf32> to vector<8x512xf32>
    %77 = arith.mulf %75, %76 : vector<8x512xf32>
    %78 = vector.broadcast %13 : vector<1x512xf32> to vector<8x512xf32>
    %79 = arith.mulf %77, %78 : vector<8x512xf32>
    %c8_49 = arith.constant 8 : index
    %c0_50 = arith.constant 0 : index
    %c0_51 = arith.constant 0 : index
    %80 = vector.load %arg1[%c8_49, %c0_50, %c0_51] : memref<39x8x8xf32, #tpu.memory_space<vmem>>, vector<1x8x8xf32>
    %81 = vector.shape_cast %80 : vector<1x8x8xf32> to vector<8x8xf32>
    %cst_52 = arith.constant dense<0.000000e+00> : vector<8x512xf32>
    %82 = tpu.matmul %81, %79, %cst_52 {dimension_numbers = #tpu.dot_dimension_numbers<[1], [0], [0], [1], [0, 0, 1, 1], [], []>} : vector<8x8xf32>, vector<8x512xf32>, vector<8x512xf32> -> vector<8x512xf32>
    %83 = arith.addf %74, %82 : vector<8x512xf32>
    %cst_53 = arith.constant dense<0.000000e+00> : vector<8xf32>
    %84 = vector.multi_reduction <add>, %83, %cst_53 [1] : vector<8x512xf32> to vector<8xf32>
    %85 = vector.shape_cast %84 : vector<8xf32> to vector<8x1xf32>
    %cst_54 = arith.constant 0.001953125 : f32
    %86 = vector.broadcast %cst_54 : f32 to vector<8x1xf32>
    %87 = arith.mulf %85, %86 : vector<8x1xf32>
    %88 = arith.mulf %83, %83 : vector<8x512xf32>
    %cst_55 = arith.constant dense<0.000000e+00> : vector<8xf32>
    %89 = vector.multi_reduction <add>, %88, %cst_55 [1] : vector<8x512xf32> to vector<8xf32>
    %90 = vector.shape_cast %89 : vector<8xf32> to vector<8x1xf32>
    %cst_56 = arith.constant 0.001953125 : f32
    %91 = vector.broadcast %cst_56 : f32 to vector<8x1xf32>
    %92 = arith.mulf %90, %91 : vector<8x1xf32>
    %93 = arith.mulf %87, %87 : vector<8x1xf32>
    %94 = arith.subf %92, %93 : vector<8x1xf32>
    %cst_57 = arith.constant 0.000000e+00 : f32
    %95 = vector.broadcast %cst_57 : f32 to vector<8x1xf32>
    %96 = arith.maximumf %94, %95 : vector<8x1xf32>
    %c0_58 = arith.constant 0 : index
    %c0_59 = arith.constant 0 : index
    %97 = vector.load %arg2[%c0_58, %c0_59] : memref<8x6xf32, #tpu.memory_space<vmem>>, vector<8x1xf32>
    %cst_60 = arith.constant 9.99999974E-6 : f32
    %98 = vector.broadcast %cst_60 : f32 to vector<8x1xf32>
    %99 = arith.addf %96, %98 : vector<8x1xf32>
    %100 = math.rsqrt %99 : vector<8x1xf32>
    %101 = arith.mulf %97, %100 : vector<8x1xf32>
    %c0_61 = arith.constant 0 : index
    %c0_62 = arith.constant 0 : index
    %102 = vector.load %arg3[%c0_61, %c0_62] : memref<8x6xf32, #tpu.memory_space<vmem>>, vector<8x1xf32>
    %103 = arith.mulf %87, %101 : vector<8x1xf32>
    %104 = arith.subf %102, %103 : vector<8x1xf32>
    %105 = vector.broadcast %101 : vector<8x1xf32> to vector<8x512xf32>
    %106 = arith.mulf %83, %105 : vector<8x512xf32>
    %107 = vector.broadcast %104 : vector<8x1xf32> to vector<8x512xf32>
    %108 = arith.addf %106, %107 : vector<8x512xf32>
    %cst_63 = arith.constant 0.000000e+00 : f32
    %109 = vector.broadcast %cst_63 : f32 to vector<8x512xf32>
    %110 = arith.cmpf oge, %108, %109 : vector<8x512xf32>
    %cst_64 = arith.constant 3.000000e-01 : f32
    %111 = vector.broadcast %cst_64 : f32 to vector<8x512xf32>
    %112 = arith.mulf %111, %108 : vector<8x512xf32>
    %113 = arith.select %110, %108, %112 : vector<8x512xi1>, vector<8x512xf32>
    %c4_i32 = arith.constant 4 : i32
    %114 = tpu.dynamic_rotate %113 by %c4_i32 dim 1 : vector<8x512xf32>, i32 -> vector<8x512xf32>
    %115 = vector.broadcast %9 : vector<1x512xf32> to vector<8x512xf32>
    %116 = arith.mulf %114, %115 : vector<8x512xf32>
    %c9_65 = arith.constant 9 : index
    %c0_66 = arith.constant 0 : index
    %c0_67 = arith.constant 0 : index
    %117 = vector.load %arg1[%c9_65, %c0_66, %c0_67] : memref<39x8x8xf32, #tpu.memory_space<vmem>>, vector<1x8x8xf32>
    %118 = vector.shape_cast %117 : vector<1x8x8xf32> to vector<8x8xf32>
    %cst_68 = arith.constant dense<0.000000e+00> : vector<8x512xf32>
    %119 = tpu.matmul %118, %116, %cst_68 {dimension_numbers = #tpu.dot_dimension_numbers<[1], [0], [0], [1], [0, 0, 1, 1], [], []>} : vector<8x8xf32>, vector<8x512xf32>, vector<8x512xf32> -> vector<8x512xf32>
    %c3_i32 = arith.constant 3 : i32
    %120 = tpu.dynamic_rotate %113 by %c3_i32 dim 1 : vector<8x512xf32>, i32 -> vector<8x512xf32>
    %121 = vector.broadcast %10 : vector<1x512xf32> to vector<8x512xf32>
    %122 = arith.mulf %120, %121 : vector<8x512xf32>
    %c10_69 = arith.constant 10 : index
    %c0_70 = arith.constant 0 : index
    %c0_71 = arith.constant 0 : index
    %123 = vector.load %arg1[%c10_69, %c0_70, %c0_71] : memref<39x8x8xf32, #tpu.memory_space<vmem>>, vector<1x8x8xf32>
    %124 = vector.shape_cast %123 : vector<1x8x8xf32> to vector<8x8xf32>
    %cst_72 = arith.constant dense<0.000000e+00> : vector<8x512xf32>
    %125 = tpu.matmul %124, %122, %cst_72 {dimension_numbers = #tpu.dot_dimension_numbers<[1], [0], [0], [1], [0, 0, 1, 1], [], []>} : vector<8x8xf32>, vector<8x512xf32>, vector<8x512xf32> -> vector<8x512xf32>
    %126 = arith.addf %119, %125 : vector<8x512xf32>
    %c2_i32 = arith.constant 2 : i32
    %127 = tpu.dynamic_rotate %113 by %c2_i32 dim 1 : vector<8x512xf32>, i32 -> vector<8x512xf32>
    %128 = vector.broadcast %11 : vector<1x512xf32> to vector<8x512xf32>
    %129 = arith.mulf %127, %128 : vector<8x512xf32>
    %c11_73 = arith.constant 11 : index
    %c0_74 = arith.constant 0 : index
    %c0_75 = arith.constant 0 : index
    %130 = vector.load %arg1[%c11_73, %c0_74, %c0_75] : memref<39x8x8xf32, #tpu.memory_space<vmem>>, vector<1x8x8xf32>
    %131 = vector.shape_cast %130 : vector<1x8x8xf32> to vector<8x8xf32>
    %cst_76 = arith.constant dense<0.000000e+00> : vector<8x512xf32>
    %132 = tpu.matmul %131, %129, %cst_76 {dimension_numbers = #tpu.dot_dimension_numbers<[1], [0], [0], [1], [0, 0, 1, 1], [], []>} : vector<8x8xf32>, vector<8x512xf32>, vector<8x512xf32> -> vector<8x512xf32>
    %133 = arith.addf %126, %132 : vector<8x512xf32>
    %c1_i32_77 = arith.constant 1 : i32
    %134 = tpu.dynamic_rotate %113 by %c1_i32_77 dim 1 : vector<8x512xf32>, i32 -> vector<8x512xf32>
    %135 = vector.broadcast %12 : vector<1x512xf32> to vector<8x512xf32>
    %136 = arith.mulf %134, %135 : vector<8x512xf32>
    %c12_78 = arith.constant 12 : index
    %c0_79 = arith.constant 0 : index
    %c0_80 = arith.constant 0 : index
    %137 = vector.load %arg1[%c12_78, %c0_79, %c0_80] : memref<39x8x8xf32, #tpu.memory_space<vmem>>, vector<1x8x8xf32>
    %138 = vector.shape_cast %137 : vector<1x8x8xf32> to vector<8x8xf32>
    %cst_81 = arith.constant dense<0.000000e+00> : vector<8x512xf32>
    %139 = tpu.matmul %138, %136, %cst_81 {dimension_numbers = #tpu.dot_dimension_numbers<[1], [0], [0], [1], [0, 0, 1, 1], [], []>} : vector<8x8xf32>, vector<8x512xf32>, vector<8x512xf32> -> vector<8x512xf32>
    %140 = arith.addf %133, %139 : vector<8x512xf32>
    %c13_82 = arith.constant 13 : index
    %c0_83 = arith.constant 0 : index
    %c0_84 = arith.constant 0 : index
    %141 = vector.load %arg1[%c13_82, %c0_83, %c0_84] : memref<39x8x8xf32, #tpu.memory_space<vmem>>, vector<1x8x8xf32>
    %142 = vector.shape_cast %141 : vector<1x8x8xf32> to vector<8x8xf32>
    %cst_85 = arith.constant dense<0.000000e+00> : vector<8x512xf32>
    %143 = tpu.matmul %142, %113, %cst_85 {dimension_numbers = #tpu.dot_dimension_numbers<[1], [0], [0], [1], [0, 0, 1, 1], [], []>} : vector<8x8xf32>, vector<8x512xf32>, vector<8x512xf32> -> vector<8x512xf32>
    %144 = arith.addf %140, %143 : vector<8x512xf32>
    %c511_i32_86 = arith.constant 511 : i32
    %145 = tpu.dynamic_rotate %113 by %c511_i32_86 dim 1 : vector<8x512xf32>, i32 -> vector<8x512xf32>
    %146 = vector.broadcast %13 : vector<1x512xf32> to vector<8x512xf32>
    %147 = arith.mulf %145, %146 : vector<8x512xf32>
    %c14_87 = arith.constant 14 : index
    %c0_88 = arith.constant 0 : index
    %c0_89 = arith.constant 0 : index
    %148 = vector.load %arg1[%c14_87, %c0_88, %c0_89] : memref<39x8x8xf32, #tpu.memory_space<vmem>>, vector<1x8x8xf32>
    %149 = vector.shape_cast %148 : vector<1x8x8xf32> to vector<8x8xf32>
    %cst_90 = arith.constant dense<0.000000e+00> : vector<8x512xf32>
    %150 = tpu.matmul %149, %147, %cst_90 {dimension_numbers = #tpu.dot_dimension_numbers<[1], [0], [0], [1], [0, 0, 1, 1], [], []>} : vector<8x8xf32>, vector<8x512xf32>, vector<8x512xf32> -> vector<8x512xf32>
    %151 = arith.addf %144, %150 : vector<8x512xf32>
    %c510_i32 = arith.constant 510 : i32
    %152 = tpu.dynamic_rotate %113 by %c510_i32 dim 1 : vector<8x512xf32>, i32 -> vector<8x512xf32>
    %153 = vector.broadcast %14 : vector<1x512xf32> to vector<8x512xf32>
    %154 = arith.mulf %152, %153 : vector<8x512xf32>
    %c15_91 = arith.constant 15 : index
    %c0_92 = arith.constant 0 : index
    %c0_93 = arith.constant 0 : index
    %155 = vector.load %arg1[%c15_91, %c0_92, %c0_93] : memref<39x8x8xf32, #tpu.memory_space<vmem>>, vector<1x8x8xf32>
    %156 = vector.shape_cast %155 : vector<1x8x8xf32> to vector<8x8xf32>
    %cst_94 = arith.constant dense<0.000000e+00> : vector<8x512xf32>
    %157 = tpu.matmul %156, %154, %cst_94 {dimension_numbers = #tpu.dot_dimension_numbers<[1], [0], [0], [1], [0, 0, 1, 1], [], []>} : vector<8x8xf32>, vector<8x512xf32>, vector<8x512xf32> -> vector<8x512xf32>
    %158 = arith.addf %151, %157 : vector<8x512xf32>
    %c509_i32 = arith.constant 509 : i32
    %159 = tpu.dynamic_rotate %113 by %c509_i32 dim 1 : vector<8x512xf32>, i32 -> vector<8x512xf32>
    %160 = vector.broadcast %15 : vector<1x512xf32> to vector<8x512xf32>
    %161 = arith.mulf %159, %160 : vector<8x512xf32>
    %c16 = arith.constant 16 : index
    %c0_95 = arith.constant 0 : index
    %c0_96 = arith.constant 0 : index
    %162 = vector.load %arg1[%c16, %c0_95, %c0_96] : memref<39x8x8xf32, #tpu.memory_space<vmem>>, vector<1x8x8xf32>
    %163 = vector.shape_cast %162 : vector<1x8x8xf32> to vector<8x8xf32>
    %cst_97 = arith.constant dense<0.000000e+00> : vector<8x512xf32>
    %164 = tpu.matmul %163, %161, %cst_97 {dimension_numbers = #tpu.dot_dimension_numbers<[1], [0], [0], [1], [0, 0, 1, 1], [], []>} : vector<8x8xf32>, vector<8x512xf32>, vector<8x512xf32> -> vector<8x512xf32>
    %165 = arith.addf %158, %164 : vector<8x512xf32>
    %c508_i32 = arith.constant 508 : i32
    %166 = tpu.dynamic_rotate %113 by %c508_i32 dim 1 : vector<8x512xf32>, i32 -> vector<8x512xf32>
    %167 = vector.broadcast %16 : vector<1x512xf32> to vector<8x512xf32>
    %168 = arith.mulf %166, %167 : vector<8x512xf32>
    %c17 = arith.constant 17 : index
    %c0_98 = arith.constant 0 : index
    %c0_99 = arith.constant 0 : index
    %169 = vector.load %arg1[%c17, %c0_98, %c0_99] : memref<39x8x8xf32, #tpu.memory_space<vmem>>, vector<1x8x8xf32>
    %170 = vector.shape_cast %169 : vector<1x8x8xf32> to vector<8x8xf32>
    %cst_100 = arith.constant dense<0.000000e+00> : vector<8x512xf32>
    %171 = tpu.matmul %170, %168, %cst_100 {dimension_numbers = #tpu.dot_dimension_numbers<[1], [0], [0], [1], [0, 0, 1, 1], [], []>} : vector<8x8xf32>, vector<8x512xf32>, vector<8x512xf32> -> vector<8x512xf32>
    %172 = arith.addf %165, %171 : vector<8x512xf32>
    %cst_101 = arith.constant dense<0.000000e+00> : vector<8xf32>
    %173 = vector.multi_reduction <add>, %172, %cst_101 [1] : vector<8x512xf32> to vector<8xf32>
    %174 = vector.shape_cast %173 : vector<8xf32> to vector<8x1xf32>
    %cst_102 = arith.constant 0.001953125 : f32
    %175 = vector.broadcast %cst_102 : f32 to vector<8x1xf32>
    %176 = arith.mulf %174, %175 : vector<8x1xf32>
    %177 = arith.mulf %172, %172 : vector<8x512xf32>
    %cst_103 = arith.constant dense<0.000000e+00> : vector<8xf32>
    %178 = vector.multi_reduction <add>, %177, %cst_103 [1] : vector<8x512xf32> to vector<8xf32>
    %179 = vector.shape_cast %178 : vector<8xf32> to vector<8x1xf32>
    %cst_104 = arith.constant 0.001953125 : f32
    %180 = vector.broadcast %cst_104 : f32 to vector<8x1xf32>
    %181 = arith.mulf %179, %180 : vector<8x1xf32>
    %182 = arith.mulf %176, %176 : vector<8x1xf32>
    %183 = arith.subf %181, %182 : vector<8x1xf32>
    %cst_105 = arith.constant 0.000000e+00 : f32
    %184 = vector.broadcast %cst_105 : f32 to vector<8x1xf32>
    %185 = arith.maximumf %183, %184 : vector<8x1xf32>
    %c0_106 = arith.constant 0 : index
    %c1_107 = arith.constant 1 : index
    %186 = vector.load %arg2[%c0_106, %c1_107] : memref<8x6xf32, #tpu.memory_space<vmem>>, vector<8x1xf32>
    %cst_108 = arith.constant 9.99999974E-6 : f32
    %187 = vector.broadcast %cst_108 : f32 to vector<8x1xf32>
    %188 = arith.addf %185, %187 : vector<8x1xf32>
    %189 = math.rsqrt %188 : vector<8x1xf32>
    %190 = arith.mulf %186, %189 : vector<8x1xf32>
    %c0_109 = arith.constant 0 : index
    %c1_110 = arith.constant 1 : index
    %191 = vector.load %arg3[%c0_109, %c1_110] : memref<8x6xf32, #tpu.memory_space<vmem>>, vector<8x1xf32>
    %192 = arith.mulf %176, %190 : vector<8x1xf32>
    %193 = arith.subf %191, %192 : vector<8x1xf32>
    %194 = vector.broadcast %190 : vector<8x1xf32> to vector<8x512xf32>
    %195 = arith.mulf %172, %194 : vector<8x512xf32>
    %196 = vector.broadcast %193 : vector<8x1xf32> to vector<8x512xf32>
    %197 = arith.addf %195, %196 : vector<8x512xf32>
    %cst_111 = arith.constant 0.000000e+00 : f32
    %198 = vector.broadcast %cst_111 : f32 to vector<8x512xf32>
    %199 = arith.cmpf oge, %197, %198 : vector<8x512xf32>
    %cst_112 = arith.constant 3.000000e-01 : f32
    %200 = vector.broadcast %cst_112 : f32 to vector<8x512xf32>
    %201 = arith.mulf %200, %197 : vector<8x512xf32>
    %202 = arith.select %199, %197, %201 : vector<8x512xi1>, vector<8x512xf32>
    %c64_i32 = arith.constant 64 : i32
    %203 = tpu.dynamic_rotate %202 by %c64_i32 dim 1 : vector<8x512xf32>, i32 -> vector<8x512xf32>
    %204 = vector.broadcast %1 : vector<1x512xf32> to vector<8x512xf32>
    %205 = arith.mulf %203, %204 : vector<8x512xf32>
    %c18 = arith.constant 18 : index
    %c0_113 = arith.constant 0 : index
    %c0_114 = arith.constant 0 : index
    %206 = vector.load %arg1[%c18, %c0_113, %c0_114] : memref<39x8x8xf32, #tpu.memory_space<vmem>>, vector<1x8x8xf32>
    %207 = vector.shape_cast %206 : vector<1x8x8xf32> to vector<8x8xf32>
    %cst_115 = arith.constant dense<0.000000e+00> : vector<8x512xf32>
    %208 = tpu.matmul %207, %205, %cst_115 {dimension_numbers = #tpu.dot_dimension_numbers<[1], [0], [0], [1], [0, 0, 1, 1], [], []>} : vector<8x8xf32>, vector<8x512xf32>, vector<8x512xf32> -> vector<8x512xf32>
    %c48_i32 = arith.constant 48 : i32
    %209 = tpu.dynamic_rotate %202 by %c48_i32 dim 1 : vector<8x512xf32>, i32 -> vector<8x512xf32>
    %210 = vector.broadcast %2 : vector<1x512xf32> to vector<8x512xf32>
    %211 = arith.mulf %209, %210 : vector<8x512xf32>
    %c19 = arith.constant 19 : index
    %c0_116 = arith.constant 0 : index
    %c0_117 = arith.constant 0 : index
    %212 = vector.load %arg1[%c19, %c0_116, %c0_117] : memref<39x8x8xf32, #tpu.memory_space<vmem>>, vector<1x8x8xf32>
    %213 = vector.shape_cast %212 : vector<1x8x8xf32> to vector<8x8xf32>
    %cst_118 = arith.constant dense<0.000000e+00> : vector<8x512xf32>
    %214 = tpu.matmul %213, %211, %cst_118 {dimension_numbers = #tpu.dot_dimension_numbers<[1], [0], [0], [1], [0, 0, 1, 1], [], []>} : vector<8x8xf32>, vector<8x512xf32>, vector<8x512xf32> -> vector<8x512xf32>
    %215 = arith.addf %208, %214 : vector<8x512xf32>
    %c32_i32 = arith.constant 32 : i32
    %216 = tpu.dynamic_rotate %202 by %c32_i32 dim 1 : vector<8x512xf32>, i32 -> vector<8x512xf32>
    %217 = vector.broadcast %3 : vector<1x512xf32> to vector<8x512xf32>
    %218 = arith.mulf %216, %217 : vector<8x512xf32>
    %c20 = arith.constant 20 : index
    %c0_119 = arith.constant 0 : index
    %c0_120 = arith.constant 0 : index
    %219 = vector.load %arg1[%c20, %c0_119, %c0_120] : memref<39x8x8xf32, #tpu.memory_space<vmem>>, vector<1x8x8xf32>
    %220 = vector.shape_cast %219 : vector<1x8x8xf32> to vector<8x8xf32>
    %cst_121 = arith.constant dense<0.000000e+00> : vector<8x512xf32>
    %221 = tpu.matmul %220, %218, %cst_121 {dimension_numbers = #tpu.dot_dimension_numbers<[1], [0], [0], [1], [0, 0, 1, 1], [], []>} : vector<8x8xf32>, vector<8x512xf32>, vector<8x512xf32> -> vector<8x512xf32>
    %222 = arith.addf %215, %221 : vector<8x512xf32>
    %c16_i32_122 = arith.constant 16 : i32
    %223 = tpu.dynamic_rotate %202 by %c16_i32_122 dim 1 : vector<8x512xf32>, i32 -> vector<8x512xf32>
    %224 = vector.broadcast %4 : vector<1x512xf32> to vector<8x512xf32>
    %225 = arith.mulf %223, %224 : vector<8x512xf32>
    %c21 = arith.constant 21 : index
    %c0_123 = arith.constant 0 : index
    %c0_124 = arith.constant 0 : index
    %226 = vector.load %arg1[%c21, %c0_123, %c0_124] : memref<39x8x8xf32, #tpu.memory_space<vmem>>, vector<1x8x8xf32>
    %227 = vector.shape_cast %226 : vector<1x8x8xf32> to vector<8x8xf32>
    %cst_125 = arith.constant dense<0.000000e+00> : vector<8x512xf32>
    %228 = tpu.matmul %227, %225, %cst_125 {dimension_numbers = #tpu.dot_dimension_numbers<[1], [0], [0], [1], [0, 0, 1, 1], [], []>} : vector<8x8xf32>, vector<8x512xf32>, vector<8x512xf32> -> vector<8x512xf32>
    %229 = arith.addf %222, %228 : vector<8x512xf32>
    %c22 = arith.constant 22 : index
    %c0_126 = arith.constant 0 : index
    %c0_127 = arith.constant 0 : index
    %230 = vector.load %arg1[%c22, %c0_126, %c0_127] : memref<39x8x8xf32, #tpu.memory_space<vmem>>, vector<1x8x8xf32>
    %231 = vector.shape_cast %230 : vector<1x8x8xf32> to vector<8x8xf32>
    %cst_128 = arith.constant dense<0.000000e+00> : vector<8x512xf32>
    %232 = tpu.matmul %231, %202, %cst_128 {dimension_numbers = #tpu.dot_dimension_numbers<[1], [0], [0], [1], [0, 0, 1, 1], [], []>} : vector<8x8xf32>, vector<8x512xf32>, vector<8x512xf32> -> vector<8x512xf32>
    %233 = arith.addf %229, %232 : vector<8x512xf32>
    %c496_i32_129 = arith.constant 496 : i32
    %234 = tpu.dynamic_rotate %202 by %c496_i32_129 dim 1 : vector<8x512xf32>, i32 -> vector<8x512xf32>
    %235 = vector.broadcast %5 : vector<1x512xf32> to vector<8x512xf32>
    %236 = arith.mulf %234, %235 : vector<8x512xf32>
    %c23 = arith.constant 23 : index
    %c0_130 = arith.constant 0 : index
    %c0_131 = arith.constant 0 : index
    %237 = vector.load %arg1[%c23, %c0_130, %c0_131] : memref<39x8x8xf32, #tpu.memory_space<vmem>>, vector<1x8x8xf32>
    %238 = vector.shape_cast %237 : vector<1x8x8xf32> to vector<8x8xf32>
    %cst_132 = arith.constant dense<0.000000e+00> : vector<8x512xf32>
    %239 = tpu.matmul %238, %236, %cst_132 {dimension_numbers = #tpu.dot_dimension_numbers<[1], [0], [0], [1], [0, 0, 1, 1], [], []>} : vector<8x8xf32>, vector<8x512xf32>, vector<8x512xf32> -> vector<8x512xf32>
    %240 = arith.addf %233, %239 : vector<8x512xf32>
    %c480_i32 = arith.constant 480 : i32
    %241 = tpu.dynamic_rotate %202 by %c480_i32 dim 1 : vector<8x512xf32>, i32 -> vector<8x512xf32>
    %242 = vector.broadcast %6 : vector<1x512xf32> to vector<8x512xf32>
    %243 = arith.mulf %241, %242 : vector<8x512xf32>
    %c24 = arith.constant 24 : index
    %c0_133 = arith.constant 0 : index
    %c0_134 = arith.constant 0 : index
    %244 = vector.load %arg1[%c24, %c0_133, %c0_134] : memref<39x8x8xf32, #tpu.memory_space<vmem>>, vector<1x8x8xf32>
    %245 = vector.shape_cast %244 : vector<1x8x8xf32> to vector<8x8xf32>
    %cst_135 = arith.constant dense<0.000000e+00> : vector<8x512xf32>
    %246 = tpu.matmul %245, %243, %cst_135 {dimension_numbers = #tpu.dot_dimension_numbers<[1], [0], [0], [1], [0, 0, 1, 1], [], []>} : vector<8x8xf32>, vector<8x512xf32>, vector<8x512xf32> -> vector<8x512xf32>
    %247 = arith.addf %240, %246 : vector<8x512xf32>
    %c464_i32 = arith.constant 464 : i32
    %248 = tpu.dynamic_rotate %202 by %c464_i32 dim 1 : vector<8x512xf32>, i32 -> vector<8x512xf32>
    %249 = vector.broadcast %7 : vector<1x512xf32> to vector<8x512xf32>
    %250 = arith.mulf %248, %249 : vector<8x512xf32>
    %c25 = arith.constant 25 : index
    %c0_136 = arith.constant 0 : index
    %c0_137 = arith.constant 0 : index
    %251 = vector.load %arg1[%c25, %c0_136, %c0_137] : memref<39x8x8xf32, #tpu.memory_space<vmem>>, vector<1x8x8xf32>
    %252 = vector.shape_cast %251 : vector<1x8x8xf32> to vector<8x8xf32>
    %cst_138 = arith.constant dense<0.000000e+00> : vector<8x512xf32>
    %253 = tpu.matmul %252, %250, %cst_138 {dimension_numbers = #tpu.dot_dimension_numbers<[1], [0], [0], [1], [0, 0, 1, 1], [], []>} : vector<8x8xf32>, vector<8x512xf32>, vector<8x512xf32> -> vector<8x512xf32>
    %254 = arith.addf %247, %253 : vector<8x512xf32>
    %c448_i32 = arith.constant 448 : i32
    %255 = tpu.dynamic_rotate %202 by %c448_i32 dim 1 : vector<8x512xf32>, i32 -> vector<8x512xf32>
    %256 = vector.broadcast %8 : vector<1x512xf32> to vector<8x512xf32>
    %257 = arith.mulf %255, %256 : vector<8x512xf32>
    %c26 = arith.constant 26 : index
    %c0_139 = arith.constant 0 : index
    %c0_140 = arith.constant 0 : index
    %258 = vector.load %arg1[%c26, %c0_139, %c0_140] : memref<39x8x8xf32, #tpu.memory_space<vmem>>, vector<1x8x8xf32>
    %259 = vector.shape_cast %258 : vector<1x8x8xf32> to vector<8x8xf32>
    %cst_141 = arith.constant dense<0.000000e+00> : vector<8x512xf32>
    %260 = tpu.matmul %259, %257, %cst_141 {dimension_numbers = #tpu.dot_dimension_numbers<[1], [0], [0], [1], [0, 0, 1, 1], [], []>} : vector<8x8xf32>, vector<8x512xf32>, vector<8x512xf32> -> vector<8x512xf32>
    %261 = arith.addf %254, %260 : vector<8x512xf32>
    %cst_142 = arith.constant dense<0.000000e+00> : vector<8xf32>
    %262 = vector.multi_reduction <add>, %261, %cst_142 [1] : vector<8x512xf32> to vector<8xf32>
    %263 = vector.shape_cast %262 : vector<8xf32> to vector<8x1xf32>
    %cst_143 = arith.constant 0.001953125 : f32
    %264 = vector.broadcast %cst_143 : f32 to vector<8x1xf32>
    %265 = arith.mulf %263, %264 : vector<8x1xf32>
    %266 = arith.mulf %261, %261 : vector<8x512xf32>
    %cst_144 = arith.constant dense<0.000000e+00> : vector<8xf32>
    %267 = vector.multi_reduction <add>, %266, %cst_144 [1] : vector<8x512xf32> to vector<8xf32>
    %268 = vector.shape_cast %267 : vector<8xf32> to vector<8x1xf32>
    %cst_145 = arith.constant 0.001953125 : f32
    %269 = vector.broadcast %cst_145 : f32 to vector<8x1xf32>
    %270 = arith.mulf %268, %269 : vector<8x1xf32>
    %271 = arith.mulf %265, %265 : vector<8x1xf32>
    %272 = arith.subf %270, %271 : vector<8x1xf32>
    %cst_146 = arith.constant 0.000000e+00 : f32
    %273 = vector.broadcast %cst_146 : f32 to vector<8x1xf32>
    %274 = arith.maximumf %272, %273 : vector<8x1xf32>
    %c0_147 = arith.constant 0 : index
    %c2_148 = arith.constant 2 : index
    %275 = vector.load %arg2[%c0_147, %c2_148] : memref<8x6xf32, #tpu.memory_space<vmem>>, vector<8x1xf32>
    %cst_149 = arith.constant 9.99999974E-6 : f32
    %276 = vector.broadcast %cst_149 : f32 to vector<8x1xf32>
    %277 = arith.addf %274, %276 : vector<8x1xf32>
    %278 = math.rsqrt %277 : vector<8x1xf32>
    %279 = arith.mulf %275, %278 : vector<8x1xf32>
    %c0_150 = arith.constant 0 : index
    %c2_151 = arith.constant 2 : index
    %280 = vector.load %arg3[%c0_150, %c2_151] : memref<8x6xf32, #tpu.memory_space<vmem>>, vector<8x1xf32>
    %281 = arith.mulf %265, %279 : vector<8x1xf32>
    %282 = arith.subf %280, %281 : vector<8x1xf32>
    %283 = vector.broadcast %279 : vector<8x1xf32> to vector<8x512xf32>
    %284 = arith.mulf %261, %283 : vector<8x512xf32>
    %285 = vector.broadcast %282 : vector<8x1xf32> to vector<8x512xf32>
    %286 = arith.addf %284, %285 : vector<8x512xf32>
    %cst_152 = arith.constant 0.000000e+00 : f32
    %287 = vector.broadcast %cst_152 : f32 to vector<8x512xf32>
    %288 = arith.cmpf oge, %286, %287 : vector<8x512xf32>
    %cst_153 = arith.constant 3.000000e-01 : f32
    %289 = vector.broadcast %cst_153 : f32 to vector<8x512xf32>
    %290 = arith.mulf %289, %286 : vector<8x512xf32>
    %291 = arith.select %288, %286, %290 : vector<8x512xi1>, vector<8x512xf32>
    %c2_i32_154 = arith.constant 2 : i32
    %292 = tpu.dynamic_rotate %0 by %c2_i32_154 dim 1 : vector<8x512xf32>, i32 -> vector<8x512xf32>
    %293 = vector.broadcast %11 : vector<1x512xf32> to vector<8x512xf32>
    %294 = arith.mulf %292, %293 : vector<8x512xf32>
    %c27 = arith.constant 27 : index
    %c0_155 = arith.constant 0 : index
    %c0_156 = arith.constant 0 : index
    %295 = vector.load %arg1[%c27, %c0_155, %c0_156] : memref<39x8x8xf32, #tpu.memory_space<vmem>>, vector<1x8x8xf32>
    %296 = vector.shape_cast %295 : vector<1x8x8xf32> to vector<8x8xf32>
    %cst_157 = arith.constant dense<0.000000e+00> : vector<8x512xf32>
    %297 = tpu.matmul %296, %294, %cst_157 {dimension_numbers = #tpu.dot_dimension_numbers<[1], [0], [0], [1], [0, 0, 1, 1], [], []>} : vector<8x8xf32>, vector<8x512xf32>, vector<8x512xf32> -> vector<8x512xf32>
    %c1_i32_158 = arith.constant 1 : i32
    %298 = tpu.dynamic_rotate %0 by %c1_i32_158 dim 1 : vector<8x512xf32>, i32 -> vector<8x512xf32>
    %299 = vector.broadcast %12 : vector<1x512xf32> to vector<8x512xf32>
    %300 = arith.mulf %298, %299 : vector<8x512xf32>
    %c28 = arith.constant 28 : index
    %c0_159 = arith.constant 0 : index
    %c0_160 = arith.constant 0 : index
    %301 = vector.load %arg1[%c28, %c0_159, %c0_160] : memref<39x8x8xf32, #tpu.memory_space<vmem>>, vector<1x8x8xf32>
    %302 = vector.shape_cast %301 : vector<1x8x8xf32> to vector<8x8xf32>
    %cst_161 = arith.constant dense<0.000000e+00> : vector<8x512xf32>
    %303 = tpu.matmul %302, %300, %cst_161 {dimension_numbers = #tpu.dot_dimension_numbers<[1], [0], [0], [1], [0, 0, 1, 1], [], []>} : vector<8x8xf32>, vector<8x512xf32>, vector<8x512xf32> -> vector<8x512xf32>
    %304 = arith.addf %297, %303 : vector<8x512xf32>
    %c29 = arith.constant 29 : index
    %c0_162 = arith.constant 0 : index
    %c0_163 = arith.constant 0 : index
    %305 = vector.load %arg1[%c29, %c0_162, %c0_163] : memref<39x8x8xf32, #tpu.memory_space<vmem>>, vector<1x8x8xf32>
    %306 = vector.shape_cast %305 : vector<1x8x8xf32> to vector<8x8xf32>
    %cst_164 = arith.constant dense<0.000000e+00> : vector<8x512xf32>
    %307 = tpu.matmul %306, %0, %cst_164 {dimension_numbers = #tpu.dot_dimension_numbers<[1], [0], [0], [1], [0, 0, 1, 1], [], []>} : vector<8x8xf32>, vector<8x512xf32>, vector<8x512xf32> -> vector<8x512xf32>
    %308 = arith.addf %304, %307 : vector<8x512xf32>
    %c511_i32_165 = arith.constant 511 : i32
    %309 = tpu.dynamic_rotate %0 by %c511_i32_165 dim 1 : vector<8x512xf32>, i32 -> vector<8x512xf32>
    %310 = vector.broadcast %13 : vector<1x512xf32> to vector<8x512xf32>
    %311 = arith.mulf %309, %310 : vector<8x512xf32>
    %c30 = arith.constant 30 : index
    %c0_166 = arith.constant 0 : index
    %c0_167 = arith.constant 0 : index
    %312 = vector.load %arg1[%c30, %c0_166, %c0_167] : memref<39x8x8xf32, #tpu.memory_space<vmem>>, vector<1x8x8xf32>
    %313 = vector.shape_cast %312 : vector<1x8x8xf32> to vector<8x8xf32>
    %cst_168 = arith.constant dense<0.000000e+00> : vector<8x512xf32>
    %314 = tpu.matmul %313, %311, %cst_168 {dimension_numbers = #tpu.dot_dimension_numbers<[1], [0], [0], [1], [0, 0, 1, 1], [], []>} : vector<8x8xf32>, vector<8x512xf32>, vector<8x512xf32> -> vector<8x512xf32>
    %315 = arith.addf %308, %314 : vector<8x512xf32>
    %c510_i32_169 = arith.constant 510 : i32
    %316 = tpu.dynamic_rotate %0 by %c510_i32_169 dim 1 : vector<8x512xf32>, i32 -> vector<8x512xf32>
    %317 = vector.broadcast %14 : vector<1x512xf32> to vector<8x512xf32>
    %318 = arith.mulf %316, %317 : vector<8x512xf32>
    %c31 = arith.constant 31 : index
    %c0_170 = arith.constant 0 : index
    %c0_171 = arith.constant 0 : index
    %319 = vector.load %arg1[%c31, %c0_170, %c0_171] : memref<39x8x8xf32, #tpu.memory_space<vmem>>, vector<1x8x8xf32>
    %320 = vector.shape_cast %319 : vector<1x8x8xf32> to vector<8x8xf32>
    %cst_172 = arith.constant dense<0.000000e+00> : vector<8x512xf32>
    %321 = tpu.matmul %320, %318, %cst_172 {dimension_numbers = #tpu.dot_dimension_numbers<[1], [0], [0], [1], [0, 0, 1, 1], [], []>} : vector<8x8xf32>, vector<8x512xf32>, vector<8x512xf32> -> vector<8x512xf32>
    %322 = arith.addf %315, %321 : vector<8x512xf32>
    %cst_173 = arith.constant dense<0.000000e+00> : vector<8xf32>
    %323 = vector.multi_reduction <add>, %322, %cst_173 [1] : vector<8x512xf32> to vector<8xf32>
    %324 = vector.shape_cast %323 : vector<8xf32> to vector<8x1xf32>
    %cst_174 = arith.constant 0.001953125 : f32
    %325 = vector.broadcast %cst_174 : f32 to vector<8x1xf32>
    %326 = arith.mulf %324, %325 : vector<8x1xf32>
    %327 = arith.mulf %322, %322 : vector<8x512xf32>
    %cst_175 = arith.constant dense<0.000000e+00> : vector<8xf32>
    %328 = vector.multi_reduction <add>, %327, %cst_175 [1] : vector<8x512xf32> to vector<8xf32>
    %329 = vector.shape_cast %328 : vector<8xf32> to vector<8x1xf32>
    %cst_176 = arith.constant 0.001953125 : f32
    %330 = vector.broadcast %cst_176 : f32 to vector<8x1xf32>
    %331 = arith.mulf %329, %330 : vector<8x1xf32>
    %332 = arith.mulf %326, %326 : vector<8x1xf32>
    %333 = arith.subf %331, %332 : vector<8x1xf32>
    %cst_177 = arith.constant 0.000000e+00 : f32
    %334 = vector.broadcast %cst_177 : f32 to vector<8x1xf32>
    %335 = arith.maximumf %333, %334 : vector<8x1xf32>
    %c0_178 = arith.constant 0 : index
    %c3_179 = arith.constant 3 : index
    %336 = vector.load %arg2[%c0_178, %c3_179] : memref<8x6xf32, #tpu.memory_space<vmem>>, vector<8x1xf32>
    %cst_180 = arith.constant 9.99999974E-6 : f32
    %337 = vector.broadcast %cst_180 : f32 to vector<8x1xf32>
    %338 = arith.addf %335, %337 : vector<8x1xf32>
    %339 = math.rsqrt %338 : vector<8x1xf32>
    %340 = arith.mulf %336, %339 : vector<8x1xf32>
    %c0_181 = arith.constant 0 : index
    %c3_182 = arith.constant 3 : index
    %341 = vector.load %arg3[%c0_181, %c3_182] : memref<8x6xf32, #tpu.memory_space<vmem>>, vector<8x1xf32>
    %342 = arith.mulf %326, %340 : vector<8x1xf32>
    %343 = arith.subf %341, %342 : vector<8x1xf32>
    %344 = vector.broadcast %340 : vector<8x1xf32> to vector<8x512xf32>
    %345 = arith.mulf %322, %344 : vector<8x512xf32>
    %346 = vector.broadcast %343 : vector<8x1xf32> to vector<8x512xf32>
    %347 = arith.addf %345, %346 : vector<8x512xf32>
    %cst_183 = arith.constant 0.000000e+00 : f32
    %348 = vector.broadcast %cst_183 : f32 to vector<8x512xf32>
    %349 = arith.cmpf oge, %347, %348 : vector<8x512xf32>
    %cst_184 = arith.constant 3.000000e-01 : f32
    %350 = vector.broadcast %cst_184 : f32 to vector<8x512xf32>
    %351 = arith.mulf %350, %347 : vector<8x512xf32>
    %352 = arith.select %349, %347, %351 : vector<8x512xi1>, vector<8x512xf32>
    %c32_i32_185 = arith.constant 32 : i32
    %353 = tpu.dynamic_rotate %352 by %c32_i32_185 dim 1 : vector<8x512xf32>, i32 -> vector<8x512xf32>
    %354 = vector.broadcast %3 : vector<1x512xf32> to vector<8x512xf32>
    %355 = arith.mulf %353, %354 : vector<8x512xf32>
    %c32 = arith.constant 32 : index
    %c0_186 = arith.constant 0 : index
    %c0_187 = arith.constant 0 : index
    %356 = vector.load %arg1[%c32, %c0_186, %c0_187] : memref<39x8x8xf32, #tpu.memory_space<vmem>>, vector<1x8x8xf32>
    %357 = vector.shape_cast %356 : vector<1x8x8xf32> to vector<8x8xf32>
    %cst_188 = arith.constant dense<0.000000e+00> : vector<8x512xf32>
    %358 = tpu.matmul %357, %355, %cst_188 {dimension_numbers = #tpu.dot_dimension_numbers<[1], [0], [0], [1], [0, 0, 1, 1], [], []>} : vector<8x8xf32>, vector<8x512xf32>, vector<8x512xf32> -> vector<8x512xf32>
    %c16_i32_189 = arith.constant 16 : i32
    %359 = tpu.dynamic_rotate %352 by %c16_i32_189 dim 1 : vector<8x512xf32>, i32 -> vector<8x512xf32>
    %360 = vector.broadcast %4 : vector<1x512xf32> to vector<8x512xf32>
    %361 = arith.mulf %359, %360 : vector<8x512xf32>
    %c33 = arith.constant 33 : index
    %c0_190 = arith.constant 0 : index
    %c0_191 = arith.constant 0 : index
    %362 = vector.load %arg1[%c33, %c0_190, %c0_191] : memref<39x8x8xf32, #tpu.memory_space<vmem>>, vector<1x8x8xf32>
    %363 = vector.shape_cast %362 : vector<1x8x8xf32> to vector<8x8xf32>
    %cst_192 = arith.constant dense<0.000000e+00> : vector<8x512xf32>
    %364 = tpu.matmul %363, %361, %cst_192 {dimension_numbers = #tpu.dot_dimension_numbers<[1], [0], [0], [1], [0, 0, 1, 1], [], []>} : vector<8x8xf32>, vector<8x512xf32>, vector<8x512xf32> -> vector<8x512xf32>
    %365 = arith.addf %358, %364 : vector<8x512xf32>
    %c34 = arith.constant 34 : index
    %c0_193 = arith.constant 0 : index
    %c0_194 = arith.constant 0 : index
    %366 = vector.load %arg1[%c34, %c0_193, %c0_194] : memref<39x8x8xf32, #tpu.memory_space<vmem>>, vector<1x8x8xf32>
    %367 = vector.shape_cast %366 : vector<1x8x8xf32> to vector<8x8xf32>
    %cst_195 = arith.constant dense<0.000000e+00> : vector<8x512xf32>
    %368 = tpu.matmul %367, %352, %cst_195 {dimension_numbers = #tpu.dot_dimension_numbers<[1], [0], [0], [1], [0, 0, 1, 1], [], []>} : vector<8x8xf32>, vector<8x512xf32>, vector<8x512xf32> -> vector<8x512xf32>
    %369 = arith.addf %365, %368 : vector<8x512xf32>
    %c496_i32_196 = arith.constant 496 : i32
    %370 = tpu.dynamic_rotate %352 by %c496_i32_196 dim 1 : vector<8x512xf32>, i32 -> vector<8x512xf32>
    %371 = vector.broadcast %5 : vector<1x512xf32> to vector<8x512xf32>
    %372 = arith.mulf %370, %371 : vector<8x512xf32>
    %c35 = arith.constant 35 : index
    %c0_197 = arith.constant 0 : index
    %c0_198 = arith.constant 0 : index
    %373 = vector.load %arg1[%c35, %c0_197, %c0_198] : memref<39x8x8xf32, #tpu.memory_space<vmem>>, vector<1x8x8xf32>
    %374 = vector.shape_cast %373 : vector<1x8x8xf32> to vector<8x8xf32>
    %cst_199 = arith.constant dense<0.000000e+00> : vector<8x512xf32>
    %375 = tpu.matmul %374, %372, %cst_199 {dimension_numbers = #tpu.dot_dimension_numbers<[1], [0], [0], [1], [0, 0, 1, 1], [], []>} : vector<8x8xf32>, vector<8x512xf32>, vector<8x512xf32> -> vector<8x512xf32>
    %376 = arith.addf %369, %375 : vector<8x512xf32>
    %c480_i32_200 = arith.constant 480 : i32
    %377 = tpu.dynamic_rotate %352 by %c480_i32_200 dim 1 : vector<8x512xf32>, i32 -> vector<8x512xf32>
    %378 = vector.broadcast %6 : vector<1x512xf32> to vector<8x512xf32>
    %379 = arith.mulf %377, %378 : vector<8x512xf32>
    %c36 = arith.constant 36 : index
    %c0_201 = arith.constant 0 : index
    %c0_202 = arith.constant 0 : index
    %380 = vector.load %arg1[%c36, %c0_201, %c0_202] : memref<39x8x8xf32, #tpu.memory_space<vmem>>, vector<1x8x8xf32>
    %381 = vector.shape_cast %380 : vector<1x8x8xf32> to vector<8x8xf32>
    %cst_203 = arith.constant dense<0.000000e+00> : vector<8x512xf32>
    %382 = tpu.matmul %381, %379, %cst_203 {dimension_numbers = #tpu.dot_dimension_numbers<[1], [0], [0], [1], [0, 0, 1, 1], [], []>} : vector<8x8xf32>, vector<8x512xf32>, vector<8x512xf32> -> vector<8x512xf32>
    %383 = arith.addf %376, %382 : vector<8x512xf32>
    %cst_204 = arith.constant dense<0.000000e+00> : vector<8xf32>
    %384 = vector.multi_reduction <add>, %383, %cst_204 [1] : vector<8x512xf32> to vector<8xf32>
    %385 = vector.shape_cast %384 : vector<8xf32> to vector<8x1xf32>
    %cst_205 = arith.constant 0.001953125 : f32
    %386 = vector.broadcast %cst_205 : f32 to vector<8x1xf32>
    %387 = arith.mulf %385, %386 : vector<8x1xf32>
    %388 = arith.mulf %383, %383 : vector<8x512xf32>
    %cst_206 = arith.constant dense<0.000000e+00> : vector<8xf32>
    %389 = vector.multi_reduction <add>, %388, %cst_206 [1] : vector<8x512xf32> to vector<8xf32>
    %390 = vector.shape_cast %389 : vector<8xf32> to vector<8x1xf32>
    %cst_207 = arith.constant 0.001953125 : f32
    %391 = vector.broadcast %cst_207 : f32 to vector<8x1xf32>
    %392 = arith.mulf %390, %391 : vector<8x1xf32>
    %393 = arith.mulf %387, %387 : vector<8x1xf32>
    %394 = arith.subf %392, %393 : vector<8x1xf32>
    %cst_208 = arith.constant 0.000000e+00 : f32
    %395 = vector.broadcast %cst_208 : f32 to vector<8x1xf32>
    %396 = arith.maximumf %394, %395 : vector<8x1xf32>
    %c0_209 = arith.constant 0 : index
    %c4_210 = arith.constant 4 : index
    %397 = vector.load %arg2[%c0_209, %c4_210] : memref<8x6xf32, #tpu.memory_space<vmem>>, vector<8x1xf32>
    %cst_211 = arith.constant 9.99999974E-6 : f32
    %398 = vector.broadcast %cst_211 : f32 to vector<8x1xf32>
    %399 = arith.addf %396, %398 : vector<8x1xf32>
    %400 = math.rsqrt %399 : vector<8x1xf32>
    %401 = arith.mulf %397, %400 : vector<8x1xf32>
    %c0_212 = arith.constant 0 : index
    %c4_213 = arith.constant 4 : index
    %402 = vector.load %arg3[%c0_212, %c4_213] : memref<8x6xf32, #tpu.memory_space<vmem>>, vector<8x1xf32>
    %403 = arith.mulf %387, %401 : vector<8x1xf32>
    %404 = arith.subf %402, %403 : vector<8x1xf32>
    %405 = vector.broadcast %401 : vector<8x1xf32> to vector<8x512xf32>
    %406 = arith.mulf %383, %405 : vector<8x512xf32>
    %407 = vector.broadcast %404 : vector<8x1xf32> to vector<8x512xf32>
    %408 = arith.addf %406, %407 : vector<8x512xf32>
    %cst_214 = arith.constant 0.000000e+00 : f32
    %409 = vector.broadcast %cst_214 : f32 to vector<8x512xf32>
    %410 = arith.cmpf oge, %408, %409 : vector<8x512xf32>
    %cst_215 = arith.constant 3.000000e-01 : f32
    %411 = vector.broadcast %cst_215 : f32 to vector<8x512xf32>
    %412 = arith.mulf %411, %408 : vector<8x512xf32>
    %413 = arith.select %410, %408, %412 : vector<8x512xi1>, vector<8x512xf32>
    %c37 = arith.constant 37 : index
    %c0_216 = arith.constant 0 : index
    %c0_217 = arith.constant 0 : index
    %414 = vector.load %arg1[%c37, %c0_216, %c0_217] : memref<39x8x8xf32, #tpu.memory_space<vmem>>, vector<1x8x8xf32>
    %415 = vector.shape_cast %414 : vector<1x8x8xf32> to vector<8x8xf32>
    %cst_218 = arith.constant dense<0.000000e+00> : vector<8x512xf32>
    %416 = tpu.matmul %415, %291, %cst_218 {dimension_numbers = #tpu.dot_dimension_numbers<[1], [0], [0], [1], [0, 0, 1, 1], [], []>} : vector<8x8xf32>, vector<8x512xf32>, vector<8x512xf32> -> vector<8x512xf32>
    %c38 = arith.constant 38 : index
    %c0_219 = arith.constant 0 : index
    %c0_220 = arith.constant 0 : index
    %417 = vector.load %arg1[%c38, %c0_219, %c0_220] : memref<39x8x8xf32, #tpu.memory_space<vmem>>, vector<1x8x8xf32>
    %418 = vector.shape_cast %417 : vector<1x8x8xf32> to vector<8x8xf32>
    %cst_221 = arith.constant dense<0.000000e+00> : vector<8x512xf32>
    %419 = tpu.matmul %418, %413, %cst_221 {dimension_numbers = #tpu.dot_dimension_numbers<[1], [0], [0], [1], [0, 0, 1, 1], [], []>} : vector<8x8xf32>, vector<8x512xf32>, vector<8x512xf32> -> vector<8x512xf32>
    %420 = arith.addf %416, %419 : vector<8x512xf32>
    %cst_222 = arith.constant dense<0.000000e+00> : vector<8xf32>
    %421 = vector.multi_reduction <add>, %420, %cst_222 [1] : vector<8x512xf32> to vector<8xf32>
    %422 = vector.shape_cast %421 : vector<8xf32> to vector<8x1xf32>
    %cst_223 = arith.constant 0.001953125 : f32
    %423 = vector.broadcast %cst_223 : f32 to vector<8x1xf32>
    %424 = arith.mulf %422, %423 : vector<8x1xf32>
    %425 = arith.mulf %420, %420 : vector<8x512xf32>
    %cst_224 = arith.constant dense<0.000000e+00> : vector<8xf32>
    %426 = vector.multi_reduction <add>, %425, %cst_224 [1] : vector<8x512xf32> to vector<8xf32>
    %427 = vector.shape_cast %426 : vector<8xf32> to vector<8x1xf32>
    %cst_225 = arith.constant 0.001953125 : f32
    %428 = vector.broadcast %cst_225 : f32 to vector<8x1xf32>
    %429 = arith.mulf %427, %428 : vector<8x1xf32>
    %430 = arith.mulf %424, %424 : vector<8x1xf32>
    %431 = arith.subf %429, %430 : vector<8x1xf32>
    %cst_226 = arith.constant 0.000000e+00 : f32
    %432 = vector.broadcast %cst_226 : f32 to vector<8x1xf32>
    %433 = arith.maximumf %431, %432 : vector<8x1xf32>
    %c0_227 = arith.constant 0 : index
    %c5_228 = arith.constant 5 : index
    %434 = vector.load %arg2[%c0_227, %c5_228] : memref<8x6xf32, #tpu.memory_space<vmem>>, vector<8x1xf32>
    %cst_229 = arith.constant 9.99999974E-6 : f32
    %435 = vector.broadcast %cst_229 : f32 to vector<8x1xf32>
    %436 = arith.addf %433, %435 : vector<8x1xf32>
    %437 = math.rsqrt %436 : vector<8x1xf32>
    %438 = arith.mulf %434, %437 : vector<8x1xf32>
    %c0_230 = arith.constant 0 : index
    %c5_231 = arith.constant 5 : index
    %439 = vector.load %arg3[%c0_230, %c5_231] : memref<8x6xf32, #tpu.memory_space<vmem>>, vector<8x1xf32>
    %440 = arith.mulf %424, %438 : vector<8x1xf32>
    %441 = arith.subf %439, %440 : vector<8x1xf32>
    %442 = vector.broadcast %438 : vector<8x1xf32> to vector<8x512xf32>
    %443 = arith.mulf %420, %442 : vector<8x512xf32>
    %444 = vector.broadcast %441 : vector<8x1xf32> to vector<8x512xf32>
    %445 = arith.addf %443, %444 : vector<8x512xf32>
    %446 = arith.addf %445, %0 : vector<8x512xf32>
    %cst_232 = arith.constant 0.000000e+00 : f32
    %447 = vector.broadcast %cst_232 : f32 to vector<8x512xf32>
    %448 = arith.cmpf oge, %446, %447 : vector<8x512xf32>
    %cst_233 = arith.constant 3.000000e-01 : f32
    %449 = vector.broadcast %cst_233 : f32 to vector<8x512xf32>
    %450 = arith.mulf %449, %446 : vector<8x512xf32>
    %451 = arith.select %448, %446, %450 : vector<8x512xi1>, vector<8x512xf32>
    %c0_234 = arith.constant 0 : index
    %c0_235 = arith.constant 0 : index
    %452 = vector.load %arg5[%c0_234, %c0_235] : memref<8x512xf32, #tpu.memory_space<vmem>>, vector<8x512xf32>
    tpu.vector_store %arg5[%c0_234, %c0_235], %451 {strides = array<i32>} : memref<8x512xf32, #tpu.memory_space<vmem>>, vector<8x512xf32>,
    return
  }
}

</mosaic_0001>

<bundles_post_ra>
// kernel: crblock_forward.1
= control target key start
LH: loop header
LB: loop body
LE: loop exit
PB: predicated region body
PF: predicated region fallthrough
CT: control target
= control target key end

     0   :  { %v7397_v2 = vmov 0.0   ;;  %s7398_s22 = smov 16   ;;  %s7399_s27 = smov 17   ;;  %v63_v5 = vlaneseq  ;;  %vm140_vm2 = vcmask 64512   ;;  %s8667_s0 = inlined_call_operand.vmem [shape: f32[8,512], index: 0, kind: input, shape index: {}]   ;;  %s8668_s4 = inlined_call_operand.vmem [shape: f32[16,512], index: 4, kind: input, shape index: {}]   ;;  %s8669_s1 = inlined_call_operand.vmem [shape: f32[39,8,8], index: 1, kind: input, shape index: {}]   ;;  %s8670_s2 = inlined_call_operand.vmem [shape: f32[8,6], index: 2, kind: input, shape index: {}]   ;;  %s8671_s3 = inlined_call_operand.vmem [shape: f32[8,6], index: 3, kind: input, shape index: {}]   ;;  %s8672_s5 = inlined_call_operand.vmem [shape: f32[8,512], index: 5, kind: output, shape index: {}]  }
   0x1   :  { %v7456_v0 = vld [vmem:[%s8667_s0 + $0x18] sm:$0xff]  ;;  %v7461_v1 = vld [vmem:[%s8667_s0] sm:$0xff]  ;;  %208 = vmatprep.mubr.f32.mxu0 %v7397_v2  ;;  %279 = vmatprep.mubr.f32.mxu1 %v7397_v2  ;;  %v7472_v3 = vld [vmem:[%s8667_s0 + $0x10] sm:$0xff]  ;;  %s7400_s28 = smov 15   ;;  %s7401_s29 = smov 1  }
   0x2   :  { %127 = vrot.lane.b32.xlu1 %v7456_v0, %s7398_s22  ;;  %121 = vrot.lane.b32.xlu0 %v7461_v1, %s7398_s22  ;;  %v7477_v4 = vld [vmem:[%s8667_s0 + $0x8] sm:$0xff]  ;;  %s7402_s30 = smov 127   ;;  %s7403_s6 = smov 113   ;;  %v72_v6 = vshrl.u32 %v63_v5, 7  ;;  %v7523_v7 = vand.u32 127, %v63_v5  ;;  %v120_v54 = vld [vmem:[%s8669_s1] sm:$0xff] }
   0x3   :  { %s7404_s7 = smov 112   ;;  %s7405_s8 = smov 111   ;;  %v7077_v14 = vld [vmem:[%s8668_s4 + $0x3] ss:$8 sm:$0xf] }
   0x4   :  { %v7525_v8 = vsub.s32 3, %v72_v6  ;;  %v7527_v9 = vsub.s32 1, %v72_v6  ;;  %v7529_v10 = vsub.s32 2, %v72_v6  ;;  %v7531_v11 = vsub.s32 0, %v72_v6  ;;  %v7090_v30 = vld [vmem:[%s8669_s1 + $0x8] sm:$0xff]  ;;  %s7407_s18 = smov 3  }
   0x5   :  { %vm129_vm0 = vcmp.lt.s32.totalorder %v7523_v7, 16  ;;  %v7085_v25 = vld [vmem:[%s8668_s4 + $0x23] ss:$8 sm:$0xf]  ;;  %vm65_vm1 = vcmp.lt.s32.totalorder %v7523_v7, 17  ;;  %vm439_vm3 = vcmp.lt.s32.totalorder %v7523_v7, 15 }
   0x6   :  { %125 = vrot.lane.b32.xlu1 %v7472_v3, %s7398_s22  ;;  %123 = vrot.lane.b32.xlu0 %v7477_v4, %s7398_s22  ;;  %v7538_v15 = vrot.slane %v7077_v14, %v7525_v8  ;;  %v7541_v16 = vrot.slane %v7077_v14, %v7527_v9  ;;  %v7544_v17 = vrot.slane %v7077_v14, %v7529_v10  ;;  %v7086_v45 = vld [vmem:[%s8668_s4 + $0x24] ss:$8 sm:$0xf]  ;;  %vm632_vm4 = vcmp.lt.s32.totalorder %v7523_v7, 1  ;;  %s7408_s19 = smov 4   ;;  %s7409_s20 = smov 2  }
   0x7   :  { %v7547_v18 = vrot.slane %v7077_v14, %v7531_v11  ;;  %v7569_v33 = vrot.slane %v7085_v25, %v7527_v9  ;;  %v7579_v36 = vrot.slane %v7085_v25, %v7529_v10  ;;  %v7582_v38 = vrot.slane %v7085_v25, %v7531_v11  ;;  %s7410_s21 = smov 126   ;;  %s7411_s23 = smov 125  }
   0x8   :  { %v7586_v41 = vrot.slane %v7085_v25, %v7525_v8  ;;  %v7608_v55 = vrot.slane %v7086_v45, %v7527_v9  ;;  %v7615_v58 = vrot.slane %v7086_v45, %v7529_v10  ;;  %v7619_v60 = vrot.slane %v7086_v45, %v7531_v11  ;;  %v7095_v25 = vld [vmem:[%s8669_s1 + $0x10] sm:$0xff]  ;;  %s7412_s24 = smov 124   ;;  %s7414_s10 = smov 64  }
   0x9   :  { %v7624_v63 = vrot.slane %v7086_v45, %v7525_v8  ;;  %vm951_vm5 = vcmp.lt.s32.totalorder %v7523_v7, 127  ;;  %v7078_v45 = vld [vmem:[%s8668_s4 + $0x4] ss:$8 sm:$0xf]  ;;  %vm1119_vm6 = vcmp.lt.s32.totalorder %v7523_v7, 113  ;;  %vm1312_vm7 = vcmp.lt.s32.totalorder %v7523_v7, 112 }
   0xa   :  { %57 = vrot.lane.b32.xlu1 %v7477_v4, %s7399_s27  ;;  %55 = vrot.lane.b32.xlu0 %v7461_v1, %s7399_s27  ;;  %vm1480_vm8 = vcmp.lt.s32.totalorder %v7523_v7, 111  ;;  %vm1748_vm13 = vcmp.lt.s32.totalorder %v7523_v7, 3  ;;  %vm1708_vm14 = vcmp.lt.s32.totalorder %v7523_v7, 4  ;;  %vm2078_vm15 = vcmp.lt.s32.totalorder %v7523_v7, 2  ;;  %s7415_s11 = smov 48   ;;  %s7416_s12 = smov 32  }
   0xb   :  { %s7417_s13 = smov 96   ;;  %s7418_s14 = smov 80  }
   0xe   :  { %59 = vrot.lane.b32.xlu1 %v7472_v3, %s7399_s27  ;;  %61 = vrot.lane.b32.xlu0 %v7456_v0, %s7399_s27 }
  0x12   :  { %433 = vrot.lane.b32.xlu1 %v7477_v4, %s7400_s28  ;;  %431 = vrot.lane.b32.xlu0 %v7461_v1, %s7400_s28 }
  0x16   :  { %435 = vrot.lane.b32.xlu1 %v7472_v3, %s7400_s28  ;;  %437 = vrot.lane.b32.xlu0 %v7456_v0, %s7400_s28 }
  0x1a   :  { %626 = vrot.lane.b32.xlu1 %v7477_v4, %s7401_s29  ;;  %624 = vrot.lane.b32.xlu0 %v7461_v1, %s7401_s29 }
  0x1e   :  { %628 = vrot.lane.b32.xlu1 %v7472_v3, %s7401_s29  ;;  %630 = vrot.lane.b32.xlu0 %v7456_v0, %s7401_s29 }
  0x22   :  { %945 = vrot.lane.b32.xlu0 %v7477_v4, %s7402_s30  ;;  %947 = vrot.lane.b32.xlu1 %v7472_v3, %s7402_s30 }
  0x26   :  { %943 = vrot.lane.b32.xlu0 %v7461_v1, %s7402_s30  ;;  %949 = vrot.lane.b32.xlu1 %v7456_v0, %s7402_s30 }
  0x2a   :  { %1113 = vrot.lane.b32.xlu0 %v7477_v4, %s7403_s6  ;;  %1115 = vrot.lane.b32.xlu1 %v7472_v3, %s7403_s6 }
  0x2e   :  { %1111 = vrot.lane.b32.xlu0 %v7461_v1, %s7403_s6  ;;  %1117 = vrot.lane.b32.xlu1 %v7456_v0, %s7403_s6 }
  0x32   :  { %1306 = vrot.lane.b32.xlu0 %v7477_v4, %s7404_s7  ;;  %1308 = vrot.lane.b32.xlu1 %v7472_v3, %s7404_s7 }
  0x36   :  { %1304 = vrot.lane.b32.xlu0 %v7461_v1, %s7404_s7  ;;  %1310 = vrot.lane.b32.xlu1 %v7456_v0, %s7404_s7 }
  0x3a   :  { %1474 = vrot.lane.b32.xlu0 %v7477_v4, %s7405_s8  ;;  %1476 = vrot.lane.b32.xlu1 %v7472_v3, %s7405_s8 }
  0x3e   :  { %1472 = vrot.lane.b32.xlu0 %v7461_v1, %s7405_s8  ;;  %1478 = vrot.lane.b32.xlu1 %v7456_v0, %s7405_s8 }
  0x74   :  { %v128_v12 = vpop.permute.xlu1 %127  ;;  %v122_v13 = vpop.permute.xlu0 %121 }
  0x75   :  { %v133_v21 = vsel %vm129_vm0, %v128_v12, %v122_v13 }
  0x76   :  { %v134_v29 = vmul.f32 %v133_v21, %v7547_v18 }
  0x78   :  { %v126_v19 = vpop.permute.xlu1 %125  ;;  %v124_v20 = vpop.permute.xlu0 %123 }
  0x79   :  { %v130_v22 = vsel %vm129_vm0, %v126_v19, %v128_v12  ;;  %v132_v23 = vsel %vm129_vm0, %v122_v13, %v124_v20  ;;  %v131_v24 = vsel %vm129_vm0, %v124_v20, %v126_v19 }
  0x7a   :  { %v137_v26 = vmul.f32 %v130_v22, %v7538_v15  ;;  %v135_v27 = vmul.f32 %v132_v23, %v7541_v16  ;;  %v136_v28 = vmul.f32 %v131_v24, %v7544_v17 }
  0x7c   :  { %215 = vmatprep.subr.mxu1 %v137_v26  ;;  %v58_v31 = vpop.permute.xlu1 %57  ;;  %144 = vmatprep.subr.mxu0 %v135_v27  ;;  %v56_v32 = vpop.permute.xlu0 %55 }
  0x7d   :  { %v68_v34 = vsel %vm65_vm1, %v56_v32, %v58_v31  ;;  %145 = vmatpush1.msra.mxu0 %v134_v29  ;;  %216 = vmatpush1.msra.mxu1 %v136_v28 }
  0x7e   :  { %v92_v35 = vmul.f32 %v7541_v16, %v68_v34  ;;  %7091 = vmatmul.mubr.msk.f32.vlgmr.msra.gmra.mrb[0].mxu0 %vm140_vm2, %v7090_v30  ;;  %7092 = vmatmul.mubr.msk.f32.vlgmr.msra.gmra.mrb[0].mxu1 %vm140_vm2, %v7090_v30 }
  0x7f   :  { %353 = vmatprep.mubr.f32.mxu0 %v7397_v2  ;;  %424 = vmatprep.mubr.f32.mxu1 %v7397_v2 }
  0x80   :  { %v60_v37 = vpop.permute.xlu1 %59  ;;  %v62_v39 = vpop.permute.xlu0 %61  ;;  %v117_v40 = vmul.f32 %v7569_v33, %v92_v35 }
  0x81   :  { %v67_v42 = vsel %vm65_vm1, %v58_v31, %v60_v37  ;;  %v66_v43 = vsel %vm65_vm1, %v60_v37, %v62_v39  ;;  %v69_v44 = vsel %vm65_vm1, %v62_v39, %v56_v32  ;;  %v7098_v39 = vld [vmem:[%s8669_s1 + $0x18] sm:$0xff]  ;;  %vm2752_vm1 = vcmp.lt.s32.totalorder %v7523_v7, 126 }
  0x82   :  { %v93_v46 = vmul.f32 %v7544_v17, %v67_v42  ;;  %v91_v47 = vmul.f32 %v7547_v18, %v69_v44  ;;  %v94_v48 = vmul.f32 %v7538_v15, %v66_v43  ;;  %289 = vmatprep.subr.mxu0 %v117_v40 }
  0x84   :  { %v118_v49 = vmul.f32 %v7579_v36, %v93_v46  ;;  %v116_v50 = vmul.f32 %v7582_v38, %v91_v47  ;;  %v434_v51 = vpop.permute.xlu1 %433  ;;  %v432_v52 = vpop.permute.xlu0 %431  ;;  %v119_v53 = vmul.f32 %v7586_v41, %v94_v48 }
  0x85   :  { %v442_v56 = vsel %vm439_vm3, %v432_v52, %v434_v51 }
  0x86   :  { %v445_v57 = vmul.f32 %v442_v56, %v7541_v16  ;;  %290 = vmatpush1.msra.mxu0 %v116_v50  ;;  %360 = vmatprep.subr.mxu1 %v119_v53 }
  0x87   :  { %7093 = vmatmul.mubr.msk.f32.vlgmr.msra.gmra.mrb[0].mxu0 %vm140_vm2, %v120_v54  ;;  %361 = vmatpush1.msra.mxu1 %v118_v49 }
  0x88   :  { %v436_v59 = vpop.permute.xlu1 %435  ;;  %7094 = vmatmul.mubr.msk.f32.vlgmr.msra.gmra.mrb[0].mxu1 %vm140_vm2, %v120_v54  ;;  %v438_v61 = vpop.permute.xlu0 %437  ;;  %v470_v62 = vmul.f32 %v7608_v55, %v445_v57  ;;  %542 = vmatprep.mubr.f32.mxu0 %v7397_v2  ;;  %v7719_v57 = vrot.slane %v7078_v45, %v7531_v11 }
  0x89   :  { %v441_v5 = vsel %vm439_vm3, %v434_v51, %v436_v59  ;;  %v440_v6 = vsel %vm439_vm3, %v436_v59, %v438_v61  ;;  %v443_v12 = vsel %vm439_vm3, %v438_v61, %v432_v52  ;;  %613 = vmatprep.mubr.f32.mxu1 %v7397_v2  ;;  %v7722_v59 = vrot.slane %v7078_v45, %v7529_v10 }
  0x8a   :  { %v446_v13 = vmul.f32 %v441_v5, %v7544_v17  ;;  %v444_v14 = vmul.f32 %v443_v12, %v7547_v18  ;;  %v447_v19 = vmul.f32 %v440_v6, %v7538_v15  ;;  %478 = vmatprep.subr.mxu0 %v470_v62  ;;  %v7725_v61 = vrot.slane %v7078_v45, %v7525_v8 }
  0x8b   :  { %vm2941_vm3 = vcmp.lt.s32.totalorder %v7523_v7, 125 }
  0x8c   :  { %v471_v20 = vmul.f32 %v7615_v58, %v446_v13  ;;  %v469_v21 = vmul.f32 %v7619_v60, %v444_v14  ;;  %v627_v22 = vpop.permute.xlu1 %626  ;;  %v625_v23 = vpop.permute.xlu0 %624  ;;  %v472_v24 = vmul.f32 %v7624_v63, %v447_v19 }
  0x8d   :  { %v635_v26 = vsel %vm632_vm4, %v625_v23, %v627_v22 }
  0x8e   :  { %479 = vmatpush1.msra.mxu0 %v469_v21  ;;  %549 = vmatprep.subr.mxu1 %v472_v24  ;;  %v7646_v27 = vmul.f32 %v635_v26, %v7569_v33 }
  0x8f   :  { %7096 = vmatmul.mubr.msk.f32.vlgmr.msra.gmra.mrb[0].mxu0 %vm140_vm2, %v7095_v25  ;;  %550 = vmatpush1.msra.mxu1 %v471_v20 }
  0x90   :  { %v629_v28 = vpop.permute.xlu1 %628  ;;  %7097 = vmatmul.mubr.msk.f32.vlgmr.msra.gmra.mrb[0].mxu1 %vm140_vm2, %v7095_v25  ;;  %v631_v29 = vpop.permute.xlu0 %630  ;;  %646 = vmatprep.subr.mxu0 %v7646_v27 }
  0x91   :  { %v634_v30 = vsel %vm632_vm4, %v627_v22, %v629_v28  ;;  %v633_v31 = vsel %vm632_vm4, %v629_v28, %v631_v29  ;;  %v636_v32 = vsel %vm632_vm4, %v631_v29, %v625_v23  ;;  %710 = vmatprep.mubr.f32.mxu0 %v7397_v2  ;;  %781 = vmatprep.mubr.f32.mxu1 %v7397_v2  ;;  %v7104_v23 = vld [vmem:[%s8669_s1 + $0x28] sm:$0xff] }
  0x92   :  { %v7660_v34 = vmul.f32 %v634_v30, %v7579_v36  ;;  %v7663_v35 = vmul.f32 %v636_v32, %v7582_v38  ;;  %v7666_v37 = vmul.f32 %v633_v31, %v7586_v41 }
  0x94   :  { %647 = vmatpush1.msra.mxu0 %v7663_v35  ;;  %717 = vmatprep.subr.mxu1 %v7666_v37  ;;  %v946_v40 = vpop.permute.xlu0 %945  ;;  %v948_v42 = vpop.permute.xlu1 %947 }
  0x95   :  { %718 = vmatpush1.msra.mxu1 %v7660_v34  ;;  %v953_v43 = vsel %vm951_vm5, %v946_v40, %v948_v42  ;;  %797 = vmatprep.subr.mxu0 %v7477_v4 }
  0x96   :  { %868 = vmatprep.subr.mxu1 %v7456_v0  ;;  %v7680_v44 = vmul.f32 %v953_v43, %v7608_v55 }
  0x97   :  { %7099 = vmatmul.mubr.msk.f32.vlgmr.msra.gmra.mrb[0].mxu0 %vm140_vm2, %v7098_v39 }
  0x98   :  { %7100 = vmatmul.mubr.msk.f32.vlgmr.msra.gmra.mrb[0].mxu1 %vm140_vm2, %v7098_v39  ;;  %v944_v46 = vpop.permute.xlu0 %943  ;;  %v950_v47 = vpop.permute.xlu1 %949  ;;  %798 = vmatpush1.msra.mxu0 %v7461_v1  ;;  %v7700_v1 = vrot.slane %v7078_v45, %v7527_v9 }
  0x99   :  { %v954_v4 = vsel %vm951_vm5, %v944_v46, %v946_v40  ;;  %v955_v0 = vsel %vm951_vm5, %v950_v47, %v944_v46  ;;  %861 = vmatprep.mubr.f32.mxu0 %v7397_v2  ;;  %869 = vmatpush1.msra.mxu1 %v7472_v3  ;;  %v952_v48 = vsel %vm951_vm5, %v948_v42, %v950_v47  ;;  %v7101_v3 = vld [vmem:[%s8669_s1 + $0x20] sm:$0xff]  ;;  %v7107_v46 = vld [vmem:[%s8669_s1 + $0x30] sm:$0xff] }
  0x9a   :  { %932 = vmatprep.mubr.f32.mxu1 %v7397_v2  ;;  %965 = vmatprep.subr.mxu0 %v7680_v44  ;;  %v7703_v49 = vmul.f32 %v955_v0, %v7624_v63  ;;  %v7706_v50 = vmul.f32 %v954_v4, %v7619_v60  ;;  %v7713_v53 = vmul.f32 %v952_v48, %v7615_v58 }
  0x9c   :  { %v1114_v51 = vpop.permute.xlu0 %1113  ;;  %v1116_v52 = vpop.permute.xlu1 %1115  ;;  %1036 = vmatprep.subr.mxu1 %v7703_v49 }
  0x9d   :  { %v1121_v54 = vsel %vm1119_vm6, %v1114_v51, %v1116_v52 }
  0x9e   :  { %v1146_v56 = vmul.f32 %v7700_v1, %v1121_v54 }
  0x9f   :  { %7102 = vmatmul.mubr.msk.f32.vlgmr.msra.gmra.mrb[0].mxu0 %vm140_vm2, %v7101_v3 }
  0xa0   :  { %7103 = vmatmul.mubr.msk.f32.vlgmr.msra.gmra.mrb[0].mxu1 %vm140_vm2, %v7101_v3  ;;  %966 = vmatpush1.msra.mxu0 %v7706_v50  ;;  %v1112_v62 = vpop.permute.xlu0 %1111  ;;  %v1118_v5 = vpop.permute.xlu1 %1117  ;;  %v1150_v6 = vmul.f32 %v1146_v56, %v7569_v33 }
  0xa1   :  { %1037 = vmatpush1.msra.mxu1 %v7713_v53  ;;  %v1122_v12 = vsel %vm1119_vm6, %v1112_v62, %v1114_v51  ;;  %v1120_v13 = vsel %vm1119_vm6, %v1116_v52, %v1118_v5  ;;  %v1123_v14 = vsel %vm1119_vm6, %v1118_v5, %v1112_v62  ;;  %1029 = vmatprep.mubr.f32.mxu0 %v7397_v2 }
  0xa2   :  { %v1145_v19 = vmul.f32 %v7719_v57, %v1122_v12  ;;  %v1147_v20 = vmul.f32 %v7722_v59, %v1120_v13  ;;  %v1148_v21 = vmul.f32 %v7725_v61, %v1123_v14  ;;  %1100 = vmatprep.mubr.f32.mxu1 %v7397_v2  ;;  %1158 = vmatprep.subr.mxu0 %v1150_v6 }
  0xa4   :  { %v1149_v22 = vmul.f32 %v1145_v19, %v7582_v38  ;;  %v1307_v24 = vpop.permute.xlu0 %1306  ;;  %v1309_v25 = vpop.permute.xlu1 %1308  ;;  %v1152_v26 = vmul.f32 %v1148_v21, %v7586_v41  ;;  %v1151_v28 = vmul.f32 %v1147_v20, %v7579_v36  ;;  %v7110_v19 = vld [vmem:[%s8669_s1 + $0x38] sm:$0xff] }
  0xa5   :  { %v1314_v29 = vsel %vm1312_vm7, %v1307_v24, %v1309_v25 }
  0xa6   :  { %1229 = vmatprep.subr.mxu1 %v1152_v26  ;;  %v1318_v30 = vmul.f32 %v1314_v29, %v7700_v1 }
  0xa7   :  { %7105 = vmatmul.mubr.msk.f32.vlgmr.msra.gmra.mrb[0].mxu0 %vm140_vm2, %v7104_v23 }
  0xa8   :  { %7106 = vmatmul.mubr.msk.f32.vlgmr.msra.gmra.mrb[0].mxu1 %vm140_vm2, %v7104_v23  ;;  %1159 = vmatpush1.msra.mxu0 %v1149_v22  ;;  %v1305_v31 = vpop.permute.xlu0 %1304  ;;  %v1311_v32 = vpop.permute.xlu1 %1310  ;;  %v7113_v22 = vld [vmem:[%s8669_s1 + $0x40] sm:$0xff] }
  0xa9   :  { %1230 = vmatpush1.msra.mxu1 %v1151_v28  ;;  %v1315_v39 = vsel %vm1312_vm7, %v1305_v31, %v1307_v24  ;;  %v1316_v40 = vsel %vm1312_vm7, %v1311_v32, %v1305_v31  ;;  %1222 = vmatprep.mubr.f32.mxu0 %v7397_v2  ;;  %v1313_v42 = vsel %vm1312_vm7, %v1309_v25, %v1311_v32 }
  0xaa   :  { %1293 = vmatprep.mubr.f32.mxu1 %v7397_v2  ;;  %1326 = vmatprep.subr.mxu0 %v1318_v30  ;;  %v1320_v43 = vmul.f32 %v1316_v40, %v7725_v61  ;;  %v1317_v45 = vmul.f32 %v1315_v39, %v7719_v57  ;;  %v1319_v0 = vmul.f32 %v1313_v42, %v7722_v59 }
  0xac   :  { %v1475_v47 = vpop.permute.xlu0 %1474  ;;  %v1477_v4 = vpop.permute.xlu1 %1476  ;;  %1397 = vmatprep.subr.mxu1 %v1320_v43 }
  0xad   :  { %v1482_v48 = vsel %vm1480_vm8, %v1475_v47, %v1477_v4 }
  0xae   :  { %v1486_v3 = vmul.f32 %v1482_v48, %v7700_v1 }
  0xaf   :  { %7108 = vmatmul.mubr.msk.f32.vlgmr.msra.gmra.mrb[0].mxu0 %vm140_vm2, %v7107_v46 }
  0xb0   :  { %7109 = vmatmul.mubr.msk.f32.vlgmr.msra.gmra.mrb[0].mxu1 %vm140_vm2, %v7107_v46  ;;  %1327 = vmatpush1.msra.mxu0 %v1317_v45  ;;  %v1473_v51 = vpop.permute.xlu0 %1472  ;;  %v1479_v52 = vpop.permute.xlu1 %1478  ;;  %v1490_v54 = vmul.f32 %v1486_v3, %v7608_v55  ;;  %v7406_v46 = vmov 0  }
  0xb1   :  { %1398 = vmatpush1.msra.mxu1 %v1319_v0  ;;  %v1483_v56 = vsel %vm1480_vm8, %v1473_v51, %v1475_v47  ;;  %v1481_v62 = vsel %vm1480_vm8, %v1477_v4, %v1479_v52  ;;  %v1484_v5 = vsel %vm1480_vm8, %v1479_v52, %v1473_v51  ;;  %1390 = vmatprep.mubr.f32.mxu0 %v7397_v2 }
  0xb2   :  { %v1485_v6 = vmul.f32 %v1483_v56, %v7719_v57  ;;  %v1487_v12 = vmul.f32 %v1481_v62, %v7722_v59  ;;  %v1488_v13 = vmul.f32 %v1484_v5, %v7725_v61  ;;  %1461 = vmatprep.mubr.f32.mxu1 %v7397_v2  ;;  %1498 = vmatprep.subr.mxu0 %v1490_v54  ;;  %v7807_v56 = vld [vmem:[%s8670_s2] sm:$0xff] }
  0xb3   :  { %7364 = vset.pattern.permute.xlu0 %v7406_v46  ;;  %7365 = vset.pattern.permute.xlu1 %v7406_v46 }
  0xb4   :  { %v1489_v14 = vmul.f32 %v1485_v6, %v7619_v60  ;;  %v1492_v20 = vmul.f32 %v1488_v13, %v7624_v63  ;;  %v1491_v21 = vmul.f32 %v1487_v12, %v7615_v58  ;;  %v7813_v6 = vld [vmem:[%s8671_s3] sm:$0xff] }
  0xb6   :  { %1569 = vmatprep.subr.mxu1 %v1492_v20 }
  0xb7   :  { %7111 = vmatmul.mubr.msk.f32.vlgmr.msra.gmra.mrb[0].mxu0 %vm140_vm2, %v7110_v19 }
  0xb8   :  { %7112 = vmatmul.mubr.msk.f32.vlgmr.msra.gmra.mrb[0].mxu1 %vm140_vm2, %v7110_v19  ;;  %1499 = vmatpush1.msra.mxu0 %v1489_v14 }
  0xb9   :  { %1570 = vmatpush1.msra.mxu1 %v1491_v21  ;;  %1562 = vmatprep.mubr.f32.mxu0 %v7397_v2 }
  0xba   :  { %1633 = vmatprep.mubr.f32.mxu1 %v7397_v2 }
  0xbf   :  { %7114 = vmatmul.mubr.msk.f32.vlgmr.msra.gmra.mrb[0].mxu0 %vm140_vm2, %v7113_v22 }
  0xc0   :  { %7115 = vmatmul.mubr.msk.f32.vlgmr.msra.gmra.mrb[0].mxu1 %vm140_vm2, %v7113_v22  ;;  %1847 = vmatprep.mubr.f32.mxu0 %v7397_v2 }
  0xc1   :  { %1918 = vmatprep.mubr.f32.mxu1 %v7397_v2 }
 0x192   :  { %v1564_v23 = vpop.f32.mrb[0].mxu0 }
 0x193   :  { %v1650_v24 = vmul.f32 %v1564_v23, %v1564_v23  ;;  %v1566_v25 = vpop.f32.mrb[1].mxu0  ;;  %v1635_v26 = vpop.f32.mrb[0].mxu1 }
 0x194   :  { %v1644_v28 = vadd.f32 %v1566_v25, %v1564_v23  ;;  %v1651_v29 = vmul.f32 %v1566_v25, %v1566_v25  ;;  %v1637_v30 = vpop.f32.mrb[1].mxu1  ;;  %v1652_v31 = vmul.f32 %v1635_v26, %v1635_v26 }
 0x195   :  { %v1653_v42 = vmul.f32 %v1637_v30, %v1637_v30 }
 0x196   :  { %v1645_v32 = vadd.f32 %v1644_v28, %v1635_v26  ;;  %v1654_v39 = vadd.f32 %v1651_v29, %v1650_v24 }
 0x198   :  { %v1646_v40 = vadd.f32 %v1645_v32, %v1637_v30  ;;  %v1655_v43 = vadd.f32 %v1654_v39, %v1652_v31 }
 0x19a   :  { %1647 = vadd.xlane.f32.xlu0 %v1646_v40  ;;  %v1656_v45 = vadd.f32 %v1655_v43, %v1653_v42 }
 0x19c   :  { %1657 = vadd.xlane.f32.xlu1 %v1656_v45  ;;  %v7083_v45 = vld [vmem:[%s8668_s4 + $0x21] ss:$8 sm:$0xf] }
 0x227   :  { %v1648_v47 = vpop.xlane.xlu0 %1647 }
 0x228   :  { %v1649_v4 = vmul.f32 0.001953125, %v1648_v47 }
 0x229   :  { %v1658_v0 = vpop.xlane.xlu1 %1657 }
 0x22a   :  { %v1660_v48 = vmul.f32 %v1649_v4, %v1649_v4  ;;  %v1659_v3 = vmul.f32 0.001953125, %v1658_v0 }
 0x22c   :  { %v1661_v51 = vsub.f32 %v1659_v3, %v1660_v48 }
 0x22e   :  { %v1662_v52 = vmax.f32 %v1661_v51, 0.0 }
 0x230   :  { %v1664_v54 = vadd.f32 1e-05, %v1662_v52  ;;  %v1757_v52 = vrot.slane %v7083_v45, %v7531_v11 }
 0x232   :  { %7375 = vrsqrt.f32 %v1664_v54 }
 0x23c   :  { %v7376_v62 = vpop.eup %7375 }
 0x23d   :  { %v1666_v5 = vmul.f32 %v7376_v62, %v7807_v56 }
 0x23f   :  { %1672 = vperm.xlu0 %7364, %v1666_v5   ;;  %v1668_v12 = vmul.f32 %v1666_v5, %v1649_v4  ;;  %v1761_v4 = vrot.slane %v7083_v45, %v7527_v9 }
 0x241   :  { %v1669_v13 = vsub.f32 %v7813_v6, %v1668_v12 }
 0x243   :  { %1681 = vperm.xlu1 %7365, %v1669_v13   ;;  %v1765_v13 = vrot.slane %v7083_v45, %v7529_v10 }
 0x2be   :  { %v1673_v14 = vpop.permute.xlu0 %1672 }
 0x2bf   :  { %v1675_v19 = vmul.f32 %v1673_v14, %v1564_v23  ;;  %v1678_v20 = vmul.f32 %v1673_v14, %v1637_v30  ;;  %v1676_v21 = vmul.f32 %v1673_v14, %v1566_v25  ;;  %v1677_v23 = vmul.f32 %v1673_v14, %v1635_v26 }
 0x2c0   :  { %v1769_v14 = vrot.slane %v7083_v45, %v7525_v8 }
 0x2c2   :  { %v1682_v22 = vpop.permute.xlu1 %1681 }
 0x2c3   :  { %v1684_v24 = vadd.f32 %v1682_v22, %v1675_v19  ;;  %v1687_v28 = vadd.f32 %v1682_v22, %v1678_v20  ;;  %v1685_v29 = vadd.f32 %v1682_v22, %v1676_v21  ;;  %v1686_v25 = vadd.f32 %v1682_v22, %v1677_v23  ;;  %v7117_v19 = vld [vmem:[%s8669_s1 + $0x50] sm:$0xff] }
 0x2c5   :  { %vm1688_vm9 = vcmp.ge.f32.partialorder %v1684_v24, 0.0  ;;  %vm1691_vm10 = vcmp.ge.f32.partialorder %v1687_v28, 0.0  ;;  %v1692_v31 = vmul.f32 0.3, %v1684_v24  ;;  %v1695_v32 = vmul.f32 0.3, %v1687_v28 }
 0x2c6   :  { %v1693_v39 = vmul.f32 0.3, %v1685_v29  ;;  %vm1689_vm11 = vcmp.ge.f32.partialorder %v1685_v29, 0.0  ;;  %v1694_v43 = vmul.f32 0.3, %v1686_v25  ;;  %vm1690_vm12 = vcmp.ge.f32.partialorder %v1686_v25, 0.0 }
 0x2c7   :  { %v7816_v40 = vsel %vm1688_vm9, %v1684_v24, %v1692_v31  ;;  %v7818_v42 = vsel %vm1691_vm10, %v1687_v28, %v1695_v32  ;;  %v7082_v31 = vld [vmem:[%s8668_s4 + $0x20] ss:$8 sm:$0xf]  ;;  %vm3413_vm10 = vcmp.lt.s32.totalorder %v7523_v7, 48 }
 0x2c8   :  { %1740 = vrot.lane.b32.xlu1 %v7816_v40, %s7407_s18  ;;  %1706 = vrot.lane.b32.xlu0 %v7818_v42, %s7408_s19  ;;  %v7822_v30 = vsel %vm1689_vm11, %v1685_v29, %v1693_v39  ;;  %v7830_v26 = vsel %vm1690_vm12, %v1686_v25, %v1694_v43  ;;  %v1721_v39 = vrot.slane %v7082_v31, %v7527_v9  ;;  %vm3373_vm11 = vcmp.lt.s32.totalorder %v7523_v7, 64 }
 0x2c9   :  { %v1717_v25 = vrot.slane %v7082_v31, %v7531_v11  ;;  %vm3743_vm12 = vcmp.lt.s32.totalorder %v7523_v7, 32 }
 0x2cc   :  { %1742 = vrot.lane.b32.xlu1 %v7822_v30, %s7407_s18  ;;  %2070 = vrot.lane.b32.xlu0 %v7816_v40, %s7409_s20 }
 0x2d0   :  { %1746 = vrot.lane.b32.xlu1 %v7818_v42, %s7407_s18  ;;  %2076 = vrot.lane.b32.xlu0 %v7818_v42, %s7409_s20 }
 0x2d4   :  { %1744 = vrot.lane.b32.xlu1 %v7830_v26, %s7407_s18  ;;  %2259 = vrot.lane.b32.xlu0 %v7816_v40, %s7401_s29 }
 0x2d8   :  { %1700 = vrot.lane.b32.xlu1 %v7816_v40, %s7408_s19  ;;  %2265 = vrot.lane.b32.xlu0 %v7818_v42, %s7401_s29 }
 0x2dc   :  { %1702 = vrot.lane.b32.xlu1 %v7822_v30, %s7408_s19  ;;  %2579 = vrot.lane.b32.xlu0 %v7822_v30, %s7402_s30 }
 0x2e0   :  { %1704 = vrot.lane.b32.xlu1 %v7830_v26, %s7408_s19  ;;  %2577 = vrot.lane.b32.xlu0 %v7816_v40, %s7402_s30 }
 0x2e4   :  { %2072 = vrot.lane.b32.xlu1 %v7822_v30, %s7409_s20  ;;  %2746 = vrot.lane.b32.xlu0 %v7822_v30, %s7410_s21 }
 0x2e8   :  { %2074 = vrot.lane.b32.xlu1 %v7830_v26, %s7409_s20  ;;  %2744 = vrot.lane.b32.xlu0 %v7816_v40, %s7410_s21 }
 0x2ec   :  { %2261 = vrot.lane.b32.xlu1 %v7822_v30, %s7401_s29  ;;  %2935 = vrot.lane.b32.xlu0 %v7822_v30, %s7411_s23 }
 0x2f0   :  { %2263 = vrot.lane.b32.xlu1 %v7830_v26, %s7401_s29  ;;  %2933 = vrot.lane.b32.xlu0 %v7816_v40, %s7411_s23 }
 0x2f4   :  { %2581 = vrot.lane.b32.xlu1 %v7830_v26, %s7402_s30  ;;  %3124 = vrot.lane.b32.xlu0 %v7822_v30, %s7412_s24 }
 0x2f8   :  { %2583 = vrot.lane.b32.xlu1 %v7818_v42, %s7402_s30  ;;  %3122 = vrot.lane.b32.xlu0 %v7816_v40, %s7412_s24 }
 0x2fc   :  { %2748 = vrot.lane.b32.xlu1 %v7830_v26, %s7410_s21 }
 0x300   :  { %2750 = vrot.lane.b32.xlu1 %v7818_v42, %s7410_s21 }
 0x304   :  { %2937 = vrot.lane.b32.xlu1 %v7830_v26, %s7411_s23 }
 0x308   :  { %2939 = vrot.lane.b32.xlu1 %v7818_v42, %s7411_s23 }
 0x30c   :  { %3126 = vrot.lane.b32.xlu1 %v7830_v26, %s7412_s24 }
 0x310   :  { %3128 = vrot.lane.b32.xlu1 %v7818_v42, %s7412_s24 }
 0x33a   :  { %v1741_v46 = vpop.permute.xlu1 %1740  ;;  %v1707_v47 = vpop.permute.xlu0 %1706 }
 0x33e   :  { %v1743_v0 = vpop.permute.xlu1 %1742  ;;  %v2071_v48 = vpop.permute.xlu0 %2070 }
 0x33f   :  { %v1751_v3 = vsel %vm1748_vm13, %v1741_v46, %v1743_v0 }
 0x340   :  { %v1775_v51 = vmul.f32 %v1761_v4, %v1751_v3  ;;  %v1729_v3 = vrot.slane %v7082_v31, %v7525_v8 }
 0x342   :  { %1783 = vmatprep.subr.mxu0 %v1775_v51  ;;  %v1747_v54 = vpop.permute.xlu1 %1746  ;;  %v7880_v62 = vpop.permute.xlu0 %2076 }
 0x343   :  { %v1752_v5 = vsel %vm1748_vm13, %v1747_v54, %v1741_v46 }
 0x344   :  { %v1774_v12 = vmul.f32 %v1757_v52, %v1752_v5  ;;  %v7116_v52 = vld [vmem:[%s8669_s1 + $0x48] sm:$0xff] }
 0x346   :  { %1784 = vmatpush1.msra.mxu0 %v1774_v12  ;;  %v1745_v20 = vpop.permute.xlu1 %1744  ;;  %v7889_v21 = vpop.permute.xlu0 %2259 }
 0x347   :  { %v1749_v22 = vsel %vm1748_vm13, %v1745_v20, %v1747_v54  ;;  %v1750_v24 = vsel %vm1748_vm13, %v1743_v0, %v1745_v20  ;;  %7118 = vmatmul.mubr.msk.f32.vlgmr.msra.gmra.mrb[2].mxu0 %vm140_vm2, %v7117_v19  ;;  %v1725_v0 = vrot.slane %v7082_v31, %v7529_v10  ;;  %v7084_v54 = vld [vmem:[%s8668_s4 + $0x22] ss:$8 sm:$0xf]  ;;  %vm4417_vm13 = vcmp.lt.s32.totalorder %v7523_v7, 96 }
 0x348   :  { %v1776_v28 = vmul.f32 %v1765_v13, %v1750_v24  ;;  %v1777_v29 = vmul.f32 %v1769_v14, %v1749_v22  ;;  %1992 = vmatprep.mubr.f32.mxu0 %v7397_v2  ;;  %v7924_v22 = vrot.slane %v7084_v54, %v7527_v9  ;;  %v7927_v24 = vrot.slane %v7084_v54, %v7531_v11 }
 0x34a   :  { %1854 = vmatprep.subr.mxu1 %v1777_v29  ;;  %v1701_v32 = vpop.permute.xlu1 %1700  ;;  %v2266_v23 = vpop.permute.xlu0 %2265 }
 0x34b   :  { %1855 = vmatpush1.msra.mxu1 %v1776_v28  ;;  %v1712_v43 = vsel %vm1708_vm14, %v1707_v47, %v1701_v32 }
 0x34c   :  { %7119 = vmatmul.mubr.msk.f32.vlgmr.msra.gmra.mrb[2].mxu1 %vm140_vm2, %v7117_v19  ;;  %v1734_v51 = vmul.f32 %v1717_v25, %v1712_v43 }
 0x34d   :  { %2063 = vmatprep.mubr.f32.mxu1 %v7397_v2 }
 0x34e   :  { %v1703_v45 = vpop.permute.xlu1 %1702  ;;  %v2580_v12 = vpop.permute.xlu0 %2579 }
 0x34f   :  { %v1711_v46 = vsel %vm1708_vm14, %v1701_v32, %v1703_v45  ;;  %v7938_v32 = vrot.slane %v7084_v54, %v7529_v10 }
 0x350   :  { %v1735_v4 = vmul.f32 %v1721_v39, %v1711_v46  ;;  %v7941_v39 = vrot.slane %v7084_v54, %v7525_v8 }
 0x352   :  { %1928 = vmatprep.subr.mxu0 %v1735_v4  ;;  %v1705_v5 = vpop.permute.xlu1 %1704  ;;  %v2578_v43 = vpop.permute.xlu0 %2577 }
 0x353   :  { %v1709_v13 = vsel %vm1708_vm14, %v1705_v5, %v1707_v47  ;;  %v1710_v14 = vsel %vm1708_vm14, %v1703_v45, %v1705_v5  ;;  %1929 = vmatpush1.msra.mxu0 %v1734_v51  ;;  %v2082_v47 = vsel %vm2078_vm15, %v7880_v62, %v2071_v48  ;;  %v7122_v45 = vld [vmem:[%s8669_s1 + $0x58] sm:$0xff]  ;;  %v2270_v51 = vsel %vm632_vm4, %v2266_v23, %v7889_v21 }
 0x354   :  { %v1736_v19 = vmul.f32 %v1725_v0, %v1710_v14  ;;  %7120 = vmatmul.mubr.msk.f32.vlgmr.msra.gmra.mrb[2].mxu0 %vm140_vm2, %v7116_v52  ;;  %v1737_v20 = vmul.f32 %v1729_v3, %v1709_v13  ;;  %v2104_v25 = vmul.f32 %v7927_v24, %v2082_v47  ;;  %v2271_v13 = vmul.f32 %v2270_v51, %v7582_v38  ;;  %v7125_v14 = vld [vmem:[%s8669_s1 + $0x60] sm:$0xff] }
 0x355   :  { %2177 = vmatprep.mubr.f32.mxu0 %v7397_v2  ;;  %vm4606_vm14 = vcmp.lt.s32.totalorder %v7523_v7, 80 }
 0x356   :  { %1999 = vmatprep.subr.mxu1 %v1737_v20  ;;  %v2073_v28 = vpop.permute.xlu1 %2072  ;;  %v2747_v54 = vpop.permute.xlu0 %2746 }
 0x357   :  { %v2081_v29 = vsel %vm2078_vm15, %v2071_v48, %v2073_v28  ;;  %2000 = vmatpush1.msra.mxu1 %v1736_v19 }
 0x358   :  { %7121 = vmatmul.mubr.msk.f32.vlgmr.msra.gmra.mrb[2].mxu1 %vm140_vm2, %v7116_v52  ;;  %v2105_v31 = vmul.f32 %v7924_v22, %v2081_v29 }
 0x359   :  { %2248 = vmatprep.mubr.f32.mxu1 %v7397_v2 }
 0x35a   :  { %2113 = vmatprep.subr.mxu0 %v2105_v31  ;;  %v2075_v48 = vpop.permute.xlu1 %2074  ;;  %v2745_v38 = vpop.permute.xlu0 %2744 }
 0x35b   :  { %v2079_v46 = vsel %vm2078_vm15, %v2075_v48, %v7880_v62  ;;  %v2080_v4 = vsel %vm2078_vm15, %v2073_v28, %v2075_v48  ;;  %2114 = vmatpush1.msra.mxu0 %v2104_v25  ;;  %v2755_v48 = vsel %vm2752_vm1, %v2745_v38, %v2747_v54 }
 0x35c   :  { %v2106_v0 = vmul.f32 %v7938_v32, %v2080_v4  ;;  %7123 = vmatmul.mubr.msk.f32.vlgmr.msra.gmra.mrb[2].mxu0 %vm140_vm2, %v7122_v45  ;;  %v2107_v3 = vmul.f32 %v7941_v39, %v2079_v46 }
 0x35d   :  { %2344 = vmatprep.mubr.f32.mxu0 %v7397_v2 }
 0x35e   :  { %2184 = vmatprep.subr.mxu1 %v2107_v3  ;;  %v2262_v52 = vpop.permute.xlu1 %2261  ;;  %v2936_v31 = vpop.permute.xlu0 %2935  ;;  %v7131_v3 = vld [vmem:[%s8669_s1 + $0x70] sm:$0xff] }
 0x35f   :  { %v2269_v62 = vsel %vm632_vm4, %v7889_v21, %v2262_v52  ;;  %2185 = vmatpush1.msra.mxu1 %v2106_v0 }
 0x360   :  { %7124 = vmatmul.mubr.msk.f32.vlgmr.msra.gmra.mrb[2].mxu1 %vm140_vm2, %v7122_v45  ;;  %v2272_v5 = vmul.f32 %v2269_v62, %v7569_v33 }
 0x361   :  { %2415 = vmatprep.mubr.f32.mxu1 %v7397_v2 }
 0x362   :  { %2280 = vmatprep.subr.mxu0 %v2272_v5  ;;  %v2264_v19 = vpop.permute.xlu1 %2263  ;;  %v2934_v0 = vpop.permute.xlu0 %2933 }
 0x363   :  { %v2267_v20 = vsel %vm632_vm4, %v2264_v19, %v2266_v23  ;;  %v2268_v21 = vsel %vm632_vm4, %v2262_v52, %v2264_v19  ;;  %2281 = vmatpush1.msra.mxu0 %v2271_v13  ;;  %v7088_v52 = vld [vmem:[%s8668_s4 + $0x26] ss:$8 sm:$0xf]  ;;  %vm3130_vm4 = vcmp.lt.s32.totalorder %v7523_v7, 124 }
 0x364   :  { %v2273_v47 = vmul.f32 %v2268_v21, %v7579_v36  ;;  %7126 = vmatmul.mubr.msk.f32.vlgmr.msra.gmra.mrb[2].mxu0 %vm140_vm2, %v7125_v14  ;;  %2431 = vmatprep.subr.mxu0 %v7822_v30  ;;  %v2274_v33 = vmul.f32 %v2267_v20, %v7586_v41  ;;  %v2587_v36 = vsel %vm951_vm5, %v2578_v43, %v2580_v12  ;;  %v7197_v7 = vld [vmem:[%s8669_s1 + $0x120] sm:$0xff] }
 0x365   :  { %2432 = vmatpush1.msra.mxu0 %v7816_v40  ;;  %2495 = vmatprep.mubr.f32.mxu0 %v7397_v2  ;;  %v7128_v40 = vld [vmem:[%s8669_s1 + $0x68] sm:$0xff]  ;;  %v2589_v29 = vmul.f32 %v2587_v36, %v7619_v60  ;;  %v2950_v20 = vrot.slane %v7088_v52, %v7531_v11  ;;  %v7134_v36 = vld [vmem:[%s8669_s1 + $0x78] sm:$0xff] }
 0x366   :  { %2351 = vmatprep.subr.mxu1 %v2274_v33  ;;  %v2582_v28 = vpop.permute.xlu1 %2581  ;;  %v3125_v21 = vpop.permute.xlu0 %3124 }
 0x367   :  { %v2586_v23 = vsel %vm951_vm5, %v2580_v12, %v2582_v28  ;;  %2352 = vmatpush1.msra.mxu1 %v2273_v47  ;;  %v7087_v12 = vld [vmem:[%s8668_s4 + $0x25] ss:$8 sm:$0xf] }
 0x368   :  { %7127 = vmatmul.mubr.msk.f32.vlgmr.msra.gmra.mrb[2].mxu1 %vm140_vm2, %v7125_v14  ;;  %2502 = vmatprep.subr.mxu1 %v7818_v42  ;;  %v2590_v41 = vmul.f32 %v2586_v23, %v7608_v55  ;;  %v8003_v25 = vrot.slane %v7087_v12, %v7527_v9  ;;  %v8008_v45 = vrot.slane %v7087_v12, %v7531_v11 }
 0x369   :  { %2503 = vmatpush1.msra.mxu1 %v7830_v26  ;;  %2566 = vmatprep.mubr.f32.mxu1 %v7397_v2  ;;  %v8018_v4 = vrot.slane %v7087_v12, %v7525_v8  ;;  %v2954_v14 = vrot.slane %v7088_v52, %v7527_v9  ;;  %v2962_v23 = vrot.slane %v7088_v52, %v7525_v8 }
 0x36a   :  { %2598 = vmatprep.subr.mxu0 %v2590_v41  ;;  %v2584_v30 = vpop.permute.xlu1 %2583  ;;  %v2778_v51 = vmul.f32 %v8008_v45, %v2755_v48 }
 0x36b   :  { %v2588_v55 = vsel %vm951_vm5, %v2584_v30, %v2578_v43  ;;  %v2585_v42 = vsel %vm951_vm5, %v2582_v28, %v2584_v30  ;;  %v7089_v30 = vld [vmem:[%s8668_s4 + $0x27] ss:$8 sm:$0xf] }
 0x36c   :  { %v2592_v26 = vmul.f32 %v2588_v55, %v7624_v63  ;;  %7129 = vmatmul.mubr.msk.f32.vlgmr.msra.gmra.mrb[2].mxu0 %vm140_vm2, %v7128_v40  ;;  %v2591_v43 = vmul.f32 %v2585_v42, %v7615_v58  ;;  %v3143_v42 = vrot.slane %v7089_v30, %v7527_v9 }
 0x36d   :  { %2599 = vmatpush1.msra.mxu0 %v2589_v29  ;;  %2662 = vmatprep.mubr.f32.mxu0 %v7397_v2  ;;  %v2958_v29 = vrot.slane %v7088_v52, %v7529_v10 }
 0x36e   :  { %2669 = vmatprep.subr.mxu1 %v2592_v26  ;;  %v2749_v60 = vpop.permute.xlu1 %2748  ;;  %v3123_v26 = vpop.permute.xlu0 %3122 }
 0x36f   :  { %v2754_v63 = vsel %vm2752_vm1, %v2747_v54, %v2749_v60  ;;  %v8029_v54 = vrot.slane %v7087_v12, %v7529_v10 }
 0x370   :  { %v2779_v46 = vmul.f32 %v8003_v25, %v2754_v63  ;;  %7130 = vmatmul.mubr.msk.f32.vlgmr.msra.gmra.mrb[2].mxu1 %vm140_vm2, %v7128_v40 }
 0x371   :  { %2670 = vmatpush1.msra.mxu1 %v2591_v43  ;;  %2733 = vmatprep.mubr.f32.mxu1 %v7397_v2  ;;  %v3139_v43 = vrot.slane %v7089_v30, %v7531_v11 }
 0x372   :  { %2787 = vmatprep.subr.mxu0 %v2779_v46  ;;  %v2751_v58 = vpop.permute.xlu1 %2750  ;;  %v3133_v46 = vsel %vm3130_vm4, %v3123_v26, %v3125_v21 }
 0x373   :  { %v2756_v62 = vsel %vm2752_vm1, %v2751_v58, %v2745_v38  ;;  %v2753_v5 = vsel %vm2752_vm1, %v2749_v60, %v2751_v58  ;;  %v2944_v38 = vsel %vm2941_vm3, %v2934_v0, %v2936_v31  ;;  %v7137_v58 = vld [vmem:[%s8669_s1 + $0x80] sm:$0xff]  ;;  %v3156_v52 = vmul.f32 %v3139_v43, %v3133_v46 }
 0x374   :  { %v2781_v13 = vmul.f32 %v8018_v4, %v2756_v62  ;;  %7132 = vmatmul.mubr.msk.f32.vlgmr.msra.gmra.mrb[2].mxu0 %vm140_vm2, %v7131_v3  ;;  %v2780_v47 = vmul.f32 %v8029_v54, %v2753_v5  ;;  %v2967_v40 = vmul.f32 %v2950_v20, %v2944_v38  ;;  %v3147_v62 = vrot.slane %v7089_v30, %v7529_v10  ;;  %v7140_v20 = vld [vmem:[%s8669_s1 + $0x88] sm:$0xff] }
 0x375   :  { %2788 = vmatpush1.msra.mxu0 %v2778_v51  ;;  %2851 = vmatprep.mubr.f32.mxu0 %v7397_v2 }
 0x376   :  { %2858 = vmatprep.subr.mxu1 %v2781_v13  ;;  %v2938_v19 = vpop.permute.xlu1 %2937 }
 0x377   :  { %v2943_v33 = vsel %vm2941_vm3, %v2936_v31, %v2938_v19 }
 0x378   :  { %v2968_v28 = vmul.f32 %v2954_v14, %v2943_v33  ;;  %7133 = vmatmul.mubr.msk.f32.vlgmr.msra.gmra.mrb[2].mxu1 %vm140_vm2, %v7131_v3  ;;  %v3151_v3 = vrot.slane %v7089_v30, %v7525_v8 }
 0x379   :  { %2859 = vmatpush1.msra.mxu1 %v2780_v47  ;;  %2922 = vmatprep.mubr.f32.mxu1 %v7397_v2 }
 0x37a   :  { %2976 = vmatprep.subr.mxu0 %v2968_v28  ;;  %v2940_v41 = vpop.permute.xlu1 %2939 }
 0x37b   :  { %v2945_v12 = vsel %vm2941_vm3, %v2940_v41, %v2934_v0  ;;  %v2942_v31 = vsel %vm2941_vm3, %v2938_v19, %v2940_v41 }
 0x37c   :  { %v2970_v55 = vmul.f32 %v2962_v23, %v2945_v12  ;;  %7135 = vmatmul.mubr.msk.f32.vlgmr.msra.gmra.mrb[2].mxu0 %vm140_vm2, %v7134_v36  ;;  %v2969_v63 = vmul.f32 %v2958_v29, %v2942_v31 }
 0x37d   :  { %2977 = vmatpush1.msra.mxu0 %v2967_v40  ;;  %3040 = vmatprep.mubr.f32.mxu0 %v7397_v2 }
 0x37e   :  { %3047 = vmatprep.subr.mxu1 %v2970_v55  ;;  %v3127_v60 = vpop.permute.xlu1 %3126 }
 0x37f   :  { %v3132_v48 = vsel %vm3130_vm4, %v3125_v21, %v3127_v60 }
 0x380   :  { %v3157_v0 = vmul.f32 %v3143_v42, %v3132_v48  ;;  %7136 = vmatmul.mubr.msk.f32.vlgmr.msra.gmra.mrb[2].mxu1 %vm140_vm2, %v7134_v36  ;;  %v7413_v42 = vmov 1  }
 0x381   :  { %3048 = vmatpush1.msra.mxu1 %v2969_v63  ;;  %3111 = vmatprep.mubr.f32.mxu1 %v7397_v2 }
 0x382   :  { %3165 = vmatprep.subr.mxu0 %v3157_v0  ;;  %v3129_v51 = vpop.permute.xlu1 %3128  ;;  %7366 = vset.pattern.permute.xlu0 %v7413_v42 }
 0x383   :  { %v3134_v5 = vsel %vm3130_vm4, %v3129_v51, %v3123_v26  ;;  %v3131_v13 = vsel %vm3130_vm4, %v3127_v60, %v3129_v51  ;;  %7367 = vset.pattern.permute.xlu1 %v7413_v42  ;;  %v8171_v42 = vld [vmem:[%s8667_s0] sm:$0xff] }
 0x384   :  { %v3159_v14 = vmul.f32 %v3151_v3, %v3134_v5  ;;  %7138 = vmatmul.mubr.msk.f32.vlgmr.msra.gmra.mrb[2].mxu0 %vm140_vm2, %v7137_v58  ;;  %v3158_v19 = vmul.f32 %v3147_v62, %v3131_v13 }
 0x385   :  { %3166 = vmatpush1.msra.mxu0 %v3156_v52  ;;  %3229 = vmatprep.mubr.f32.mxu0 %v7397_v2 }
 0x386   :  { %3236 = vmatprep.subr.mxu1 %v3159_v14 }
 0x388   :  { %7139 = vmatmul.mubr.msk.f32.vlgmr.msra.gmra.mrb[2].mxu1 %vm140_vm2, %v7137_v58 }
 0x389   :  { %3237 = vmatpush1.msra.mxu1 %v3158_v19  ;;  %3300 = vmatprep.mubr.f32.mxu1 %v7397_v2 }
 0x38c   :  { %7141 = vmatmul.mubr.msk.f32.vlgmr.msra.gmra.mrb[2].mxu0 %vm140_vm2, %v7140_v20 }
 0x38d   :  { %3512 = vmatprep.mubr.f32.mxu0 %v7397_v2 }
 0x390   :  { %7142 = vmatmul.mubr.msk.f32.vlgmr.msra.gmra.mrb[2].mxu1 %vm140_vm2, %v7140_v20 }
 0x391   :  { %3583 = vmatprep.mubr.f32.mxu1 %v7397_v2 }
 0x45f   :  { %v3231_v21 = vpop.f32.mrb[2].mxu0 }
 0x460   :  { %v3317_v47 = vmul.f32 %v3231_v21, %v3231_v21  ;;  %v3233_v33 = vpop.f32.mrb[3].mxu0 }
 0x461   :  { %v3311_v38 = vadd.f32 %v3233_v33, %v3231_v21  ;;  %v3318_v28 = vmul.f32 %v3233_v33, %v3233_v33 }
 0x463   :  { %v3302_v23 = vpop.f32.mrb[2].mxu1  ;;  %v3321_v36 = vadd.f32 %v3318_v28, %v3317_v47 }
 0x464   :  { %v3319_v41 = vmul.f32 %v3302_v23, %v3302_v23  ;;  %v3304_v40 = vpop.f32.mrb[3].mxu1  ;;  %v3312_v30 = vadd.f32 %v3311_v38, %v3302_v23 }
 0x465   :  { %v3320_v29 = vmul.f32 %v3304_v40, %v3304_v40 }
 0x466   :  { %v3313_v12 = vadd.f32 %v3312_v30, %v3304_v40  ;;  %v3322_v31 = vadd.f32 %v3321_v36, %v3319_v41 }
 0x468   :  { %3314 = vadd.xlane.f32.xlu0 %v3313_v12  ;;  %v3323_v55 = vadd.f32 %v3322_v31, %v3320_v29 }
 0x46a   :  { %3324 = vadd.xlane.f32.xlu1 %v3323_v55  ;;  %v8164_v55 = vld [vmem:[%s8667_s0 + $0x18] sm:$0xff] }
 0x4f5   :  { %v3315_v26 = vpop.xlane.xlu0 %3314 }
 0x4f6   :  { %v3316_v60 = vmul.f32 0.001953125, %v3315_v26  ;;  %v7075_v26 = vld [vmem:[%s8668_s4 + $0x1] ss:$8 sm:$0xf] }
 0x4f7   :  { %v3325_v43 = vpop.xlane.xlu1 %3324 }
 0x4f8   :  { %v3327_v63 = vmul.f32 %v3316_v60, %v3316_v60  ;;  %v3326_v48 = vmul.f32 0.001953125, %v3325_v43 }
 0x4fa   :  { %v3328_v46 = vsub.f32 %v3326_v48, %v3327_v63  ;;  %v3426_v63 = vrot.slane %v7075_v26, %v7527_v9 }
 0x4fc   :  { %v3329_v0 = vmax.f32 %v3328_v46, 0.0 }
 0x4fe   :  { %v3330_v3 = vadd.f32 1e-05, %v3329_v0 }
 0x500   :  { %7377 = vrsqrt.f32 %v3330_v3 }
 0x50a   :  { %v7378_v58 = vpop.eup %7377 }
 0x50b   :  { %v3332_v51 = vmul.f32 %v7378_v58, %v7807_v56  ;;  %v3422_v58 = vrot.slane %v7075_v26, %v7531_v11 }
 0x50d   :  { %3337 = vperm.xlu0 %7366, %v3332_v51   ;;  %v3333_v52 = vmul.f32 %v3332_v51, %v3316_v60 }
 0x50f   :  { %v3334_v62 = vsub.f32 %v7813_v6, %v3333_v52 }
 0x511   :  { %3346 = vperm.xlu1 %7367, %v3334_v62  }
 0x58c   :  { %v3338_v5 = vpop.permute.xlu0 %3337 }
 0x58d   :  { %v3340_v13 = vmul.f32 %v3338_v5, %v3231_v21  ;;  %v3341_v14 = vmul.f32 %v3338_v5, %v3233_v33  ;;  %v3342_v19 = vmul.f32 %v3338_v5, %v3302_v23  ;;  %v3343_v36 = vmul.f32 %v3338_v5, %v3304_v40  ;;  %v8144_v23 = vld [vmem:[%s8667_s0 + $0x8] sm:$0xff]  ;;  %v8153_v40 = vld [vmem:[%s8667_s0 + $0x10] sm:$0xff] }
 0x590   :  { %v3347_v20 = vpop.permute.xlu1 %3346 }
 0x591   :  { %v3349_v47 = vadd.f32 %v3347_v20, %v3340_v13  ;;  %v3350_v38 = vadd.f32 %v3347_v20, %v3341_v14  ;;  %v3351_v28 = vadd.f32 %v3347_v20, %v3342_v19  ;;  %v3352_v29 = vadd.f32 %v3347_v20, %v3343_v36  ;;  %v7144_v19 = vld [vmem:[%s8669_s1 + $0x98] sm:$0xff] }
 0x592   :  { %v3430_v13 = vrot.slane %v7075_v26, %v7529_v10  ;;  %v3434_v14 = vrot.slane %v7075_v26, %v7525_v8 }
 0x593   :  { %vm3353_vm5 = vcmp.ge.f32.partialorder %v3349_v47, 0.0  ;;  %vm3354_vm6 = vcmp.ge.f32.partialorder %v3350_v38, 0.0  ;;  %v3357_v41 = vmul.f32 0.3, %v3349_v47  ;;  %v3358_v30 = vmul.f32 0.3, %v3350_v38 }
 0x594   :  { %v3359_v56 = vmul.f32 0.3, %v3351_v28  ;;  %vm3355_vm8 = vcmp.ge.f32.partialorder %v3351_v28, 0.0  ;;  %v3360_v6 = vmul.f32 0.3, %v3352_v29  ;;  %vm3356_vm9 = vcmp.ge.f32.partialorder %v3352_v29, 0.0 }
 0x595   :  { %v8093_v12 = vsel %vm3353_vm5, %v3349_v47, %v3357_v41  ;;  %v8095_v31 = vsel %vm3354_vm6, %v3350_v38, %v3358_v30  ;;  %v24_v38 = vld [vmem:[%s8668_s4] ss:$8 sm:$0xf] }
 0x596   :  { %3367 = vrot.lane.b32.xlu0 %v8095_v31, %s7414_s10  ;;  %3405 = vrot.lane.b32.xlu1 %v8093_v12, %s7415_s11  ;;  %v8099_v21 = vsel %vm3355_vm8, %v3351_v28, %v3359_v56  ;;  %v8103_v33 = vsel %vm3356_vm9, %v3352_v29, %v3360_v6  ;;  %v3386_v29 = vrot.slane %v24_v38, %v7527_v9 }
 0x59a   :  { %3369 = vrot.lane.b32.xlu0 %v8099_v21, %s7414_s10  ;;  %3407 = vrot.lane.b32.xlu1 %v8095_v31, %s7415_s11 }
 0x59e   :  { %3737 = vrot.lane.b32.xlu0 %v8095_v31, %s7416_s12  ;;  %3411 = vrot.lane.b32.xlu1 %v8103_v33, %s7415_s11 }
 0x5a2   :  { %3739 = vrot.lane.b32.xlu0 %v8099_v21, %s7416_s12  ;;  %3409 = vrot.lane.b32.xlu1 %v8099_v21, %s7415_s11 }
 0x5a6   :  { %3926 = vrot.lane.b32.xlu0 %v8095_v31, %s7398_s22  ;;  %3365 = vrot.lane.b32.xlu1 %v8093_v12, %s7414_s10 }
 0x5aa   :  { %3928 = vrot.lane.b32.xlu0 %v8099_v21, %s7398_s22  ;;  %3371 = vrot.lane.b32.xlu1 %v8103_v33, %s7414_s10 }
 0x5ae   :  { %4246 = vrot.lane.b32.xlu0 %v8099_v21, %s7404_s7  ;;  %3735 = vrot.lane.b32.xlu1 %v8093_v12, %s7416_s12 }
 0x5b2   :  { %4248 = vrot.lane.b32.xlu0 %v8103_v33, %s7404_s7  ;;  %3741 = vrot.lane.b32.xlu1 %v8103_v33, %s7416_s12 }
 0x5b6   :  { %4413 = vrot.lane.b32.xlu0 %v8099_v21, %s7417_s13  ;;  %3924 = vrot.lane.b32.xlu1 %v8093_v12, %s7398_s22 }
 0x5ba   :  { %4415 = vrot.lane.b32.xlu0 %v8103_v33, %s7417_s13  ;;  %3930 = vrot.lane.b32.xlu1 %v8103_v33, %s7398_s22 }
 0x5be   :  { %4602 = vrot.lane.b32.xlu0 %v8099_v21, %s7418_s14  ;;  %4244 = vrot.lane.b32.xlu1 %v8095_v31, %s7404_s7 }
 0x5c2   :  { %4604 = vrot.lane.b32.xlu0 %v8103_v33, %s7418_s14  ;;  %4242 = vrot.lane.b32.xlu1 %v8093_v12, %s7404_s7 }
 0x5c6   :  { %4411 = vrot.lane.b32.xlu1 %v8095_v31, %s7417_s13  ;;  %5019 = vrot.lane.b32.xlu0 %v8144_v23, %s7409_s20 }
 0x5ca   :  { %4409 = vrot.lane.b32.xlu1 %v8093_v12, %s7417_s13  ;;  %5021 = vrot.lane.b32.xlu0 %v8153_v40, %s7409_s20 }
 0x5ce   :  { %4600 = vrot.lane.b32.xlu1 %v8095_v31, %s7418_s14  ;;  %5633 = vrot.lane.b32.xlu0 %v8153_v40, %s7410_s21 }
 0x5d2   :  { %4598 = vrot.lane.b32.xlu1 %v8093_v12, %s7418_s14  ;;  %5635 = vrot.lane.b32.xlu0 %v8164_v55, %s7410_s21 }
 0x5d6   :  { %5017 = vrot.lane.b32.xlu1 %v8171_v42, %s7409_s20 }
 0x5da   :  { %5023 = vrot.lane.b32.xlu1 %v8164_v55, %s7409_s20 }
 0x5de   :  { %5631 = vrot.lane.b32.xlu1 %v8144_v23, %s7410_s21 }
 0x5e2   :  { %5629 = vrot.lane.b32.xlu1 %v8171_v42, %s7410_s21 }
 0x608   :  { %v3368_v60 = vpop.permute.xlu0 %3367  ;;  %v3406_v43 = vpop.permute.xlu1 %3405 }
 0x60c   :  { %v3370_v48 = vpop.permute.xlu0 %3369  ;;  %v3408_v46 = vpop.permute.xlu1 %3407 }
 0x60d   :  { %v3416_v0 = vsel %vm3413_vm10, %v3406_v43, %v3408_v46 }
 0x60e   :  { %v3440_v3 = vmul.f32 %v3426_v63, %v3416_v0  ;;  %v3382_v63 = vrot.slane %v24_v38, %v7531_v11  ;;  %v3390_v0 = vrot.slane %v24_v38, %v7529_v10 }
 0x610   :  { %v3738_v51 = vpop.permute.xlu0 %3737  ;;  %3448 = vmatprep.subr.mxu0 %v3440_v3  ;;  %v3412_v52 = vpop.permute.xlu1 %3411  ;;  %v8219_v3 = vsel %vm3373_vm11, %v3368_v60, %v3370_v48 }
 0x611   :  { %v3417_v62 = vsel %vm3413_vm10, %v3412_v52, %v3406_v43 }
 0x612   :  { %v3439_v5 = vmul.f32 %v3422_v58, %v3417_v62 }
 0x614   :  { %v3740_v20 = vpop.permute.xlu0 %3739  ;;  %3449 = vmatpush1.msra.mxu0 %v3439_v5  ;;  %v3410_v47 = vpop.permute.xlu1 %3409 }
 0x615   :  { %v3414_v28 = vsel %vm3413_vm10, %v3410_v47, %v3412_v52  ;;  %v3415_v36 = vsel %vm3413_vm10, %v3408_v46, %v3410_v47  ;;  %7145 = vmatmul.mubr.msk.f32.vlgmr.msra.gmra.mrb[4].mxu0 %vm140_vm2, %v7144_v19  ;;  %v3394_v46 = vrot.slane %v24_v38, %v7525_v8  ;;  %v7076_v52 = vld [vmem:[%s8668_s4 + $0x2] ss:$8 sm:$0xf]  ;;  %v3401_v47 = vmul.f32 %v3390_v0, %v8219_v3 }
 0x616   :  { %v3441_v41 = vmul.f32 %v3430_v13, %v3415_v36  ;;  %v3442_v30 = vmul.f32 %v3434_v14, %v3414_v28  ;;  %3657 = vmatprep.mubr.f32.mxu0 %v7397_v2 }
 0x618   :  { %3519 = vmatprep.subr.mxu1 %v3442_v30  ;;  %v3366_v56 = vpop.permute.xlu1 %3365  ;;  %v3927_v6 = vpop.permute.xlu0 %3926  ;;  %v8251_v30 = vrot.slane %v7076_v52, %v7525_v8 }
 0x619   :  { %v8209_v26 = vsel %vm3373_vm11, %v3366_v56, %v3368_v60  ;;  %3520 = vmatpush1.msra.mxu1 %v3441_v41  ;;  %v8235_v60 = vrot.slane %v7076_v52, %v7527_v9  ;;  %v8248_v41 = vrot.slane %v7076_v52, %v7531_v11 }
 0x61a   :  { %v3400_v43 = vmul.f32 %v3386_v29, %v8209_v26  ;;  %7146 = vmatmul.mubr.msk.f32.vlgmr.msra.gmra.mrb[4].mxu1 %vm140_vm2, %v7144_v19  ;;  %v7143_v19 = vld [vmem:[%s8669_s1 + $0x90] sm:$0xff]  ;;  %v8255_v29 = vrot.slane %v7076_v52, %v7529_v10  ;;  %v7149_v52 = vld [vmem:[%s8669_s1 + $0xa0] sm:$0xff] }
 0x61b   :  { %3728 = vmatprep.mubr.f32.mxu1 %v7397_v2 }
 0x61c   :  { %3593 = vmatprep.subr.mxu0 %v3400_v43  ;;  %v3372_v58 = vpop.permute.xlu1 %3371  ;;  %v3929_v38 = vpop.permute.xlu0 %3928 }
 0x61d   :  { %v8226_v62 = vsel %vm3373_vm11, %v3370_v48, %v3372_v58  ;;  %v8230_v5 = vsel %vm3373_vm11, %v3372_v58, %v3366_v56  ;;  %v3745_v56 = vsel %vm3743_vm12, %v3738_v51, %v3740_v20 }
 0x61e   :  { %v3399_v13 = vmul.f32 %v3382_v63, %v8230_v5  ;;  %v3402_v14 = vmul.f32 %v3394_v46, %v8226_v62 }
 0x620   :  { %3594 = vmatpush1.msra.mxu0 %v3399_v13  ;;  %3664 = vmatprep.subr.mxu1 %v3402_v14  ;;  %v3736_v48 = vpop.permute.xlu1 %3735  ;;  %v4247_v63 = vpop.permute.xlu0 %4246  ;;  %v3771_v14 = vmul.f32 %v8255_v29, %v3745_v56 }
 0x621   :  { %v3746_v28 = vsel %vm3743_vm12, %v3736_v48, %v3738_v51  ;;  %7147 = vmatmul.mubr.msk.f32.vlgmr.msra.gmra.mrb[4].mxu0 %vm140_vm2, %v7143_v19  ;;  %3665 = vmatpush1.msra.mxu1 %v3401_v47 }
 0x622   :  { %v3770_v36 = vmul.f32 %v8235_v60, %v3746_v28  ;;  %7148 = vmatmul.mubr.msk.f32.vlgmr.msra.gmra.mrb[4].mxu1 %vm140_vm2, %v7143_v19  ;;  %3842 = vmatprep.mubr.f32.mxu0 %v7397_v2 }
 0x623   :  { %3913 = vmatprep.mubr.f32.mxu1 %v7397_v2 }
 0x624   :  { %3778 = vmatprep.subr.mxu0 %v3770_v36  ;;  %v3742_v43 = vpop.permute.xlu1 %3741  ;;  %v4249_v47 = vpop.permute.xlu0 %4248 }
 0x625   :  { %v3744_v46 = vsel %vm3743_vm12, %v3740_v20, %v3742_v43  ;;  %v3747_v0 = vsel %vm3743_vm12, %v3742_v43, %v3736_v48  ;;  %v3933_v48 = vsel %vm129_vm0, %v3927_v6, %v3929_v38 }
 0x626   :  { %v3769_v58 = vmul.f32 %v8248_v41, %v3747_v0  ;;  %v3772_v13 = vmul.f32 %v8251_v30, %v3744_v46  ;;  %v7152_v0 = vld [vmem:[%s8669_s1 + $0xa8] sm:$0xff] }
 0x628   :  { %3779 = vmatpush1.msra.mxu0 %v3769_v58  ;;  %3849 = vmatprep.subr.mxu1 %v3772_v13  ;;  %v3925_v51 = vpop.permute.xlu1 %3924  ;;  %v3938_v58 = vmul.f32 %v3933_v48, %v7544_v17  ;;  %v4414_v13 = vpop.permute.xlu0 %4413  ;;  %v7155_v48 = vld [vmem:[%s8669_s1 + $0xb0] sm:$0xff] }
 0x629   :  { %v3934_v19 = vsel %vm129_vm0, %v3925_v51, %v3927_v6  ;;  %7150 = vmatmul.mubr.msk.f32.vlgmr.msra.gmra.mrb[4].mxu0 %vm140_vm2, %v7149_v52  ;;  %3850 = vmatpush1.msra.mxu1 %v3771_v14 }
 0x62a   :  { %v3937_v20 = vmul.f32 %v3934_v19, %v7541_v16  ;;  %7151 = vmatmul.mubr.msk.f32.vlgmr.msra.gmra.mrb[4].mxu1 %vm140_vm2, %v7149_v52  ;;  %4009 = vmatprep.mubr.f32.mxu0 %v7397_v2 }
 0x62b   :  { %4080 = vmatprep.mubr.f32.mxu1 %v7397_v2 }
 0x62c   :  { %3945 = vmatprep.subr.mxu0 %v3937_v20  ;;  %v3931_v28 = vpop.permute.xlu1 %3930 }
 0x62d   :  { %v3932_v36 = vsel %vm129_vm0, %v3929_v38, %v3931_v28  ;;  %v3935_v56 = vsel %vm129_vm0, %v3931_v28, %v3925_v51  ;;  %v7079_v51 = vld [vmem:[%s8668_s4 + $0x5] ss:$8 sm:$0xf]  ;;  %v4416_v28 = vpop.permute.xlu0 %4415 }
 0x62e   :  { %v3936_v43 = vmul.f32 %v3935_v56, %v7547_v18  ;;  %v3939_v46 = vmul.f32 %v3932_v36, %v7538_v15  ;;  %v8312_v20 = vrot.slane %v7079_v51, %v7527_v9 }
 0x630   :  { %3946 = vmatpush1.msra.mxu0 %v3936_v43  ;;  %4016 = vmatprep.subr.mxu1 %v3939_v46  ;;  %v4245_v6 = vpop.permute.xlu1 %4244  ;;  %v8325_v43 = vrot.slane %v7079_v51, %v7531_v11  ;;  %v8328_v46 = vrot.slane %v7079_v51, %v7525_v8 }
 0x631   :  { %v4251_v38 = vsel %vm1312_vm7, %v4245_v6, %v4247_v63  ;;  %7153 = vmatmul.mubr.msk.f32.vlgmr.msra.gmra.mrb[4].mxu0 %vm140_vm2, %v7152_v0  ;;  %4017 = vmatpush1.msra.mxu1 %v3938_v58  ;;  %v8333_v58 = vrot.slane %v7079_v51, %v7529_v10 }
 0x632   :  { %v4255_v52 = vmul.f32 %v4251_v38, %v7700_v1  ;;  %4096 = vmatprep.subr.mxu0 %v8095_v31  ;;  %7154 = vmatmul.mubr.msk.f32.vlgmr.msra.gmra.mrb[4].mxu1 %vm140_vm2, %v7152_v0  ;;  %v7080_v38 = vld [vmem:[%s8668_s4 + $0x6] ss:$8 sm:$0xf] }
 0x633   :  { %4097 = vmatpush1.msra.mxu0 %v8093_v12  ;;  %4167 = vmatprep.subr.mxu1 %v8103_v33  ;;  %v4250_v12 = vsel %vm1312_vm7, %v4247_v63, %v4249_v47  ;;  %v4619_v51 = vrot.slane %v7080_v38, %v7527_v9 }
 0x634   :  { %4168 = vmatpush1.msra.mxu1 %v8099_v21  ;;  %4263 = vmatprep.subr.mxu0 %v4255_v52  ;;  %v4243_v14 = vpop.permute.xlu1 %4242  ;;  %v4256_v56 = vmul.f32 %v4250_v12, %v7722_v59 }
 0x635   :  { %v4252_v19 = vsel %vm1312_vm7, %v4243_v14, %v4245_v6  ;;  %v4253_v31 = vsel %vm1312_vm7, %v4249_v47, %v4243_v14  ;;  %4160 = vmatprep.mubr.f32.mxu0 %v7397_v2  ;;  %4231 = vmatprep.mubr.f32.mxu1 %v7397_v2  ;;  %v4603_v6 = vpop.permute.xlu0 %4602 }
 0x636   :  { %v4254_v21 = vmul.f32 %v4252_v19, %v7719_v57  ;;  %v4257_v33 = vmul.f32 %v4253_v31, %v7725_v61  ;;  %v4418_v19 = vsel %vm4417_vm13, %v4414_v13, %v4416_v28 }
 0x638   :  { %4334 = vmatprep.subr.mxu1 %v4257_v33  ;;  %v4412_v36 = vpop.permute.xlu1 %4411 }
 0x639   :  { %v4419_v63 = vsel %vm4417_vm13, %v4412_v36, %v4414_v13  ;;  %7156 = vmatmul.mubr.msk.f32.vlgmr.msra.gmra.mrb[4].mxu0 %vm140_vm2, %v7155_v48  ;;  %v7081_v13 = vld [vmem:[%s8668_s4 + $0x7] ss:$8 sm:$0xf] }
 0x63a   :  { %v4444_v47 = vmul.f32 %v8312_v20, %v4419_v63  ;;  %4264 = vmatpush1.msra.mxu0 %v4254_v21  ;;  %7157 = vmatmul.mubr.msk.f32.vlgmr.msra.gmra.mrb[4].mxu1 %vm140_vm2, %v7155_v48  ;;  %v7158_v21 = vld [vmem:[%s8669_s1 + $0xb8] sm:$0xff]  ;;  %v4445_v48 = vmul.f32 %v8333_v58, %v4418_v19  ;;  %v4627_v63 = vrot.slane %v7080_v38, %v7525_v8 }
 0x63b   :  { %4335 = vmatpush1.msra.mxu1 %v4256_v56  ;;  %4327 = vmatprep.mubr.f32.mxu0 %v7397_v2  ;;  %v4615_v56 = vrot.slane %v7080_v38, %v7531_v11 }
 0x63c   :  { %4452 = vmatprep.subr.mxu0 %v4444_v47  ;;  %v4410_v0 = vpop.permute.xlu1 %4409  ;;  %4398 = vmatprep.mubr.f32.mxu1 %v7397_v2  ;;  %v4605_v47 = vpop.permute.xlu0 %4604 }
 0x63d   :  { %v4420_v52 = vsel %vm4417_vm13, %v4410_v0, %v4412_v36  ;;  %v4421_v14 = vsel %vm4417_vm13, %v4416_v28, %v4410_v0 }
 0x63e   :  { %v4443_v31 = vmul.f32 %v8325_v43, %v4420_v52  ;;  %v4446_v12 = vmul.f32 %v8328_v46, %v4421_v14  ;;  %v4795_v52 = vrot.slane %v7081_v13, %v7527_v9  ;;  %v4623_v14 = vrot.slane %v7080_v38, %v7529_v10 }
 0x640   :  { %4523 = vmatprep.subr.mxu1 %v4446_v12  ;;  %v4601_v33 = vpop.permute.xlu1 %4600  ;;  %v4803_v12 = vrot.slane %v7081_v13, %v7525_v8  ;;  %v4809_v9 = vmul.f32 %v4795_v52, %v8219_v3  ;;  %v4791_v8 = vrot.slane %v7081_v13, %v7531_v11 }
 0x641   :  { %v4608_v36 = vsel %vm4606_vm14, %v4601_v33, %v4603_v6  ;;  %7159 = vmatmul.mubr.msk.f32.vlgmr.msra.gmra.mrb[4].mxu0 %vm140_vm2, %v7158_v21 }
 0x642   :  { %v4633_v28 = vmul.f32 %v4619_v51, %v4608_v36  ;;  %4453 = vmatpush1.msra.mxu0 %v4443_v31  ;;  %7160 = vmatmul.mubr.msk.f32.vlgmr.msra.gmra.mrb[4].mxu1 %vm140_vm2, %v7158_v21  ;;  %v4607_v51 = vsel %vm4606_vm14, %v4603_v6, %v4605_v47  ;;  %v7161_v36 = vld [vmem:[%s8669_s1 + $0xc0] sm:$0xff]  ;;  %v4799_v6 = vrot.slane %v7081_v13, %v7529_v10 }
 0x643   :  { %4524 = vmatpush1.msra.mxu1 %v4445_v48  ;;  %4516 = vmatprep.mubr.f32.mxu0 %v7397_v2  ;;  %v4634_v38 = vmul.f32 %v4623_v14, %v4607_v51  ;;  %v7171_v14 = vld [vmem:[%s8669_s1 + $0xe0] sm:$0xff] }
 0x644   :  { %4641 = vmatprep.subr.mxu0 %v4633_v28  ;;  %v4599_v0 = vpop.permute.xlu1 %4598  ;;  %4587 = vmatprep.mubr.f32.mxu1 %v7397_v2  ;;  %v5020_v28 = vpop.permute.xlu0 %5019 }
 0x645   :  { %v4609_v19 = vsel %vm4606_vm14, %v4599_v0, %v4601_v33  ;;  %v4610_v31 = vsel %vm4606_vm14, %v4605_v47, %v4599_v0  ;;  %v4811_v33 = vmul.f32 %v4803_v12, %v8230_v5  ;;  %v7164_v5 = vld [vmem:[%s8669_s1 + $0xc8] sm:$0xff] }
 0x646   :  { %v4632_v21 = vmul.f32 %v4615_v56, %v4609_v19  ;;  %v4635_v48 = vmul.f32 %v4627_v63, %v4610_v31  ;;  %v4808_v56 = vmul.f32 %v4791_v8, %v8209_v26  ;;  %v4810_v63 = vmul.f32 %v4799_v6, %v8226_v62  ;;  %v7167_v26 = vld [vmem:[%s8669_s1 + $0xd0] sm:$0xff] }
 0x648   :  { %4712 = vmatprep.subr.mxu1 %v4635_v48  ;;  %v5018_v3 = vpop.permute.xlu1 %5017  ;;  %v5022_v11 = vpop.permute.xlu0 %5021 }
 0x649   :  { %7162 = vmatmul.mubr.msk.f32.vlgmr.msra.gmra.mrb[4].mxu0 %vm140_vm2, %v7161_v36  ;;  %v5027_v13 = vsel %vm2078_vm15, %v5018_v3, %v5020_v28 }
 0x64a   :  { %4642 = vmatpush1.msra.mxu0 %v4632_v21  ;;  %7163 = vmatmul.mubr.msk.f32.vlgmr.msra.gmra.mrb[4].mxu1 %vm140_vm2, %v7161_v36  ;;  %v5030_v47 = vmul.f32 %v5027_v13, %v7924_v22 }
 0x64b   :  { %4713 = vmatpush1.msra.mxu1 %v4634_v38  ;;  %4817 = vmatprep.subr.mxu0 %v4809_v9 }
 0x64c   :  { %4888 = vmatprep.subr.mxu1 %v4811_v33  ;;  %4705 = vmatprep.mubr.f32.mxu0 %v7397_v2  ;;  %v5024_v10 = vpop.permute.xlu1 %5023 }
 0x64d   :  { %4776 = vmatprep.mubr.f32.mxu1 %v7397_v2  ;;  %v5025_v62 = vsel %vm2078_vm15, %v5022_v11, %v5024_v10 }
 0x64e   :  { %v5032_v0 = vmul.f32 %v5025_v62, %v7941_v39 }
 0x651   :  { %7165 = vmatmul.mubr.msk.f32.vlgmr.msra.gmra.mrb[4].mxu0 %vm140_vm2, %v7164_v5 }
 0x652   :  { %4818 = vmatpush1.msra.mxu0 %v4808_v56  ;;  %7166 = vmatmul.mubr.msk.f32.vlgmr.msra.gmra.mrb[4].mxu1 %vm140_vm2, %v7164_v5 }
 0x653   :  { %4889 = vmatpush1.msra.mxu1 %v4810_v63  ;;  %5040 = vmatprep.subr.mxu0 %v7646_v27  ;;  %v5028_v27 = vsel %vm2078_vm15, %v5024_v10, %v5018_v3 }
 0x654   :  { %5111 = vmatprep.subr.mxu1 %v7666_v37  ;;  %4881 = vmatprep.mubr.f32.mxu0 %v7397_v2  ;;  %v5026_v37 = vsel %vm2078_vm15, %v5020_v28, %v5022_v11  ;;  %v5029_v52 = vmul.f32 %v5028_v27, %v7927_v24  ;;  %v7170_v24 = vld [vmem:[%s8669_s1 + $0xd8] sm:$0xff] }
 0x655   :  { %4952 = vmatprep.mubr.f32.mxu1 %v7397_v2  ;;  %v5031_v22 = vmul.f32 %v5026_v37, %v7938_v32 }
 0x659   :  { %7168 = vmatmul.mubr.msk.f32.vlgmr.msra.gmra.mrb[4].mxu0 %vm140_vm2, %v7167_v26 }
 0x65a   :  { %5041 = vmatpush1.msra.mxu0 %v7663_v35  ;;  %7169 = vmatmul.mubr.msk.f32.vlgmr.msra.gmra.mrb[4].mxu1 %vm140_vm2, %v7167_v26  ;;  %v5634_v35 = vpop.permute.xlu0 %5633 }
 0x65b   :  { %5112 = vmatpush1.msra.mxu1 %v7660_v34  ;;  %5104 = vmatprep.mubr.f32.mxu0 %v7397_v2  ;;  %v5632_v34 = vpop.permute.xlu1 %5631 }
 0x65c   :  { %5175 = vmatprep.mubr.f32.mxu1 %v7397_v2  ;;  %5185 = vmatprep.subr.mxu0 %v5030_v47 }
 0x65d   :  { %7172 = vmatmul.mubr.msk.f32.vlgmr.msra.gmra.mrb[6].mxu0 %vm140_vm2, %v7171_v14  ;;  %5256 = vmatprep.subr.mxu1 %v5032_v0 }
 0x65e   :  { %7173 = vmatmul.mubr.msk.f32.vlgmr.msra.gmra.mrb[6].mxu1 %vm140_vm2, %v7171_v14  ;;  %5186 = vmatpush1.msra.mxu0 %v5029_v52  ;;  %v5636_v39 = vpop.permute.xlu0 %5635  ;;  %v7419_v14 = vmov 3  }
 0x65f   :  { %5257 = vmatpush1.msra.mxu1 %v5031_v22  ;;  %5249 = vmatprep.mubr.f32.mxu0 %v7397_v2  ;;  %v5630_v32 = vpop.permute.xlu1 %5629  ;;  %v5637_v19 = vsel %vm2752_vm1, %v5634_v35, %v5636_v39 }
 0x660   :  { %5332 = vmatprep.subr.mxu0 %v8144_v23  ;;  %5320 = vmatprep.mubr.f32.mxu1 %v7397_v2  ;;  %v5638_v23 = vsel %vm2752_vm1, %v5632_v34, %v5634_v35 }
 0x661   :  { %5403 = vmatprep.subr.mxu1 %v8164_v55  ;;  %v7176_v55 = vld [vmem:[%s8669_s1 + $0xe8] sm:$0xff]  ;;  %7368 = vset.pattern.permute.xlu0 %v7419_v14 }
 0x662   :  { %7369 = vset.pattern.permute.xlu1 %v7419_v14  ;;  %v7186_v14 = vld [vmem:[%s8669_s1 + $0x108] sm:$0xff] }
 0x665   :  { %7174 = vmatmul.mubr.msk.f32.vlgmr.msra.gmra.mrb[6].mxu0 %vm140_vm2, %v7170_v24 }
 0x666   :  { %5333 = vmatpush1.msra.mxu0 %v8171_v42  ;;  %7175 = vmatmul.mubr.msk.f32.vlgmr.msra.gmra.mrb[6].mxu1 %vm140_vm2, %v7170_v24  ;;  %v5639_v42 = vsel %vm2752_vm1, %v5630_v32, %v5632_v34 }
 0x667   :  { %5404 = vmatpush1.msra.mxu1 %v8153_v40  ;;  %5483 = vmatprep.subr.mxu0 %v7680_v44  ;;  %v5640_v40 = vsel %vm2752_vm1, %v5636_v39, %v5630_v32  ;;  %v5642_v44 = vmul.f32 %v5638_v23, %v8003_v25  ;;  %v5641_v25 = vmul.f32 %v5639_v42, %v8008_v45  ;;  %v7182_v45 = vld [vmem:[%s8669_s1 + $0xf8] sm:$0xff] }
 0x668   :  { %5554 = vmatprep.subr.mxu1 %v7703_v49  ;;  %5396 = vmatprep.mubr.f32.mxu0 %v7397_v2  ;;  %v5644_v49 = vmul.f32 %v5640_v40, %v8018_v4 }
 0x669   :  { %5467 = vmatprep.mubr.f32.mxu1 %v7397_v2 }
 0x66d   :  { %7177 = vmatmul.mubr.msk.f32.vlgmr.msra.gmra.mrb[6].mxu0 %vm140_vm2, %v7176_v55 }
 0x66e   :  { %5484 = vmatpush1.msra.mxu0 %v7706_v50  ;;  %7178 = vmatmul.mubr.msk.f32.vlgmr.msra.gmra.mrb[6].mxu1 %vm140_vm2, %v7176_v55  ;;  %v7179_v50 = vld [vmem:[%s8669_s1 + $0xf0] sm:$0xff] }
 0x66f   :  { %5555 = vmatpush1.msra.mxu1 %v7713_v53  ;;  %5547 = vmatprep.mubr.f32.mxu0 %v7397_v2  ;;  %v5643_v53 = vmul.f32 %v5637_v19, %v8029_v54  ;;  %v8503_v19 = vld [vmem:[%s8671_s3] sm:$0xff] }
 0x670   :  { %5618 = vmatprep.mubr.f32.mxu1 %v7397_v2  ;;  %5650 = vmatprep.subr.mxu0 %v5642_v44  ;;  %v8497_v44 = vld [vmem:[%s8670_s2] sm:$0xff] }
 0x671   :  { %5721 = vmatprep.subr.mxu1 %v5644_v49 }
 0x675   :  { %7180 = vmatmul.mubr.msk.f32.vlgmr.msra.gmra.mrb[6].mxu0 %vm140_vm2, %v7179_v50 }
 0x676   :  { %7181 = vmatmul.mubr.msk.f32.vlgmr.msra.gmra.mrb[6].mxu1 %vm140_vm2, %v7179_v50  ;;  %5651 = vmatpush1.msra.mxu0 %v5641_v25 }
 0x677   :  { %5722 = vmatpush1.msra.mxu1 %v5643_v53  ;;  %5714 = vmatprep.mubr.f32.mxu0 %v7397_v2 }
 0x678   :  { %5785 = vmatprep.mubr.f32.mxu1 %v7397_v2 }
 0x67d   :  { %7183 = vmatmul.mubr.msk.f32.vlgmr.msra.gmra.mrb[6].mxu0 %vm140_vm2, %v7182_v45 }
 0x67e   :  { %7184 = vmatmul.mubr.msk.f32.vlgmr.msra.gmra.mrb[6].mxu1 %vm140_vm2, %v7182_v45  ;;  %5953 = vmatprep.mubr.f32.mxu0 %v7397_v2 }
 0x67f   :  { %6024 = vmatprep.mubr.f32.mxu1 %v7397_v2 }
 0x72c   :  { %v8470_v4 = vpop.f32.mrb[4].mxu0 }
 0x72d   :  { %v4969_v54 = vmul.f32 %v8470_v4, %v8470_v4  ;;  %v8474_v31 = vpop.f32.mrb[5].mxu0  ;;  %v8476_v12 = vpop.f32.mrb[4].mxu1 }
 0x72e   :  { %v4963_v51 = vadd.f32 %v8474_v31, %v8470_v4  ;;  %v4970_v21 = vmul.f32 %v8474_v31, %v8474_v31  ;;  %v8482_v48 = vpop.f32.mrb[5].mxu1  ;;  %v4971_v38 = vmul.f32 %v8476_v12, %v8476_v12 }
 0x72f   :  { %v4972_v6 = vmul.f32 %v8482_v48, %v8482_v48 }
 0x730   :  { %v4973_v36 = vadd.f32 %v4970_v21, %v4969_v54  ;;  %v4964_v9 = vadd.f32 %v4963_v51, %v8476_v12 }
 0x732   :  { %v4974_v33 = vadd.f32 %v4973_v36, %v4971_v38  ;;  %v8488_v8 = vadd.f32 %v4964_v9, %v8482_v48 }
 0x734   :  { %v8492_v3 = vadd.f32 %v4974_v33, %v4972_v6 }
 0x750   :  { %v5716_v28 = vpop.f32.mrb[6].mxu0 }
 0x751   :  { %v5802_v5 = vmul.f32 %v5716_v28, %v5716_v28  ;;  %v5718_v56 = vpop.f32.mrb[7].mxu0  ;;  %v5787_v63 = vpop.f32.mrb[6].mxu1 }
 0x752   :  { %v5796_v10 = vadd.f32 %v5718_v56, %v5716_v28  ;;  %v5803_v11 = vmul.f32 %v5718_v56, %v5718_v56  ;;  %v5789_v13 = vpop.f32.mrb[7].mxu1  ;;  %v5804_v27 = vmul.f32 %v5787_v63, %v5787_v63 }
 0x753   :  { %v5805_v0 = vmul.f32 %v5789_v13, %v5789_v13 }
 0x754   :  { %v5806_v26 = vadd.f32 %v5803_v11, %v5802_v5  ;;  %v5797_v62 = vadd.f32 %v5796_v10, %v5787_v63 }
 0x756   :  { %v5807_v47 = vadd.f32 %v5806_v26, %v5804_v27  ;;  %v5798_v37 = vadd.f32 %v5797_v62, %v5789_v13 }
 0x758   :  { %5799 = vadd.xlane.f32.xlu1 %v5798_v37  ;;  %v5808_v52 = vadd.f32 %v5807_v47, %v5805_v0 }
 0x75a   :  { %5809 = vadd.xlane.f32.xlu0 %v5808_v52 }
 0x7e5   :  { %v5800_v22 = vpop.xlane.xlu1 %5799 }
 0x7e6   :  { %v5801_v34 = vmul.f32 0.001953125, %v5800_v22 }
 0x7e7   :  { %v5810_v35 = vpop.xlane.xlu0 %5809 }
 0x7e8   :  { %v5812_v24 = vmul.f32 %v5801_v34, %v5801_v34  ;;  %v5811_v32 = vmul.f32 0.001953125, %v5810_v35 }
 0x7ea   :  { %v5813_v39 = vsub.f32 %v5811_v32, %v5812_v24 }
 0x7ec   :  { %v5814_v23 = vmax.f32 %v5813_v39, 0.0 }
 0x7ee   :  { %v5815_v55 = vadd.f32 1e-05, %v5814_v23 }
 0x7f0   :  { %7379 = vrsqrt.f32 %v5815_v55 }
 0x7fa   :  { %v7380_v40 = vpop.eup %7379 }
 0x7fb   :  { %v5817_v49 = vmul.f32 %v8497_v44, %v7380_v40 }
 0x7fd   :  { %5822 = vperm.xlu0 %7368, %v5817_v49   ;;  %v5818_v42 = vmul.f32 %v5817_v49, %v5801_v34 }
 0x7ff   :  { %v5819_v25 = vsub.f32 %v8503_v19, %v5818_v42 }
 0x801   :  { %5831 = vperm.xlu1 %7369, %v5819_v25  }
 0x87c   :  { %v5823_v50 = vpop.permute.xlu0 %5822 }
 0x87d   :  { %v5825_v53 = vmul.f32 %v5823_v50, %v5716_v28  ;;  %v5826_v45 = vmul.f32 %v5823_v50, %v5718_v56  ;;  %v5827_v54 = vmul.f32 %v5823_v50, %v5787_v63  ;;  %v5828_v38 = vmul.f32 %v5823_v50, %v5789_v13 }
 0x880   :  { %v5832_v51 = vpop.permute.xlu1 %5831 }
 0x881   :  { %v5834_v21 = vadd.f32 %v5832_v51, %v5825_v53  ;;  %v5835_v36 = vadd.f32 %v5832_v51, %v5826_v45  ;;  %v5836_v9 = vadd.f32 %v5832_v51, %v5827_v54  ;;  %v5837_v5 = vadd.f32 %v5832_v51, %v5828_v38  ;;  %v7185_v53 = vld [vmem:[%s8669_s1 + $0x100] sm:$0xff] }
 0x883   :  { %vm5840_vm15 = vcmp.ge.f32.partialorder %v5836_v9, 0.0  ;;  %v5844_v33 = vmul.f32 0.3, %v5836_v9  ;;  %vm5838_vm1 = vcmp.ge.f32.partialorder %v5834_v21, 0.0  ;;  %v5842_v6 = vmul.f32 0.3, %v5834_v21 }
 0x884   :  { %v5843_v26 = vmul.f32 0.3, %v5835_v36  ;;  %vm5839_vm3 = vcmp.ge.f32.partialorder %v5835_v36, 0.0  ;;  %v5845_v56 = vmul.f32 0.3, %v5837_v5  ;;  %vm5841_vm4 = vcmp.ge.f32.partialorder %v5837_v5, 0.0 }
 0x885   :  { %v8506_v10 = vsel %vm5840_vm15, %v5836_v9, %v5844_v33  ;;  %v8508_v11 = vsel %vm5838_vm1, %v5834_v21, %v5842_v6  ;;  %v7191_v33 = vld [vmem:[%s8669_s1 + $0x110] sm:$0xff] }
 0x886   :  { %5854 = vrot.lane.b32.xlu0 %v8506_v10, %s7416_s12  ;;  %5868 = vrot.lane.b32.xlu1 %v8508_v11, %s7398_s22  ;;  %v5847_v28 = vsel %vm5839_vm3, %v5835_v36, %v5843_v26  ;;  %v5849_v63 = vsel %vm5841_vm4, %v5837_v5, %v5845_v56 }
 0x88a   :  { %6331 = vrot.lane.b32.xlu0 %v8506_v10, %s7404_s7  ;;  %5870 = vrot.lane.b32.xlu1 %v5847_v28, %s7398_s22 }
 0x88e   :  { %6333 = vrot.lane.b32.xlu0 %v5849_v63, %s7404_s7  ;;  %5874 = vrot.lane.b32.xlu1 %v5849_v63, %s7398_s22 }
 0x892   :  { %6498 = vrot.lane.b32.xlu0 %v8506_v10, %s7417_s13  ;;  %5872 = vrot.lane.b32.xlu1 %v8506_v10, %s7398_s22 }
 0x896   :  { %6500 = vrot.lane.b32.xlu0 %v5849_v63, %s7417_s13  ;;  %5850 = vrot.lane.b32.xlu1 %v8508_v11, %s7416_s12 }
 0x89a   :  { %5852 = vrot.lane.b32.xlu1 %v5847_v28, %s7416_s12 }
 0x89e   :  { %5856 = vrot.lane.b32.xlu1 %v5849_v63, %s7416_s12 }
 0x8a2   :  { %6329 = vrot.lane.b32.xlu1 %v5847_v28, %s7404_s7 }
 0x8a6   :  { %6327 = vrot.lane.b32.xlu1 %v8508_v11, %s7404_s7 }
 0x8aa   :  { %6496 = vrot.lane.b32.xlu1 %v5847_v28, %s7417_s13 }
 0x8ae   :  { %6494 = vrot.lane.b32.xlu1 %v8508_v11, %s7417_s13 }
 0x8f8   :  { %v5869_v13 = vpop.permute.xlu1 %5868 }
 0x8fc   :  { %v5871_v62 = vpop.permute.xlu1 %5870 }
 0x8fd   :  { %v5878_v27 = vsel %vm129_vm0, %v5869_v13, %v5871_v62 }
 0x8fe   :  { %v5881_v47 = vmul.f32 %v5878_v27, %v7541_v16 }
 0x900   :  { %5889 = vmatprep.subr.mxu0 %v5881_v47  ;;  %v5875_v37 = vpop.permute.xlu1 %5874 }
 0x901   :  { %v5879_v0 = vsel %vm129_vm0, %v5875_v37, %v5869_v13 }
 0x902   :  { %v5880_v52 = vmul.f32 %v5879_v0, %v7547_v18  ;;  %v5855_v18 = vpop.permute.xlu0 %5854 }
 0x904   :  { %5890 = vmatpush1.msra.mxu0 %v5880_v52  ;;  %v5873_v22 = vpop.permute.xlu1 %5872 }
 0x905   :  { %v5876_v34 = vsel %vm129_vm0, %v5873_v22, %v5875_v37  ;;  %v5877_v35 = vsel %vm129_vm0, %v5871_v62, %v5873_v22  ;;  %7187 = vmatmul.mubr.msk.f32.vlgmr.msra.gmra.mrb[8].mxu0 %vm140_vm2, %v7186_v14 }
 0x906   :  { %v5882_v16 = vmul.f32 %v5877_v35, %v7544_v17  ;;  %v5883_v24 = vmul.f32 %v5876_v34, %v7538_v15  ;;  %6098 = vmatprep.mubr.f32.mxu0 %v7397_v2  ;;  %v6332_v23 = vpop.permute.xlu0 %6331 }
 0x908   :  { %5960 = vmatprep.subr.mxu1 %v5883_v24  ;;  %v5851_v32 = vpop.permute.xlu1 %5850  ;;  %v7420_v24 = vmov 4  }
 0x909   :  { %5961 = vmatpush1.msra.mxu1 %v5882_v16  ;;  %7370 = vset.pattern.permute.xlu0 %v7420_v24 }
 0x90a   :  { %7188 = vmatmul.mubr.msk.f32.vlgmr.msra.gmra.mrb[8].mxu1 %vm140_vm2, %v7186_v14  ;;  %7371 = vset.pattern.permute.xlu1 %v7420_v24  ;;  %v7200_v24 = vld [vmem:[%s8669_s1 + $0x128] sm:$0xff] }
 0x90b   :  { %6169 = vmatprep.mubr.f32.mxu1 %v7397_v2 }
 0x90c   :  { %v5853_v39 = vpop.permute.xlu1 %5852 }
 0x90d   :  { %v5860_v55 = vsel %vm3743_vm12, %v5851_v32, %v5853_v39  ;;  %v5859_v15 = vsel %vm3743_vm12, %v5853_v39, %v5855_v18 }
 0x90e   :  { %v5863_v40 = vmul.f32 %v5860_v55, %v8235_v60  ;;  %v6334_v60 = vpop.permute.xlu0 %6333  ;;  %v5864_v45 = vmul.f32 %v5859_v15, %v8255_v29 }
 0x910   :  { %6034 = vmatprep.subr.mxu0 %v5863_v40  ;;  %v5857_v17 = vpop.permute.xlu1 %5856 }
 0x911   :  { %v5858_v49 = vsel %vm3743_vm12, %v5855_v18, %v5857_v17  ;;  %v5861_v42 = vsel %vm3743_vm12, %v5857_v17, %v5851_v32 }
 0x912   :  { %v5862_v25 = vmul.f32 %v5861_v42, %v8248_v41  ;;  %v5865_v50 = vmul.f32 %v5858_v49, %v8251_v30  ;;  %v6499_v29 = vpop.permute.xlu0 %6498 }
 0x914   :  { %6035 = vmatpush1.msra.mxu0 %v5862_v25  ;;  %6105 = vmatprep.subr.mxu1 %v5865_v50  ;;  %v6330_v54 = vpop.permute.xlu1 %6329 }
 0x915   :  { %v6336_v51 = vsel %vm1312_vm7, %v6330_v54, %v6332_v23  ;;  %7189 = vmatmul.mubr.msk.f32.vlgmr.msra.gmra.mrb[8].mxu0 %vm140_vm2, %v7185_v53  ;;  %6106 = vmatpush1.msra.mxu1 %v5864_v45 }
 0x916   :  { %v6340_v41 = vmul.f32 %v6336_v51, %v7700_v1  ;;  %6181 = vmatprep.subr.mxu0 %v5847_v28  ;;  %7190 = vmatmul.mubr.msk.f32.vlgmr.msra.gmra.mrb[8].mxu1 %vm140_vm2, %v7185_v53  ;;  %v6335_v1 = vsel %vm1312_vm7, %v6332_v23, %v6334_v60 }
 0x917   :  { %6182 = vmatpush1.msra.mxu0 %v8508_v11  ;;  %6252 = vmatprep.subr.mxu1 %v5849_v63  ;;  %v6341_v5 = vmul.f32 %v6335_v1, %v7722_v59  ;;  %v7194_v63 = vld [vmem:[%s8669_s1 + $0x118] sm:$0xff] }
 0x918   :  { %6253 = vmatpush1.msra.mxu1 %v8506_v10  ;;  %6348 = vmatprep.subr.mxu0 %v6340_v41  ;;  %v6328_v30 = vpop.permute.xlu1 %6327 }
 0x919   :  { %v6337_v21 = vsel %vm1312_vm7, %v6328_v30, %v6330_v54  ;;  %v6338_v36 = vsel %vm1312_vm7, %v6334_v60, %v6328_v30  ;;  %6245 = vmatprep.mubr.f32.mxu0 %v7397_v2  ;;  %6316 = vmatprep.mubr.f32.mxu1 %v7397_v2 }
 0x91a   :  { %v6339_v9 = vmul.f32 %v6337_v21, %v7719_v57  ;;  %v6342_v38 = vmul.f32 %v6338_v36, %v7725_v61  ;;  %v6501_v57 = vpop.permute.xlu0 %6500  ;;  %v7421_v36 = vmov 2  }
 0x91c   :  { %6419 = vmatprep.subr.mxu1 %v6342_v38  ;;  %v6497_v6 = vpop.permute.xlu1 %6496 }
 0x91d   :  { %v6503_v10 = vsel %vm4417_vm13, %v6497_v6, %v6499_v29  ;;  %7192 = vmatmul.mubr.msk.f32.vlgmr.msra.gmra.mrb[8].mxu0 %vm140_vm2, %v7191_v33 }
 0x91e   :  { %v6507_v11 = vmul.f32 %v6503_v10, %v8312_v20  ;;  %6349 = vmatpush1.msra.mxu0 %v6339_v9  ;;  %7193 = vmatmul.mubr.msk.f32.vlgmr.msra.gmra.mrb[8].mxu1 %vm140_vm2, %v7191_v33  ;;  %v6502_v20 = vsel %vm4417_vm13, %v6499_v29, %v6501_v57 }
 0x91f   :  { %6420 = vmatpush1.msra.mxu1 %v6341_v5  ;;  %6412 = vmatprep.mubr.f32.mxu0 %v7397_v2  ;;  %v6508_v13 = vmul.f32 %v6502_v20, %v8333_v58 }
 0x920   :  { %6515 = vmatprep.subr.mxu0 %v6507_v11  ;;  %v6495_v61 = vpop.permute.xlu1 %6494  ;;  %6483 = vmatprep.mubr.f32.mxu1 %v7397_v2 }
 0x921   :  { %v6504_v59 = vsel %vm4417_vm13, %v6495_v61, %v6497_v6  ;;  %v6505_v26 = vsel %vm4417_vm13, %v6501_v57, %v6495_v61 }
 0x922   :  { %v6506_v28 = vmul.f32 %v6504_v59, %v8325_v43  ;;  %v6509_v56 = vmul.f32 %v6505_v26, %v8328_v46 }
 0x924   :  { %6586 = vmatprep.subr.mxu1 %v6509_v56 }
 0x925   :  { %7195 = vmatmul.mubr.msk.f32.vlgmr.msra.gmra.mrb[8].mxu0 %vm140_vm2, %v7194_v63 }
 0x926   :  { %6516 = vmatpush1.msra.mxu0 %v6506_v28  ;;  %7196 = vmatmul.mubr.msk.f32.vlgmr.msra.gmra.mrb[8].mxu1 %vm140_vm2, %v7194_v63 }
 0x927   :  { %6587 = vmatpush1.msra.mxu1 %v6508_v13  ;;  %6579 = vmatprep.mubr.f32.mxu0 %v7397_v2 }
 0x928   :  { %6650 = vmatprep.mubr.f32.mxu1 %v7397_v2 }
 0x92d   :  { %7198 = vmatmul.mubr.msk.f32.vlgmr.msra.gmra.mrb[8].mxu0 %vm140_vm2, %v7197_v7 }
 0x92e   :  { %7199 = vmatmul.mubr.msk.f32.vlgmr.msra.gmra.mrb[8].mxu1 %vm140_vm2, %v7197_v7  ;;  %6786 = vmatprep.mubr.f32.mxu0 %v7397_v2 }
 0x92f   :  { %6857 = vmatprep.mubr.f32.mxu1 %v7397_v2 }
 0xa00   :  { %v6581_v43 = vpop.f32.mrb[8].mxu0 }
 0xa01   :  { %v6667_v46 = vmul.f32 %v6581_v43, %v6581_v43  ;;  %v6583_v58 = vpop.f32.mrb[9].mxu0  ;;  %v6652_v62 = vpop.f32.mrb[8].mxu1 }
 0xa02   :  { %v6661_v27 = vadd.f32 %v6583_v58, %v6581_v43  ;;  %v6668_v47 = vmul.f32 %v6583_v58, %v6583_v58  ;;  %v6654_v37 = vpop.f32.mrb[9].mxu1  ;;  %v6669_v14 = vmul.f32 %v6652_v62, %v6652_v62 }
 0xa03   :  { %v6670_v35 = vmul.f32 %v6654_v37, %v6654_v37 }
 0xa04   :  { %v6671_v0 = vadd.f32 %v6668_v47, %v6667_v46  ;;  %v6662_v52 = vadd.f32 %v6661_v27, %v6652_v62 }
 0xa06   :  { %v6672_v22 = vadd.f32 %v6671_v0, %v6669_v14  ;;  %v6663_v34 = vadd.f32 %v6662_v52, %v6654_v37 }
 0xa08   :  { %6664 = vadd.xlane.f32.xlu1 %v6663_v34  ;;  %v6673_v16 = vadd.f32 %v6672_v22, %v6670_v35 }
 0xa0a   :  { %6674 = vadd.xlane.f32.xlu0 %v6673_v16 }
 0xa0c   :  { %4976 = vadd.xlane.f32.xlu1 %v8492_v3 }
 0xa0e   :  { %4966 = vadd.xlane.f32.xlu0 %v8488_v8 }
 0xa95   :  { %v6665_v18 = vpop.xlane.xlu1 %6664 }
 0xa96   :  { %v6666_v32 = vmul.f32 0.001953125, %v6665_v18 }
 0xa97   :  { %v6675_v39 = vpop.xlane.xlu0 %6674 }
 0xa98   :  { %v6677_v23 = vmul.f32 %v6666_v32, %v6666_v32  ;;  %v6676_v55 = vmul.f32 0.001953125, %v6675_v39 }
 0xa99   :  { %v4977_v15 = vpop.xlane.xlu1 %4976 }
 0xa9a   :  { %v6678_v40 = vsub.f32 %v6676_v55, %v6677_v23  ;;  %v4978_v50 = vmul.f32 0.001953125, %v4977_v15 }
 0xa9b   :  { %v4967_v17 = vpop.xlane.xlu0 %4966 }
 0xa9c   :  { %v6679_v49 = vmax.f32 %v6678_v40, 0.0  ;;  %v4968_v42 = vmul.f32 0.001953125, %v4967_v17 }
 0xa9e   :  { %v6680_v25 = vadd.f32 1e-05, %v6679_v49  ;;  %v4979_v53 = vmul.f32 %v4968_v42, %v4968_v42 }
 0xaa0   :  { %7381 = vrsqrt.f32 %v6680_v25  ;;  %v4980_v3 = vsub.f32 %v4978_v50, %v4979_v53 }
 0xaa2   :  { %v4981_v60 = vmax.f32 %v4980_v3, 0.0 }
 0xaa4   :  { %v4982_v8 = vadd.f32 1e-05, %v4981_v60 }
 0xaa6   :  { %7383 = vrsqrt.f32 %v4982_v8  ;;  %v7422_v8 = vmov 5  }
 0xaaa   :  { %v7382_v45 = vpop.eup %7381 }
 0xaab   :  { %v6682_v54 = vmul.f32 %v8497_v44, %v7382_v45 }
 0xaad   :  { %6687 = vperm.xlu0 %7370, %v6682_v54   ;;  %v6683_v51 = vmul.f32 %v6682_v54, %v6666_v32 }
 0xaaf   :  { %v6684_v41 = vsub.f32 %v8503_v19, %v6683_v51 }
 0xab0   :  { %v7384_v30 = vpop.eup %7383 }
 0xab1   :  { %v4984_v29 = vmul.f32 %v8497_v44, %v7384_v30  ;;  %6696 = vperm.xlu1 %7371, %v6684_v41   ;;  %7374 = vset.pattern.permute.xlu0 %v7422_v8 }
 0xab3   :  { %v4985_v21 = vmul.f32 %v4984_v29, %v4968_v42 }
 0xab5   :  { %7372 = vset.pattern.permute.xlu1 %v7421_v36  ;;  %v4986_v1 = vsub.f32 %v8503_v19, %v4985_v21 }
 0xab6   :  { %4989 = vperm.xlu1 %7372, %v4984_v29  }
 0xaba   :  { %4998 = vperm.xlu1 %7372, %v4986_v1  }
 0xabe   :  { %7373 = vset.pattern.permute.xlu1 %v7422_v8 }
 0xb2c   :  { %v6688_v9 = vpop.permute.xlu0 %6687 }
 0xb2d   :  { %v6690_v38 = vmul.f32 %v6688_v9, %v6581_v43  ;;  %v6691_v33 = vmul.f32 %v6688_v9, %v6583_v58  ;;  %v6692_v6 = vmul.f32 %v6688_v9, %v6652_v62  ;;  %v6693_v5 = vmul.f32 %v6688_v9, %v6654_v37  ;;  %v7201_v43 = vld [vmem:[%s8669_s1 + $0x130] sm:$0xff] }
 0xb30   :  { %v6697_v10 = vpop.permute.xlu1 %6696 }
 0xb31   :  { %v6699_v11 = vadd.f32 %v6697_v10, %v6690_v38  ;;  %v6700_v57 = vadd.f32 %v6697_v10, %v6691_v33  ;;  %v6701_v61 = vadd.f32 %v6697_v10, %v6692_v6  ;;  %v6702_v59 = vadd.f32 %v6697_v10, %v6693_v5 }
 0xb33   :  { %vm6704_vm0 = vcmp.ge.f32.partialorder %v6700_v57, 0.0  ;;  %v6708_v26 = vmul.f32 0.3, %v6700_v57  ;;  %vm6706_vm7 = vcmp.ge.f32.partialorder %v6702_v59, 0.0  ;;  %v6710_v20 = vmul.f32 0.3, %v6702_v59 }
 0xb34   :  { %vm6703_vm5 = vcmp.ge.f32.partialorder %v6699_v11, 0.0  ;;  %v6707_v28 = vmul.f32 0.3, %v6699_v11  ;;  %vm6705_vm6 = vcmp.ge.f32.partialorder %v6701_v61, 0.0  ;;  %v6709_v56 = vmul.f32 0.3, %v6701_v61 }
 0xb35   :  { %v4990_v63 = vpop.permute.xlu1 %4989  ;;  %v6712_v13 = vsel %vm6704_vm0, %v6700_v57, %v6708_v26  ;;  %v6714_v7 = vsel %vm6706_vm7, %v6702_v59, %v6710_v20 }
 0xb36   :  { %6722 = vmatprep.subr.mxu0 %v6712_v13  ;;  %v4992_v46 = vmul.f32 %v4990_v63, %v8470_v4  ;;  %6793 = vmatprep.subr.mxu1 %v6714_v7  ;;  %v6711_v58 = vsel %vm6703_vm5, %v6699_v11, %v6707_v28  ;;  %v6713_v62 = vsel %vm6705_vm6, %v6701_v61, %v6709_v56  ;;  %v7393_v56 = vld [vmem:[%s8667_s0] sm:$0xff]  ;;  %v7395_v13 = vld [vmem:[%s8667_s0 + $0x10] sm:$0xff] }
 0xb37   :  { %v4993_v27 = vmul.f32 %v4990_v63, %v8474_v31  ;;  %v4994_v47 = vmul.f32 %v4990_v63, %v8476_v12  ;;  %v4995_v37 = vmul.f32 %v4990_v63, %v8482_v48  ;;  %6723 = vmatpush1.msra.mxu0 %v6711_v58  ;;  %6794 = vmatpush1.msra.mxu1 %v6713_v62 }
 0xb38   :  { %7202 = vmatmul.mubr.msk.f32.vlgmr.msra.gmra.mrb[10].mxu0 %vm140_vm2, %v7201_v43  ;;  %7203 = vmatmul.mubr.msk.f32.vlgmr.msra.gmra.mrb[10].mxu1 %vm140_vm2, %v7201_v43  ;;  %v7396_v43 = vld [vmem:[%s8667_s0 + $0x18] sm:$0xff] }
 0xb39   :  { %v4999_v0 = vpop.permute.xlu1 %4998  ;;  %6931 = vmatprep.mubr.f32.mxu0 %v7397_v2  ;;  %7002 = vmatprep.mubr.f32.mxu1 %v7397_v2 }
 0xb3a   :  { %v5001_v52 = vadd.f32 %v4999_v0, %v4992_v46  ;;  %v5002_v14 = vadd.f32 %v4999_v0, %v4993_v27  ;;  %v5003_v22 = vadd.f32 %v4999_v0, %v4994_v47  ;;  %v5004_v4 = vadd.f32 %v4999_v0, %v4995_v37 }
 0xb3c   :  { %vm5006_vm8 = vcmp.ge.f32.partialorder %v5002_v14, 0.0  ;;  %v5010_v31 = vmul.f32 0.3, %v5002_v14  ;;  %vm5008_vm9 = vcmp.ge.f32.partialorder %v5004_v4, 0.0  ;;  %v5012_v12 = vmul.f32 0.3, %v5004_v4 }
 0xb3d   :  { %vm5005_vm10 = vcmp.ge.f32.partialorder %v5001_v52, 0.0  ;;  %v5009_v48 = vmul.f32 0.3, %v5001_v52  ;;  %vm5007_vm11 = vcmp.ge.f32.partialorder %v5003_v22, 0.0  ;;  %v5011_v34 = vmul.f32 0.3, %v5003_v22 }
 0xb3e   :  { %v5014_v35 = vsel %vm5006_vm8, %v5002_v14, %v5010_v31  ;;  %v5016_v16 = vsel %vm5008_vm9, %v5004_v4, %v5012_v12 }
 0xb3f   :  { %6867 = vmatprep.subr.mxu0 %v5014_v35  ;;  %6938 = vmatprep.subr.mxu1 %v5016_v16  ;;  %v5013_v18 = vsel %vm5005_vm10, %v5001_v52, %v5009_v48  ;;  %v5015_v32 = vsel %vm5007_vm11, %v5003_v22, %v5011_v34 }
 0xb40   :  { %6868 = vmatpush1.msra.mxu0 %v5013_v18  ;;  %6939 = vmatpush1.msra.mxu1 %v5015_v32 }
 0xb41   :  { %7204 = vmatmul.mubr.msk.f32.vlgmr.msra.gmra.mrb[10].mxu0 %vm140_vm2, %v7200_v24  ;;  %7205 = vmatmul.mubr.msk.f32.vlgmr.msra.gmra.mrb[10].mxu1 %vm140_vm2, %v7200_v24 }
 0xc14   :  { %v6933_v2 = vpop.f32.mrb[10].mxu0  ;;  %v7004_v39 = vpop.f32.mrb[10].mxu1 }
 0xc15   :  { %v7015_v23 = vmul.f32 %v6933_v2, %v6933_v2  ;;  %v6935_v55 = vpop.f32.mrb[11].mxu0  ;;  %v7006_v40 = vpop.f32.mrb[11].mxu1  ;;  %v7017_v25 = vmul.f32 %v7004_v39, %v7004_v39 }
 0xc16   :  { %v7009_v15 = vadd.f32 %v6935_v55, %v6933_v2  ;;  %v7016_v17 = vmul.f32 %v6935_v55, %v6935_v55  ;;  %v7018_v3 = vmul.f32 %v7006_v40, %v7006_v40 }
 0xc18   :  { %v7019_v49 = vadd.f32 %v7016_v17, %v7015_v23  ;;  %v7010_v42 = vadd.f32 %v7009_v15, %v7004_v39 }
 0xc1a   :  { %v7020_v50 = vadd.f32 %v7019_v49, %v7017_v25  ;;  %v7011_v53 = vadd.f32 %v7010_v42, %v7006_v40 }
 0xc1c   :  { %v7021_v60 = vadd.f32 %v7020_v50, %v7018_v3  ;;  %7012 = vadd.xlane.f32.xlu1 %v7011_v53 }
 0xc1e   :  { %7022 = vadd.xlane.f32.xlu0 %v7021_v60 }
 0xca9   :  { %v7013_v45 = vpop.xlane.xlu1 %7012 }
 0xcaa   :  { %v7014_v54 = vmul.f32 0.001953125, %v7013_v45 }
 0xcab   :  { %v7023_v51 = vpop.xlane.xlu0 %7022 }
 0xcac   :  { %v7025_v41 = vmul.f32 %v7014_v54, %v7014_v54  ;;  %v7024_v30 = vmul.f32 0.001953125, %v7023_v51 }
 0xcae   :  { %v7026_v29 = vsub.f32 %v7024_v30, %v7025_v41 }
 0xcb0   :  { %v7027_v21 = vmax.f32 %v7026_v29, 0.0 }
 0xcb2   :  { %v7028_v36 = vadd.f32 1e-05, %v7027_v21 }
 0xcb4   :  { %7385 = vrsqrt.f32 %v7028_v36 }
 0xcbe   :  { %v7386_v1 = vpop.eup %7385 }
 0xcbf   :  { %v7030_v9 = vmul.f32 %v8497_v44, %v7386_v1 }
 0xcc1   :  { %7035 = vperm.xlu1 %7373, %v7030_v9   ;;  %v7031_v38 = vmul.f32 %v7030_v9, %v7014_v54 }
 0xcc3   :  { %v7032_v33 = vsub.f32 %v8503_v19, %v7031_v38  ;;  %v7394_v19 = vld [vmem:[%s8667_s0 + $0x8] sm:$0xff] }
 0xcc5   :  { %7044 = vperm.xlu0 %7374, %v7032_v33  }
 0xd40   :  { %v7036_v6 = vpop.permute.xlu1 %7035 }
 0xd41   :  { %v7038_v5 = vmul.f32 %v7036_v6, %v6933_v2  ;;  %v7039_v10 = vmul.f32 %v7036_v6, %v6935_v55  ;;  %v7040_v11 = vmul.f32 %v7036_v6, %v7004_v39  ;;  %v7041_v57 = vmul.f32 %v7036_v6, %v7006_v40 }
 0xd44   :  { %v7045_v61 = vpop.permute.xlu0 %7044 }
 0xd45   :  { %v7047_v59 = vadd.f32 %v7045_v61, %v7038_v5  ;;  %v7048_v26 = vadd.f32 %v7045_v61, %v7039_v10  ;;  %v7049_v20 = vadd.f32 %v7045_v61, %v7040_v11  ;;  %v7050_v28 = vadd.f32 %v7045_v61, %v7041_v57 }
 0xd47   :  { %v7051_v44 = vadd.f32 %v7393_v56, %v7047_v59  ;;  %v7052_v63 = vadd.f32 %v7394_v19, %v7048_v26  ;;  %v7053_v7 = vadd.f32 %v7395_v13, %v7049_v20  ;;  %v7054_v46 = vadd.f32 %v7396_v43, %v7050_v28 }
 0xd49   :  { %vm7055_vm2 = vcmp.ge.f32.partialorder %v7051_v44, 0.0  ;;  %vm7056_vm12 = vcmp.ge.f32.partialorder %v7052_v63, 0.0  ;;  %vm7057_vm13 = vcmp.ge.f32.partialorder %v7053_v7, 0.0  ;;  %vm7058_vm14 = vcmp.ge.f32.partialorder %v7054_v46, 0.0 }
 0xd4a   :  { %v7059_v58 = vmul.f32 0.3, %v7051_v44  ;;  %v7060_v62 = vmul.f32 0.3, %v7052_v63  ;;  %v7061_v27 = vmul.f32 0.3, %v7053_v7 }
 0xd4b   :  { %v7062_v47 = vmul.f32 0.3, %v7054_v46 }
 0xd4c   :  { %v7063_v37 = vsel %vm7055_vm2, %v7051_v44, %v7059_v58  ;;  %v7064_v0 = vsel %vm7056_vm12, %v7052_v63, %v7060_v62  ;;  %v7065_v52 = vsel %vm7057_vm13, %v7053_v7, %v7061_v27 }
 0xd4d   :  { %v7066_v14 = vsel %vm7058_vm14, %v7054_v46, %v7062_v47  ;;  %7067 = vst [vmem:[%s8672_s5] sm:$0xff] %v7063_v37  ;;  %7068 = vst [vmem:[%s8672_s5 + $0x8] sm:$0xff] %v7064_v0 }
 0xd4e   :  { %7069 = vst [vmem:[%s8672_s5 + $0x10] sm:$0xff] %v7065_v52  ;;  %7070 = vst [vmem:[%s8672_s5 + $0x18] sm:$0xff] %v7066_v14 }

</bundles_post_ra>
